<compile_context>
chip_gen: v7x
topology: tpu7x:2x2x1
jax: 0.10.0
libtpu: 0.0.40
codegen_flags: <defaults>
</compile_context>

<pallas_src>
import functools

import jax
import jax.numpy as jnp
from jax.experimental import pallas as pl
from jax.experimental.pallas import tpu as pltpu

SUBLANE = 8
LANE = 128


def _round_up(n, m):
    return ((n + m - 1) // m) * m


# -----------------------------------------------------------------------------
# Kernel: fused 5-layer MLP (bf16 matmul + f32 bias + ReLU per layer), all
# weights VMEM-resident, one batch tile per grid step.
# -----------------------------------------------------------------------------
def _make_padqn_kernel(out_dims):
    """out_dims: per-layer (already padded) output widths, e.g. (256,512,1024,1024,128)."""
    offsets = []
    off = 0
    for d in out_dims:
        offsets.append(off)
        off += d
    n_layers = len(out_dims)

    def kernel(x_ref, w1_ref, w2_ref, w3_ref, w4_ref, w5_ref, b_ref, o_ref):
        w_refs = (w1_ref, w2_ref, w3_ref, w4_ref, w5_ref)
        h = x_ref[...]                                   # (tm, n_states) bf16
        for li, (w_ref, b_off, d) in enumerate(zip(w_refs, offsets, out_dims)):
            # bf16 MXU matmul, f32 accumulation.
            y = jnp.dot(h, w_ref[...], preferred_element_type=jnp.float32)
            y = jnp.maximum(y + b_ref[:, b_off:b_off + d], 0.0)   # bias + nn.ReLU
            # Keep the cross-layer live value in bf16 (halves spill traffic);
            # the last layer stays f32 for the output store.
            h = y if li == n_layers - 1 else y.astype(jnp.bfloat16)
        o_ref[...] = h                                   # lane-dense (tm, 128*k) store

    return kernel


# -----------------------------------------------------------------------------
# Parameter preprocessing (done ONCE per parameter set): cast weights to bf16,
# zero-pad the head to a lane multiple, concatenate all biases into one f32
# operand.
# -----------------------------------------------------------------------------
def prepare_params(params):
    """params: list of (W f32 (in,out), b f32 (1,out)).

    Returns (weights_bf16 tuple, bias_concat_f32, out_dims_padded tuple).
    """
    ws, bs, out_dims = [], [], []
    n_layers = len(params)
    for idx, (w, b) in enumerate(params):
        out = w.shape[1]
        if idx == n_layers - 1:
            out_p = _round_up(out, LANE)
            if out_p != out:
                w = jnp.pad(w, ((0, 0), (0, out_p - out)))
                b = jnp.pad(b.reshape(1, -1), ((0, 0), (0, out_p - out)))
            out = out_p
        ws.append(jnp.asarray(w, jnp.bfloat16))
        bs.append(jnp.asarray(b, jnp.float32).reshape(1, -1))
        out_dims.append(int(out))
    b_cat = jnp.concatenate(bs, axis=1)
    return tuple(ws), b_cat, tuple(out_dims)


# -----------------------------------------------------------------------------
# Forward wrapper: pad batch, build grid + BlockSpecs, call the kernel, slice.
# n_actions and out_dims are STATIC (shape-determining).
# -----------------------------------------------------------------------------
@functools.partial(jax.jit, static_argnames=("n_actions", "out_dims"))
def _padqn_forward_prepared(x, weights, b_cat, n_actions, out_dims):
    batch, n_states = x.shape
    out_last = out_dims[-1]

    # Batch tiling:
    #  - batch <= 128: single sublane-padded tile (weight-DMA bound; don't split).
    #  - 128 < batch <= 512: two tiles so the "parallel" axis feeds both v7x TCs.
    #  - batch > 512: tm = 256 to fill the 256-wide MXU (v6e/v7x).
    if batch <= LANE:
        tm = _round_up(max(batch, SUBLANE), SUBLANE)
    elif batch <= 4 * LANE:
        tm = _round_up((batch + 1) // 2, SUBLANE)
    else:
        tm = 2 * LANE
    padded_batch = _round_up(batch, tm)
    if padded_batch != batch:
        x = jnp.pad(x, ((0, padded_batch - batch), (0, 0)))
    x = x.astype(jnp.bfloat16)
    grid = (padded_batch // tm,)

    in_specs = [pl.BlockSpec((tm, n_states), lambda i: (i, 0))]             # x tile streams
    in_specs += [pl.BlockSpec(w.shape, lambda i: (0, 0)) for w in weights]  # weights VMEM-resident
    in_specs += [pl.BlockSpec(b_cat.shape, lambda i: (0, 0))]               # fused bias, resident
    out_spec = pl.BlockSpec((tm, out_last), lambda i: (i, 0))

    out = pl.pallas_call(
        _make_padqn_kernel(out_dims),
        out_shape=jax.ShapeDtypeStruct((padded_batch, out_last), jnp.float32),
        grid=grid,
        in_specs=in_specs,
        out_specs=out_spec,
        compiler_params=pltpu.CompilerParams(
            dimension_semantics=("parallel",),
            vmem_limit_bytes=32 << 20,
        ),
    )(x, *weights, b_cat)

    return out[:batch, :n_actions]


def make_padqn_forward(params):
    """Prepare parameters ONCE and return a fast forward(x) closure."""
    n_actions = int(params[-1][0].shape[1])
    weights, b_cat, out_dims = prepare_params(params)

    def forward(x):
        return _padqn_forward_prepared(x, weights, b_cat, n_actions, out_dims)

    return forward


def padqn_forward(x, params):
    """Convenience one-shot API. Prefer make_padqn_forward() for repeated calls."""
    return make_padqn_forward(params)(x)


# -----------------------------------------------------------------------------
# Deterministic parameter init (matches PyTorch nn.Linear default: U(-k, k),
# k = 1/sqrt(fan_in)).
# -----------------------------------------------------------------------------
def init_params(key, n_states, n_actions):
    dims = [n_states, 256, 512, 1024, 1024, n_actions]
    params = []
    for i in range(len(dims) - 1):
        fan_in, fan_out = dims[i], dims[i + 1]
        key, kw, kb = jax.random.split(key, 3)
        bound = 1.0 / jnp.sqrt(jnp.float32(fan_in))
        w = jax.random.uniform(kw, (fan_in, fan_out), jnp.float32, -bound, bound)
        b = jax.random.uniform(kb, (1, fan_out), jnp.float32, -bound, bound)
        params.append((w, b))
    return params


def reference_forward(x, params):
    """Pure-JAX reference mirroring the kernel's bf16-weight / f32-accum math."""
    h = x
    for w, b in params:
        y = jnp.dot(h.astype(jnp.bfloat16), w.astype(jnp.bfloat16),
                    preferred_element_type=jnp.float32) + b
        h = jnp.maximum(y, 0.0)
    return h


if __name__ == "__main__":
    n_states = 32     # small synthetic observation size
    n_actions = 8     # small synthetic action space
    batch = 2

    key = jax.random.PRNGKey(0)
    key, kx = jax.random.split(key)
    x = jax.random.normal(kx, (batch, n_states), jnp.float32)

    params = init_params(key, n_states, n_actions)

    # Prepare the parameters once; reuse the closure across calls.
    forward = make_padqn_forward(params)
    out = forward(x)
    out = jax.block_until_ready(out)

    ref = reference_forward(x, params)
    assert out.shape == (batch, n_actions)
    assert jnp.allclose(out, ref, atol=1e-2, rtol=1e-2), "mismatch vs JAX reference"

    # Note: per the PyTorch spec, the Q-value head DOES have a trailing ReLU.
    print("KERNEL_OK")
</pallas_src>

<mosaic_0001>
module attributes {stable_mosaic.version = 11 : i64} {
  func.func @kernel(%arg0: i32, %arg1: memref<8x32xbf16, #tpu.memory_space<vmem>>, %arg2: memref<32x256xbf16, #tpu.memory_space<vmem>>, %arg3: memref<256x512xbf16, #tpu.memory_space<vmem>>, %arg4: memref<512x1024xbf16, #tpu.memory_space<vmem>>, %arg5: memref<1024x1024xbf16, #tpu.memory_space<vmem>>, %arg6: memref<1024x128xbf16, #tpu.memory_space<vmem>>, %arg7: memref<1x2944xf32, #tpu.memory_space<vmem>>, %arg8: memref<8x128xf32, #tpu.memory_space<vmem>>) attributes {dimension_semantics = [#tpu.dimension_semantics<parallel>], iteration_bounds = array<i64: 1>, scalar_prefetch = 0 : i64, scratch_operands = 0 : i64, tpu.core_type = #tpu.core_type<tc>, window_params = [{transform_indices = @transform_0, window_bounds = array<i64: 8, 32>}, {pipeline_mode = #tpu.pipeline_mode<synchronous>, transform_indices = @transform_1, window_bounds = array<i64: 32, 256>}, {pipeline_mode = #tpu.pipeline_mode<synchronous>, transform_indices = @transform_2, window_bounds = array<i64: 256, 512>}, {pipeline_mode = #tpu.pipeline_mode<synchronous>, transform_indices = @transform_3, window_bounds = array<i64: 512, 1024>}, {pipeline_mode = #tpu.pipeline_mode<synchronous>, transform_indices = @transform_4, window_bounds = array<i64: 1024, 1024>}, {pipeline_mode = #tpu.pipeline_mode<synchronous>, transform_indices = @transform_5, window_bounds = array<i64: 1024, 128>}, {pipeline_mode = #tpu.pipeline_mode<synchronous>, transform_indices = @transform_6, window_bounds = array<i64: 1, 2944>}, {transform_indices = @transform_7, window_bounds = array<i64: 8, 128>}]} {
    %c0 = arith.constant 0 : index
    %c0_0 = arith.constant 0 : index
    %0 = vector.load %arg1[%c0, %c0_0] : memref<8x32xbf16, #tpu.memory_space<vmem>>, vector<8x32xbf16>
    %c0_1 = arith.constant 0 : index
    %c0_2 = arith.constant 0 : index
    %1 = vector.load %arg2[%c0_1, %c0_2] : memref<32x256xbf16, #tpu.memory_space<vmem>>, vector<32x256xbf16>
    %cst = arith.constant dense<0.000000e+00> : vector<8x256xf32>
    %2 = tpu.matmul %0, %1, %cst {dimension_numbers = #tpu.dot_dimension_numbers<[1], [0], [0], [1], [0, 0, 1, 1], [], []>} : vector<8x32xbf16>, vector<32x256xbf16>, vector<8x256xf32> -> vector<8x256xf32>
    %c0_3 = arith.constant 0 : index
    %c0_4 = arith.constant 0 : index
    %3 = vector.load %arg7[%c0_3, %c0_4] : memref<1x2944xf32, #tpu.memory_space<vmem>>, vector<1x256xf32>
    %4 = vector.broadcast %3 : vector<1x256xf32> to vector<8x256xf32>
    %5 = arith.addf %2, %4 : vector<8x256xf32>
    %cst_5 = arith.constant 0.000000e+00 : f32
    %6 = vector.broadcast %cst_5 : f32 to vector<8x256xf32>
    %7 = arith.maximumf %5, %6 : vector<8x256xf32>
    %8 = arith.truncf %7 : vector<8x256xf32> to vector<8x256xbf16>
    %c0_6 = arith.constant 0 : index
    %c0_7 = arith.constant 0 : index
    %9 = vector.load %arg3[%c0_6, %c0_7] : memref<256x512xbf16, #tpu.memory_space<vmem>>, vector<256x512xbf16>
    %cst_8 = arith.constant dense<0.000000e+00> : vector<8x512xf32>
    %10 = tpu.matmul %8, %9, %cst_8 {dimension_numbers = #tpu.dot_dimension_numbers<[1], [0], [0], [1], [0, 0, 1, 1], [], []>} : vector<8x256xbf16>, vector<256x512xbf16>, vector<8x512xf32> -> vector<8x512xf32>
    %c0_9 = arith.constant 0 : index
    %c256 = arith.constant 256 : index
    %11 = vector.load %arg7[%c0_9, %c256] : memref<1x2944xf32, #tpu.memory_space<vmem>>, vector<1x512xf32>
    %12 = vector.broadcast %11 : vector<1x512xf32> to vector<8x512xf32>
    %13 = arith.addf %10, %12 : vector<8x512xf32>
    %cst_10 = arith.constant 0.000000e+00 : f32
    %14 = vector.broadcast %cst_10 : f32 to vector<8x512xf32>
    %15 = arith.maximumf %13, %14 : vector<8x512xf32>
    %16 = arith.truncf %15 : vector<8x512xf32> to vector<8x512xbf16>
    %c0_11 = arith.constant 0 : index
    %c0_12 = arith.constant 0 : index
    %17 = vector.load %arg4[%c0_11, %c0_12] : memref<512x1024xbf16, #tpu.memory_space<vmem>>, vector<512x1024xbf16>
    %cst_13 = arith.constant dense<0.000000e+00> : vector<8x1024xf32>
    %18 = tpu.matmul %16, %17, %cst_13 {dimension_numbers = #tpu.dot_dimension_numbers<[1], [0], [0], [1], [0, 0, 1, 1], [], []>} : vector<8x512xbf16>, vector<512x1024xbf16>, vector<8x1024xf32> -> vector<8x1024xf32>
    %c0_14 = arith.constant 0 : index
    %c768 = arith.constant 768 : index
    %19 = vector.load %arg7[%c0_14, %c768] : memref<1x2944xf32, #tpu.memory_space<vmem>>, vector<1x1024xf32>
    %20 = vector.broadcast %19 : vector<1x1024xf32> to vector<8x1024xf32>
    %21 = arith.addf %18, %20 : vector<8x1024xf32>
    %cst_15 = arith.constant 0.000000e+00 : f32
    %22 = vector.broadcast %cst_15 : f32 to vector<8x1024xf32>
    %23 = arith.maximumf %21, %22 : vector<8x1024xf32>
    %24 = arith.truncf %23 : vector<8x1024xf32> to vector<8x1024xbf16>
    %c0_16 = arith.constant 0 : index
    %c0_17 = arith.constant 0 : index
    %25 = vector.load %arg5[%c0_16, %c0_17] : memref<1024x1024xbf16, #tpu.memory_space<vmem>>, vector<1024x1024xbf16>
    %cst_18 = arith.constant dense<0.000000e+00> : vector<8x1024xf32>
    %26 = tpu.matmul %24, %25, %cst_18 {dimension_numbers = #tpu.dot_dimension_numbers<[1], [0], [0], [1], [0, 0, 1, 1], [], []>} : vector<8x1024xbf16>, vector<1024x1024xbf16>, vector<8x1024xf32> -> vector<8x1024xf32>
    %c0_19 = arith.constant 0 : index
    %c1792 = arith.constant 1792 : index
    %27 = vector.load %arg7[%c0_19, %c1792] : memref<1x2944xf32, #tpu.memory_space<vmem>>, vector<1x1024xf32>
    %28 = vector.broadcast %27 : vector<1x1024xf32> to vector<8x1024xf32>
    %29 = arith.addf %26, %28 : vector<8x1024xf32>
    %cst_20 = arith.constant 0.000000e+00 : f32
    %30 = vector.broadcast %cst_20 : f32 to vector<8x1024xf32>
    %31 = arith.maximumf %29, %30 : vector<8x1024xf32>
    %32 = arith.truncf %31 : vector<8x1024xf32> to vector<8x1024xbf16>
    %c0_21 = arith.constant 0 : index
    %c0_22 = arith.constant 0 : index
    %33 = vector.load %arg6[%c0_21, %c0_22] : memref<1024x128xbf16, #tpu.memory_space<vmem>>, vector<1024x128xbf16>
    %cst_23 = arith.constant dense<0.000000e+00> : vector<8x128xf32>
    %34 = tpu.matmul %32, %33, %cst_23 {dimension_numbers = #tpu.dot_dimension_numbers<[1], [0], [0], [1], [0, 0, 1, 1], [], []>} : vector<8x1024xbf16>, vector<1024x128xbf16>, vector<8x128xf32> -> vector<8x128xf32>
    %c0_24 = arith.constant 0 : index
    %c2816 = arith.constant 2816 : index
    %35 = vector.load %arg7[%c0_24, %c2816] : memref<1x2944xf32, #tpu.memory_space<vmem>>, vector<1x128xf32>
    %36 = vector.broadcast %35 : vector<1x128xf32> to vector<8x128xf32>
    %37 = arith.addf %34, %36 : vector<8x128xf32>
    %cst_25 = arith.constant 0.000000e+00 : f32
    %38 = vector.broadcast %cst_25 : f32 to vector<8x128xf32>
    %39 = arith.maximumf %37, %38 : vector<8x128xf32>
    %c0_26 = arith.constant 0 : index
    %c0_27 = arith.constant 0 : index
    %40 = vector.load %arg8[%c0_26, %c0_27] : memref<8x128xf32, #tpu.memory_space<vmem>>, vector<8x128xf32>
    tpu.vector_store %arg8[%c0_26, %c0_27], %39 {strides = array<i32>} : memref<8x128xf32, #tpu.memory_space<vmem>>, vector<8x128xf32>,
    return
  }
  func.func @transform_0(%arg0: i32) -> (i32, i32) {
    %c0_i32 = arith.constant 0 : i32
    %c0_i32_0 = arith.constant 0 : i32
    return %arg0, %c0_i32 : i32, i32
  }
  func.func @transform_1(%arg0: i32) -> (i32, i32) {
    %c0_i32 = arith.constant 0 : i32
    %c0_i32_0 = arith.constant 0 : i32
    %c0_i32_1 = arith.constant 0 : i32
    return %c0_i32, %c0_i32_0 : i32, i32
  }
  func.func @transform_2(%arg0: i32) -> (i32, i32) {
    %c0_i32 = arith.constant 0 : i32
    %c0_i32_0 = arith.constant 0 : i32
    %c0_i32_1 = arith.constant 0 : i32
    return %c0_i32, %c0_i32_0 : i32, i32
  }
  func.func @transform_3(%arg0: i32) -> (i32, i32) {
    %c0_i32 = arith.constant 0 : i32
    %c0_i32_0 = arith.constant 0 : i32
    %c0_i32_1 = arith.constant 0 : i32
    return %c0_i32, %c0_i32_0 : i32, i32
  }
  func.func @transform_4(%arg0: i32) -> (i32, i32) {
    %c0_i32 = arith.constant 0 : i32
    %c0_i32_0 = arith.constant 0 : i32
    %c0_i32_1 = arith.constant 0 : i32
    return %c0_i32, %c0_i32_0 : i32, i32
  }
  func.func @transform_5(%arg0: i32) -> (i32, i32) {
    %c0_i32 = arith.constant 0 : i32
    %c0_i32_0 = arith.constant 0 : i32
    %c0_i32_1 = arith.constant 0 : i32
    return %c0_i32, %c0_i32_0 : i32, i32
  }
  func.func @transform_6(%arg0: i32) -> (i32, i32) {
    %c0_i32 = arith.constant 0 : i32
    %c0_i32_0 = arith.constant 0 : i32
    %c0_i32_1 = arith.constant 0 : i32
    return %c0_i32, %c0_i32_0 : i32, i32
  }
  func.func @transform_7(%arg0: i32) -> (i32, i32) {
    %c0_i32 = arith.constant 0 : i32
    %c0_i32_0 = arith.constant 0 : i32
    return %arg0, %c0_i32 : i32, i32
  }
}

</mosaic_0001>

<bundles_post_ra>
// kernel: _padqn_forward_prepared.1
= control target key start
LH: loop header
LB: loop body
LE: loop exit
PB: predicated region body
PF: predicated region fallthrough
CT: control target
= control target key end

     0   :  { %12 = vsyncpa [#allocation3], 0  ;;  %s8783_s0 = inlined_call_operand.vmem [shape: bf16[8,32], index: 0, kind: input, shape index: {}]   ;;  %s8784_s1 = inlined_call_operand.hbm [shape: bf16[32,256], index: 1, kind: input, shape index: {}]   ;;  %s8785_s2 = inlined_call_operand.hbm [shape: bf16[256,512], index: 2, kind: input, shape index: {}]   ;;  %s8786_s3 = inlined_call_operand.hbm [shape: bf16[512,1024], index: 3, kind: input, shape index: {}]   ;;  %s8787_s4 = inlined_call_operand.hbm [shape: bf16[1024,1024], index: 4, kind: input, shape index: {}]   ;;  %s8788_s5 = inlined_call_operand.hbm [shape: bf16[1024,128], index: 5, kind: input, shape index: {}]   ;;  %s8789_s6 = inlined_call_operand.hbm [shape: f32[1,2944], index: 6, kind: input, shape index: {}]   ;;  %s8790_s7 = inlined_call_operand.vmem [shape: f32[8,128], index: 7, kind: output, shape index: {}]  }
   0x1   :  { %13 = vsyncpa [#allocation5], 0 }
   0x2   :  { %14 = vsyncpa [#allocation8], 0 }
   0x3   :  { %15 = vsyncpa [#allocation11], 0  ;;  %s8478_s24 = smov [#allocation4]   ;;  %s8338_s28 = scalar_lea.hbm %s8785_s2, 8192 }
   0x4   :  { %s35_s25 = sshll.u32 %s8478_s24, 4  ;;  %p8339_p0 = scmp.ne.s32.totalorder %s8785_s2, %s8338_s28  ;;  %s36_s25 = int_to_ptr.vmem [resolvable:$true] %s35_s25 }
   0x5   :  { %p8342_p1 = scmp.lt.u32.totalorder %s8338_s28, %s8785_s2 }
   0x7   :  { %p8344_p2 = pnand %p8342_p1, %p8339_p0 }
   0x9   :  { %8347 = shalt.err (!%p8344_p2)
}
   0xa   :  { %s8348_s10 = scalar_lea.vmem %s36_s25, 8192  ;;  %p8353_p4 = scmp.lt.s32.totalorder %s36_s25, %s36_s25 }
   0xb   :  { %p8349_p3 = scmp.ne.s32.totalorder %s36_s25, %s8348_s10  ;;  %p8354_p5 = scmp.lt.s32.totalorder %s8348_s10, %s8348_s10 }
   0xd   :  { %p8355_p6 = por %p8354_p5, %p8353_p4 }
   0xf   :  { %p8356_p7 = pnand %p8355_p6, %p8349_p3 }
  0x11   :  { %8359 = shalt.err (!%p8356_p7)
}
  0x12   :  { %s8479_s11 = smov 256   ;;  %s8480_s12 = smov 16  }
  0x13   :  { %41 = dma.hbm_to_vmem [thread:$0]  %s8785_s2, 8192, %s36_s25, [#allocation5], %s8479_s11, %s8479_s11, %s8480_s12  }
  0x14   :  { %s8481_s15 = smov [#allocation7]   ;;  %s8482_s17 = smov [#allocation2]  }
  0x15   :  { %s59_s16 = sshll.u32 %s8481_s15, 4  ;;  %s23_s18 = sshll.u32 %s8482_s17, 4  ;;  %s60_s16 = int_to_ptr.vmem [resolvable:$true] %s59_s16  ;;  %s24_s18 = int_to_ptr.vmem [resolvable:$true] %s23_s18 }
  0x16   :  { %s8360_s21 = scalar_lea.hbm %s8787_s4, 65536 }
  0x17   :  { %p8361_p8 = scmp.ne.s32.totalorder %s8787_s4, %s8360_s21  ;;  %p8364_p9 = scmp.lt.u32.totalorder %s8360_s21, %s8787_s4 }
  0x19   :  { %p8366_p10 = pnand %p8364_p9, %p8361_p8 }
  0x1b   :  { %8369 = shalt.err (!%p8366_p10)
}
  0x1c   :  { %s8370_s2 = scalar_lea.vmem %s60_s16, 65536  ;;  %p8375_p12 = scmp.lt.s32.totalorder %s60_s16, %s60_s16 }
  0x1d   :  { %p8371_p11 = scmp.ne.s32.totalorder %s60_s16, %s8370_s2  ;;  %p8376_p13 = scmp.lt.s32.totalorder %s8370_s2, %s8370_s2 }
  0x1f   :  { %p8377_p0 = por %p8376_p13, %p8375_p12 }
  0x21   :  { %p8378_p1 = pnand %p8377_p0, %p8371_p11 }
  0x23   :  { %8381 = shalt.err (!%p8378_p1)
}
  0x24   :  { %s8483_s25 = smov 512   ;;  %s8484_s27 = smov 32  }
  0x25   :  { %65 = dma.hbm_to_vmem [thread:$0]  %s8787_s4, 65536, %s60_s16, [#allocation8], %s8483_s25, %s8483_s25, %s8484_s27  }
  0x26   :  { %s8382_s9 = scalar_lea.hbm %s8784_s1, 512 }
  0x27   :  { %p8383_p2 = scmp.ne.s32.totalorder %s8784_s1, %s8382_s9  ;;  %p8386_p3 = scmp.lt.u32.totalorder %s8382_s9, %s8784_s1 }
  0x29   :  { %p8388_p4 = pnand %p8386_p3, %p8383_p2 }
  0x2b   :  { %8391 = shalt.err (!%p8388_p4)
}
  0x2c   :  { %s8392_s14 = scalar_lea.vmem %s24_s18, 512  ;;  %p8397_p6 = scmp.lt.s32.totalorder %s24_s18, %s24_s18 }
  0x2d   :  { %p8393_p5 = scmp.ne.s32.totalorder %s24_s18, %s8392_s14  ;;  %p8398_p7 = scmp.lt.s32.totalorder %s8392_s14, %s8392_s14 }
  0x2f   :  { %p8399_p8 = por %p8398_p7, %p8397_p6 }
  0x31   :  { %p8400_p9 = pnand %p8399_p8, %p8393_p5 }
  0x33   :  { %8403 = shalt.err (!%p8400_p9)
}
  0x34   :  { %s8485_s4 = smov 128   ;;  %s8486_s15 = smov 8  }
  0x35   :  { %29 = dma.hbm_to_vmem [thread:$0]  %s8784_s1, 512, %s24_s18, [#allocation3], %s8485_s4, %s8485_s4, %s8486_s15  }
  0x36   :  { %s8487_s19 = smov [#allocation6]   ;;  %s8488_s21 = smov [#allocation9]  }
  0x37   :  { %s47_s20 = sshll.u32 %s8487_s19, 4  ;;  %s71_s22 = sshll.u32 %s8488_s21, 4  ;;  %s48_s20 = int_to_ptr.vmem [resolvable:$true] %s47_s20  ;;  %s72_s22 = int_to_ptr.vmem [resolvable:$true] %s71_s22 }
  0x38   :  { %s8404_s26 = scalar_lea.hbm %s8786_s3, 32768 }
  0x39   :  { %p8405_p10 = scmp.ne.s32.totalorder %s8786_s3, %s8404_s26  ;;  %p8408_p11 = scmp.lt.u32.totalorder %s8404_s26, %s8786_s3 }
  0x3b   :  { %p8410_p12 = pnand %p8408_p11, %p8405_p10 }
  0x3d   :  { %8413 = shalt.err (!%p8410_p12)
}
  0x3e   :  { %s8414_s1 = scalar_lea.vmem %s48_s20, 32768  ;;  %p8419_p0 = scmp.lt.s32.totalorder %s48_s20, %s48_s20 }
  0x3f   :  { %p8415_p13 = scmp.ne.s32.totalorder %s48_s20, %s8414_s1  ;;  %p8420_p1 = scmp.lt.s32.totalorder %s8414_s1, %s8414_s1 }
  0x41   :  { %p8421_p2 = por %p8420_p1, %p8419_p0 }
  0x43   :  { %p8422_p3 = pnand %p8421_p2, %p8415_p13 }
  0x45   :  { %8425 = shalt.err (!%p8422_p3)
}
  0x46   :  { %53 = dma.hbm_to_vmem [thread:$0]  %s8786_s3, 32768, %s48_s20, [#allocation5], %s8483_s25, %s8483_s25, %s8484_s27  }
  0x47   :  { %s8426_s11 = scalar_lea.hbm %s8788_s5, 8192 }
  0x48   :  { %p8427_p4 = scmp.ne.s32.totalorder %s8788_s5, %s8426_s11  ;;  %p8430_p5 = scmp.lt.u32.totalorder %s8426_s11, %s8788_s5 }
  0x4a   :  { %p8432_p6 = pnand %p8430_p5, %p8427_p4 }
  0x4c   :  { %8435 = shalt.err (!%p8432_p6)
}
  0x4d   :  { %s8436_s15 = scalar_lea.vmem %s72_s22, 8192  ;;  %p8441_p8 = scmp.lt.s32.totalorder %s72_s22, %s72_s22 }
  0x4e   :  { %p8437_p7 = scmp.ne.s32.totalorder %s72_s22, %s8436_s15  ;;  %p8442_p9 = scmp.lt.s32.totalorder %s8436_s15, %s8436_s15 }
  0x50   :  { %p8443_p10 = por %p8442_p9, %p8441_p8 }
  0x52   :  { %p8444_p11 = pnand %p8443_p10, %p8437_p7 }
  0x54   :  { %8447 = shalt.err (!%p8444_p11)
}
  0x55   :  { %s8489_s3 = smov 64   ;;  %s8490_s25 = smov 4  }
  0x56   :  { %77 = dma.hbm_to_vmem [thread:$0]  %s8788_s5, 8192, %s72_s22, [#allocation8], %s8489_s3, %s8489_s3, %s8490_s25  }
  0x57   :  { %s8491_s17 = smov [#allocation10]   ;;  %s8448_s23 = scalar_lea.hbm %s8789_s6, 368 }
  0x58   :  { %s84_s19 = sshll.u32 %s8491_s17, 4  ;;  %p8449_p12 = scmp.ne.s32.totalorder %s8789_s6, %s8448_s23  ;;  %s85_s19 = int_to_ptr.vmem [resolvable:$true] %s84_s19 }
  0x59   :  { %p8452_p13 = scmp.lt.u32.totalorder %s8448_s23, %s8789_s6 }
  0x5b   :  { %p8454_p0 = pnand %p8452_p13, %p8449_p12 }
  0x5d   :  { %8457 = shalt.err (!%p8454_p0)
}
  0x5e   :  { %s8458_s29 = scalar_lea.vmem %s85_s19, 368  ;;  %s8462_s5 = scalar_lea.vmem %s85_s19, 384 }
  0x5f   :  { %p8459_p1 = scmp.ne.s32.totalorder %s85_s19, %s8458_s29  ;;  %p8463_p2 = scmp.lt.s32.totalorder %s85_s19, %s85_s19 }
  0x60   :  { %p8464_p3 = scmp.lt.s32.totalorder %s8462_s5, %s8458_s29 }
  0x62   :  { %p8465_p4 = por %p8464_p3, %p8463_p2 }
  0x64   :  { %p8466_p5 = pnand %p8465_p4, %p8459_p1 }
  0x66   :  { %8469 = shalt.err (!%p8466_p5)
}
  0x67   :  { %87 = dma.hbm_to_vmem [thread:$0]  %s8789_s6, 368, %s85_s19, [#allocation11]  }
  0x68   :  { %8470 = dma.done.wait [#allocation3], 512  }
  0x69   :  { %8471 = vsyncadd [#allocation3], 4294966784 }
  0x6a   :  { %8472 = dma.done.wait [#allocation5], 40960  }
  0x6b   :  { %8473 = vsyncadd [#allocation5], 4294926336 }
  0x6c   :  { %8474 = dma.done.wait [#allocation8], 73728  }
  0x6d   :  { %8475 = vsyncadd [#allocation8], 4294893568 }
  0x6e   :  { %8476 = dma.done.wait [#allocation11], 368  }
  0x6f   :  { %8477 = vsyncadd [#allocation11], 4294966928  ;;  %v8492_v0 = vmov 0   ;;  %v8171_v1 = vld [vmem:[#allocation2 + $0x4] ss:$8 sps:$4 sm:$0xff]   ;;  %vm144_vm0 = vcmask 261120  }
  0x70   :  { %180 = vmatprep.mubr.bf16.mxu0 %v8492_v0  ;;  %v8173_v2 = vld [vmem:[#allocation2] ss:$8 sps:$4 sm:$0xff]   ;;  %148 = vmatprep.subr.bf16.mxu0 %v8171_v1  ;;  %v8174_v3 = vld [vmem:[#allocation2 + $0x14] ss:$8 sps:$4 sm:$0xff]   ;;  %v8176_v4 = vld [vmem:[#allocation2 + $0x10] ss:$8 sps:$4 sm:$0xff]  }
  0x71   :  { %149 = vmatpush1.bf16.msra.mxu0 %v8173_v2  ;;  %v8177_v5 = vld [vmem:[#allocation4 + $0x4] ss:$16 sps:$4 sm:$0xff]   ;;  %v107_v6 = vld [vmem:[%s8783_s0] sm:$0xf]  ;;  %v8181_v7 = vld [vmem:[#allocation4 + $0xc] ss:$16 sps:$4 sm:$0xff]  }
  0x72   :  { %150 = vmatprep.subr.bf16.mxu0 %v8174_v3  ;;  %599 = vmatprep.subr.bf16.mxu1 %v8177_v5  ;;  %v8182_v8 = vld [vmem:[#allocation4] ss:$16 sps:$4 sm:$0xff]   ;;  %v8183_v9 = vld [vmem:[#allocation4 + $0x24] ss:$16 sps:$4 sm:$0xff]   ;;  %v8179_v10 = vld [vmem:[#allocation4 + $0x8] ss:$16 sps:$4 sm:$0xff]  }
  0x73   :  { %600 = vmatpush1.bf16.msra.mxu1 %v8182_v8  ;;  %v8187_v11 = vld [vmem:[#allocation4 + $0x2c] ss:$16 sps:$4 sm:$0xff]   ;;  %v8188_v12 = vld [vmem:[#allocation4 + $0x20] ss:$16 sps:$4 sm:$0xff]   ;;  %v8189_v13 = vld [vmem:[#allocation4 + $0x44] ss:$16 sps:$4 sm:$0xff]  }
  0x74   :  { %601 = vmatprep.subr.bf16.mxu1 %v8183_v9  ;;  %v8185_v14 = vld [vmem:[#allocation4 + $0x28] ss:$16 sps:$4 sm:$0xff]   ;;  %v8193_v15 = vld [vmem:[#allocation4 + $0x4c] ss:$16 sps:$4 sm:$0xff]   ;;  %v8194_v16 = vld [vmem:[#allocation4 + $0x40] ss:$16 sps:$4 sm:$0xff]  }
  0x75   :  { %151 = vmatpush1.bf16.msra.mxu0 %v8176_v4  ;;  %v8195_v17 = vld [vmem:[#allocation4 + $0x64] ss:$16 sps:$4 sm:$0xff]   ;;  %v8191_v18 = vld [vmem:[#allocation4 + $0x48] ss:$16 sps:$4 sm:$0xff]   ;;  %v8199_v19 = vld [vmem:[#allocation4 + $0x6c] ss:$16 sps:$4 sm:$0xff]  }
  0x76   :  { %640 = vmatprep.subr.bf16.mxu0 %v8181_v7  ;;  %v8200_v20 = vld [vmem:[#allocation4 + $0x60] ss:$16 sps:$4 sm:$0xff]   ;;  %v8201_v21 = vld [vmem:[#allocation4 + $0x84] ss:$16 sps:$4 sm:$0xff]   ;;  %v8197_v22 = vld [vmem:[#allocation4 + $0x68] ss:$16 sps:$4 sm:$0xff]  }
  0x77   :  { %602 = vmatpush1.bf16.msra.mxu1 %v8188_v12  ;;  %v8205_v23 = vld [vmem:[#allocation4 + $0x8c] ss:$16 sps:$4 sm:$0xff]   ;;  %v8206_v24 = vld [vmem:[#allocation4 + $0x80] ss:$16 sps:$4 sm:$0xff]   ;;  %v8207_v25 = vld [vmem:[#allocation4 + $0xa4] ss:$16 sps:$4 sm:$0xff]  }
  0x78   :  { %7090 = vmatmul.mubr.msk.bf16.vlgmr.msra.gmra.mrb[0].mxu0 %vm144_vm0, %v107_v6  ;;  %603 = vmatprep.subr.bf16.mxu1 %v8189_v13  ;;  %v8203_v26 = vld [vmem:[#allocation4 + $0x88] ss:$16 sps:$4 sm:$0xff]   ;;  %v8211_v27 = vld [vmem:[#allocation4 + $0xac] ss:$16 sps:$4 sm:$0xff]   ;;  %v8212_v28 = vld [vmem:[#allocation4 + $0xa0] ss:$16 sps:$4 sm:$0xff]  }
  0x79   :  { %641 = vmatpush1.bf16.msra.mxu0 %v8179_v10  ;;  %v8213_v29 = vld [vmem:[#allocation4 + $0xc4] ss:$16 sps:$4 sm:$0xff]   ;;  %v8209_v30 = vld [vmem:[#allocation4 + $0xa8] ss:$16 sps:$4 sm:$0xff]   ;;  %v8217_v31 = vld [vmem:[#allocation4 + $0xcc] ss:$16 sps:$4 sm:$0xff]  }
  0x7a   :  { %642 = vmatprep.subr.bf16.mxu0 %v8187_v11  ;;  %v8218_v32 = vld [vmem:[#allocation4 + $0xc0] ss:$16 sps:$4 sm:$0xff]   ;;  %v8219_v33 = vld [vmem:[#allocation4 + $0xe4] ss:$16 sps:$4 sm:$0xff]   ;;  %v8215_v34 = vld [vmem:[#allocation4 + $0xc8] ss:$16 sps:$4 sm:$0xff]  }
  0x7b   :  { %604 = vmatpush1.bf16.msra.mxu1 %v8194_v16  ;;  %v8223_v35 = vld [vmem:[#allocation4 + $0xec] ss:$16 sps:$4 sm:$0xff]   ;;  %v8224_v36 = vld [vmem:[#allocation4 + $0xe0] ss:$16 sps:$4 sm:$0xff]   ;;  %v8225_v37 = vld [vmem:[#allocation4 + $0x104] ss:$16 sps:$4 sm:$0xff]  }
  0x7c   :  { %605 = vmatprep.subr.bf16.mxu1 %v8195_v17  ;;  %v8221_v38 = vld [vmem:[#allocation4 + $0xe8] ss:$16 sps:$4 sm:$0xff]   ;;  %v8229_v39 = vld [vmem:[#allocation4 + $0x10c] ss:$16 sps:$4 sm:$0xff]   ;;  %v8230_v40 = vld [vmem:[#allocation4 + $0x100] ss:$16 sps:$4 sm:$0xff]  }
  0x7d   :  { %643 = vmatpush1.bf16.msra.mxu0 %v8185_v14  ;;  %v8231_v41 = vld [vmem:[#allocation4 + $0x124] ss:$16 sps:$4 sm:$0xff]   ;;  %v8227_v42 = vld [vmem:[#allocation4 + $0x108] ss:$16 sps:$4 sm:$0xff]   ;;  %v8236_v43 = vld [vmem:[#allocation4 + $0x120] ss:$16 sps:$4 sm:$0xff]   ;;  %v114_v14 = vlaneseq }
  0x7e   :  { %644 = vmatprep.subr.bf16.mxu0 %v8193_v15  ;;  %v8235_v44 = vld [vmem:[#allocation4 + $0x12c] ss:$16 sps:$4 sm:$0xff]   ;;  %v8237_v45 = vld [vmem:[#allocation4 + $0x144] ss:$16 sps:$4 sm:$0xff]   ;;  %v8233_v46 = vld [vmem:[#allocation4 + $0x128] ss:$16 sps:$4 sm:$0xff]  }
  0x7f   :  { %606 = vmatpush1.bf16.msra.mxu1 %v8200_v20  ;;  %v8242_v47 = vld [vmem:[#allocation4 + $0x140] ss:$16 sps:$4 sm:$0xff]   ;;  %v8241_v48 = vld [vmem:[#allocation4 + $0x14c] ss:$16 sps:$4 sm:$0xff]   ;;  %v8243_v49 = vld [vmem:[#allocation4 + $0x164] ss:$16 sps:$4 sm:$0xff]  }
  0x80   :  { %607 = vmatprep.subr.bf16.mxu1 %v8201_v21  ;;  %v8239_v50 = vld [vmem:[#allocation4 + $0x148] ss:$16 sps:$4 sm:$0xff]   ;;  %v8248_v51 = vld [vmem:[#allocation4 + $0x160] ss:$16 sps:$4 sm:$0xff]   ;;  %v8247_v52 = vld [vmem:[#allocation4 + $0x16c] ss:$16 sps:$4 sm:$0xff]  }
  0x81   :  { %645 = vmatpush1.bf16.msra.mxu0 %v8191_v18  ;;  %v8249_v53 = vld [vmem:[#allocation4 + $0x184] ss:$16 sps:$4 sm:$0xff]   ;;  %v8245_v54 = vld [vmem:[#allocation4 + $0x168] ss:$16 sps:$4 sm:$0xff]   ;;  %v8254_v55 = vld [vmem:[#allocation4 + $0x180] ss:$16 sps:$4 sm:$0xff]  }
  0x82   :  { %646 = vmatprep.subr.bf16.mxu0 %v8199_v19  ;;  %v8253_v56 = vld [vmem:[#allocation4 + $0x18c] ss:$16 sps:$4 sm:$0xff]   ;;  %v8255_v57 = vld [vmem:[#allocation4 + $0x1a4] ss:$16 sps:$4 sm:$0xff]   ;;  %v8251_v58 = vld [vmem:[#allocation4 + $0x188] ss:$16 sps:$4 sm:$0xff]  }
  0x83   :  { %608 = vmatpush1.bf16.msra.mxu1 %v8206_v24  ;;  %v8260_v59 = vld [vmem:[#allocation4 + $0x1a0] ss:$16 sps:$4 sm:$0xff]   ;;  %v8259_v60 = vld [vmem:[#allocation4 + $0x1ac] ss:$16 sps:$4 sm:$0xff]   ;;  %v8257_v61 = vld [vmem:[#allocation4 + $0x1a8] ss:$16 sps:$4 sm:$0xff]  }
  0x84   :  { %609 = vmatprep.subr.bf16.mxu1 %v8207_v25  ;;  %v8261_v62 = vld [vmem:[#allocation4 + $0x1c4] ss:$16 sps:$4 sm:$0xff]   ;;  %v8265_v63 = vld [vmem:[#allocation4 + $0x1cc] ss:$16 sps:$4 sm:$0xff]   ;;  %v8263_v0 = vld [vmem:[#allocation4 + $0x1c8] ss:$16 sps:$4 sm:$0xff]  }
  0x85   :  { %647 = vmatpush1.bf16.msra.mxu0 %v8197_v22  ;;  %v8266_v1 = vld [vmem:[#allocation4 + $0x1c0] ss:$16 sps:$4 sm:$0xff]   ;;  %v8267_v2 = vld [vmem:[#allocation4 + $0x1e4] ss:$16 sps:$4 sm:$0xff]   ;;  %v8271_v3 = vld [vmem:[#allocation4 + $0x1ec] ss:$16 sps:$4 sm:$0xff]  }
  0x86   :  { %648 = vmatprep.subr.bf16.mxu0 %v8205_v23  ;;  %v8269_v4 = vld [vmem:[#allocation4 + $0x1e8] ss:$16 sps:$4 sm:$0xff]   ;;  %v8272_v5 = vld [vmem:[#allocation4 + $0x1e0] ss:$16 sps:$4 sm:$0xff]   ;;  %v8614_v15 = vshrl.u32 %v114_v14, 7 }
  0x87   :  { %610 = vmatpush1.bf16.msra.mxu1 %v8212_v28  ;;  %v689_v6 = vld [vmem:[#allocation6] sm:$0xff]  ;;  %v690_v8 = vld [vmem:[#allocation6 + $0x8] sm:$0xff] }
  0x88   :  { %611 = vmatprep.subr.bf16.mxu1 %v8213_v29  ;;  %v693_v7 = vld [vmem:[#allocation6 + $0x20] sm:$0xff]  ;;  %v694_v11 = vld [vmem:[#allocation6 + $0x28] sm:$0xff]  ;;  %v8617_v16 = vsub.s32 0, %v8614_v15  ;;  %v8620_v18 = vsub.s32 1, %v8614_v15 }
  0x89   :  { %649 = vmatpush1.bf16.msra.mxu0 %v8203_v26  ;;  %v7155_v9 = vcombine.low %v689_v6, %v693_v7  ;;  %v7156_v10 = vcombine.high %v689_v6, %v693_v7  ;;  %v7157_v12 = vcombine.low %v690_v8, %v694_v11  ;;  %v7158_v13 = vcombine.high %v690_v8, %v694_v11  ;;  %v112_v17 = vld [vmem:[#allocation10] sm:$0x3]  ;;  %v738_v7 = vld [vmem:[#allocation6 + $0x188] sm:$0xff] }
  0x8a   :  { %650 = vmatprep.subr.bf16.mxu0 %v8211_v27  ;;  %v117_v19 = vrot.slane %v112_v17, %v8617_v16  ;;  %v121_v20 = vrot.slane %v112_v17, %v8620_v18  ;;  %v697_v28 = vld [vmem:[#allocation6 + $0x40] sm:$0xff]  ;;  %v742_v8 = vld [vmem:[#allocation6 + $0x1a8] sm:$0xff] }
  0x8b   :  { %612 = vmatpush1.bf16.msra.mxu1 %v8218_v32  ;;  %v702_v32 = vld [vmem:[#allocation6 + $0x68] sm:$0xff]  ;;  %v741_v6 = vld [vmem:[#allocation6 + $0x1a0] sm:$0xff] }
  0x8c   :  { %613 = vmatprep.subr.bf16.mxu1 %v8219_v33  ;;  %v749_v14 = vld [vmem:[#allocation6 + $0x1e0] sm:$0xff]  ;;  %v746_v17 = vld [vmem:[#allocation6 + $0x1c8] sm:$0xff] }
  0x8d   :  { %651 = vmatpush1.bf16.msra.mxu0 %v8209_v30  ;;  %v701_v30 = vld [vmem:[#allocation6 + $0x60] sm:$0xff] }
  0x8e   :  { %652 = vmatprep.subr.bf16.mxu0 %v8217_v31  ;;  %v698_v31 = vld [vmem:[#allocation6 + $0x48] sm:$0xff] }
  0x8f   :  { %614 = vmatpush1.bf16.msra.mxu1 %v8224_v36  ;;  %v7166_v36 = vcombine.high %v698_v31, %v702_v32 }
  0x90   :  { %615 = vmatprep.subr.bf16.mxu1 %v8225_v37  ;;  %v705_v37 = vld [vmem:[#allocation6 + $0x80] sm:$0xff] }
  0x91   :  { %653 = vmatpush1.bf16.msra.mxu0 %v8215_v34 }
  0x92   :  { %654 = vmatprep.subr.bf16.mxu0 %v8223_v35  ;;  %v7164_v35 = vcombine.high %v697_v28, %v701_v30 }
  0x93   :  { %616 = vmatpush1.bf16.msra.mxu1 %v8230_v40  ;;  %v710_v40 = vld [vmem:[#allocation6 + $0xa8] sm:$0xff] }
  0x94   :  { %617 = vmatprep.subr.bf16.mxu1 %v8231_v41  ;;  %v7163_v41 = vcombine.low %v697_v28, %v701_v30 }
  0x95   :  { %655 = vmatpush1.bf16.msra.mxu0 %v8221_v38  ;;  %v709_v38 = vld [vmem:[#allocation6 + $0xa0] sm:$0xff] }
  0x96   :  { %656 = vmatprep.subr.bf16.mxu0 %v8229_v39  ;;  %v706_v39 = vld [vmem:[#allocation6 + $0x88] sm:$0xff] }
  0x97   :  { %618 = vmatpush1.bf16.msra.mxu1 %v8236_v43  ;;  %v7172_v43 = vcombine.high %v705_v37, %v709_v38 }
  0x98   :  { %619 = vmatprep.subr.bf16.mxu1 %v8237_v45  ;;  %v713_v45 = vld [vmem:[#allocation6 + $0xc0] sm:$0xff] }
  0x99   :  { %657 = vmatpush1.bf16.msra.mxu0 %v8227_v42  ;;  %v7165_v42 = vcombine.low %v698_v31, %v702_v32  ;;  %v761_v32 = vld [vmem:[#allocation6 + $0x240] sm:$0xff] }
  0x9a   :  { %658 = vmatprep.subr.bf16.mxu0 %v8235_v44  ;;  %v7174_v44 = vcombine.high %v706_v39, %v710_v40 }
  0x9b   :  { %620 = vmatpush1.bf16.msra.mxu1 %v8242_v47  ;;  %v714_v47 = vld [vmem:[#allocation6 + $0xc8] sm:$0xff] }
  0x9c   :  { %621 = vmatprep.subr.bf16.mxu1 %v8243_v49  ;;  %v7171_v49 = vcombine.low %v705_v37, %v709_v38 }
  0x9d   :  { %659 = vmatpush1.bf16.msra.mxu0 %v8233_v46  ;;  %v717_v46 = vld [vmem:[#allocation6 + $0xe0] sm:$0xff] }
  0x9e   :  { %660 = vmatprep.subr.bf16.mxu0 %v8241_v48  ;;  %v718_v48 = vld [vmem:[#allocation6 + $0xe8] sm:$0xff] }
  0x9f   :  { %622 = vmatpush1.bf16.msra.mxu1 %v8248_v51  ;;  %v7180_v51 = vcombine.high %v713_v45, %v717_v46 }
  0xa0   :  { %623 = vmatprep.subr.bf16.mxu1 %v8249_v53  ;;  %v721_v53 = vld [vmem:[#allocation6 + $0x100] sm:$0xff] }
  0xa1   :  { %661 = vmatpush1.bf16.msra.mxu0 %v8239_v50  ;;  %v7173_v50 = vcombine.low %v706_v39, %v710_v40  ;;  %v769_v40 = vld [vmem:[#allocation6 + $0x280] sm:$0xff] }
  0xa2   :  { %662 = vmatprep.subr.bf16.mxu0 %v8247_v52  ;;  %v7182_v52 = vcombine.high %v714_v47, %v718_v48 }
  0xa3   :  { %624 = vmatpush1.bf16.msra.mxu1 %v8254_v55  ;;  %v722_v55 = vld [vmem:[#allocation6 + $0x108] sm:$0xff] }
  0xa4   :  { %625 = vmatprep.subr.bf16.mxu1 %v8255_v57  ;;  %v7179_v57 = vcombine.low %v713_v45, %v717_v46 }
  0xa5   :  { %663 = vmatpush1.bf16.msra.mxu0 %v8245_v54  ;;  %v725_v54 = vld [vmem:[#allocation6 + $0x120] sm:$0xff] }
  0xa6   :  { %664 = vmatprep.subr.bf16.mxu0 %v8253_v56  ;;  %v726_v56 = vld [vmem:[#allocation6 + $0x128] sm:$0xff] }
  0xa7   :  { %626 = vmatpush1.bf16.msra.mxu1 %v8260_v59  ;;  %v7188_v59 = vcombine.high %v721_v53, %v725_v54 }
  0xa8   :  { %627 = vmatprep.subr.bf16.mxu1 %v8261_v62  ;;  %v733_v62 = vld [vmem:[#allocation6 + $0x160] sm:$0xff] }
  0xa9   :  { %665 = vmatpush1.bf16.msra.mxu0 %v8251_v58  ;;  %v7181_v58 = vcombine.low %v714_v47, %v718_v48  ;;  %v777_v48 = vld [vmem:[#allocation6 + $0x2c0] sm:$0xff] }
  0xaa   :  { %666 = vmatprep.subr.bf16.mxu0 %v8259_v60  ;;  %v7190_v60 = vcombine.high %v722_v55, %v726_v56 }
  0xab   :  { %628 = vmatpush1.bf16.msra.mxu1 %v8266_v1  ;;  %v7187_v1 = vcombine.low %v721_v53, %v725_v54 }
  0xac   :  { %629 = vmatprep.subr.bf16.mxu1 %v8267_v2  ;;  %v7189_v2 = vcombine.low %v722_v55, %v726_v56  ;;  %v785_v56 = vld [vmem:[#allocation6 + $0x300] sm:$0xff] }
  0xad   :  { %667 = vmatpush1.bf16.msra.mxu0 %v8257_v61  ;;  %v729_v61 = vld [vmem:[#allocation6 + $0x140] sm:$0xff] }
  0xae   :  { %668 = vmatprep.subr.bf16.mxu0 %v8265_v63  ;;  %v730_v63 = vld [vmem:[#allocation6 + $0x148] sm:$0xff] }
  0xaf   :  { %630 = vmatpush1.bf16.msra.mxu1 %v8272_v5  ;;  %v737_v5 = vld [vmem:[#allocation6 + $0x180] sm:$0xff] }
  0xb0   :  { %2267 = vmatprep.subr.bf16.mxu1 %v7156_v10  ;;  %v7204_v11 = vcombine.high %v737_v5, %v741_v6 }
  0xb1   :  { %669 = vmatpush1.bf16.msra.mxu0 %v8263_v0  ;;  %v734_v0 = vld [vmem:[#allocation6 + $0x168] sm:$0xff] }
  0xb2   :  { %670 = vmatprep.subr.bf16.mxu0 %v8271_v3  ;;  %v7196_v3 = vcombine.high %v729_v61, %v733_v62  ;;  %v7197_v10 = vcombine.low %v730_v63, %v734_v0 }
  0xb5   :  { %671 = vmatpush1.bf16.msra.mxu0 %v8269_v4  ;;  %v7198_v4 = vcombine.high %v730_v63, %v734_v0  ;;  %v793_v0 = vld [vmem:[#allocation6 + $0x340] sm:$0xff] }
  0xb6   :  { %2349 = vmatprep.subr.bf16.mxu0 %v7158_v13  ;;  %v745_v13 = vld [vmem:[#allocation6 + $0x1c0] sm:$0xff] }
  0xb7   :  { %v7211_v28 = vcombine.low %v745_v13, %v749_v14 }
 0x14b   :  { %v182_v21 = vpop.f32.mrb[0].mxu0 }
 0x14c   :  { %v183_v22 = vadd.f32 %v182_v21, %v117_v19  ;;  %v184_v23 = vpop.f32.mrb[1].mxu0  ;;  %v750_v19 = vld [vmem:[#allocation6 + $0x1e8] sm:$0xff]  ;;  %v7205_v21 = vcombine.low %v738_v7, %v742_v8 }
 0x14d   :  { %v185_v24 = vadd.f32 %v184_v23, %v121_v20  ;;  %v186_v25 = vpop.f32.mrb[2].mxu0  ;;  %v7203_v20 = vcombine.low %v737_v5, %v741_v6  ;;  %v7214_v23 = vcombine.high %v746_v17, %v750_v19 }
 0x14e   :  { %v189_v26 = vmax.f32 %v183_v22, 0.0  ;;  %v187_v27 = vpop.f32.mrb[3].mxu0  ;;  %v7212_v22 = vcombine.high %v745_v13, %v749_v14  ;;  %v757_v25 = vld [vmem:[#allocation6 + $0x220] sm:$0xff]  ;;  %v806_v14 = vld [vmem:[#allocation6 + $0x3a8] sm:$0xff] }
 0x14f   :  { %v190_v29 = vmax.f32 %v185_v24, 0.0  ;;  %v753_v24 = vld [vmem:[#allocation6 + $0x200] sm:$0xff]  ;;  %v758_v27 = vld [vmem:[#allocation6 + $0x228] sm:$0xff] }
 0x150   :  { %v191_v34 = vpack.c.bf16 %v189_v26, %v189_v26  ;;  %v754_v26 = vld [vmem:[#allocation6 + $0x208] sm:$0xff]  ;;  %v7220_v30 = vcombine.high %v753_v24, %v757_v25 }
 0x151   :  { %v192_v33 = vpack.c.bf16 %v190_v29, %v190_v29  ;;  %v7213_v29 = vcombine.low %v746_v17, %v750_v19  ;;  %v7222_v31 = vcombine.high %v754_v26, %v758_v27  ;;  %v7221_v37 = vcombine.low %v754_v26, %v758_v27 }
 0x153   :  { %631 = vmatprep.mubr.bf16.mxu1 %v192_v33  ;;  %672 = vmatprep.mubr.bf16.mxu0 %v192_v33  ;;  %v765_v33 = vld [vmem:[#allocation6 + $0x260] sm:$0xff] }
 0x154   :  { %632 = vmatmul.mubr.bf16.vlgmr.msra.gmra.mrb[0].mxu1 %v191_v34  ;;  %673 = vmatmul.mubr.bf16.vlgmr.msra.gmra.mrb[4].mxu0 %v191_v34  ;;  %v762_v34 = vld [vmem:[#allocation6 + $0x248] sm:$0xff]  ;;  %v7228_v38 = vcombine.high %v761_v32, %v765_v33 }
 0x155   :  { %2268 = vmatpush1.bf16.msra.mxu1 %v7155_v9  ;;  %2350 = vmatpush1.bf16.msra.mxu0 %v7157_v12  ;;  %v7195_v9 = vcombine.low %v729_v61, %v733_v62  ;;  %v7206_v12 = vcombine.high %v738_v7, %v742_v8 }
 0x156   :  { %2269 = vmatprep.subr.bf16.mxu1 %v7164_v35  ;;  %2351 = vmatprep.subr.bf16.mxu0 %v7166_v36  ;;  %v766_v35 = vld [vmem:[#allocation6 + $0x268] sm:$0xff]  ;;  %v7219_v36 = vcombine.low %v753_v24, %v757_v25 }
 0x157   :  { %v7230_v39 = vcombine.high %v762_v34, %v766_v35  ;;  %v7229_v45 = vcombine.low %v762_v34, %v766_v35  ;;  %v814_v25 = vld [vmem:[#allocation6 + $0x3e8] sm:$0xff] }
 0x159   :  { %2270 = vmatpush1.bf16.msra.mxu1 %v7163_v41  ;;  %2352 = vmatpush1.bf16.msra.mxu0 %v7165_v42  ;;  %v773_v41 = vld [vmem:[#allocation6 + $0x2a0] sm:$0xff]  ;;  %v770_v42 = vld [vmem:[#allocation6 + $0x288] sm:$0xff] }
 0x15a   :  { %2271 = vmatprep.subr.bf16.mxu1 %v7172_v43  ;;  %2353 = vmatprep.subr.bf16.mxu0 %v7174_v44  ;;  %v774_v43 = vld [vmem:[#allocation6 + $0x2a8] sm:$0xff]  ;;  %v7227_v44 = vcombine.low %v761_v32, %v765_v33  ;;  %v7236_v46 = vcombine.high %v769_v40, %v773_v41 }
 0x15b   :  { %v7238_v47 = vcombine.high %v770_v42, %v774_v43  ;;  %v7237_v53 = vcombine.low %v770_v42, %v774_v43  ;;  %v822_v33 = vld [vmem:[#allocation6 + $0x428] sm:$0xff] }
 0x15d   :  { %2272 = vmatpush1.bf16.msra.mxu1 %v7171_v49  ;;  %2354 = vmatpush1.bf16.msra.mxu0 %v7173_v50  ;;  %v781_v49 = vld [vmem:[#allocation6 + $0x2e0] sm:$0xff]  ;;  %v778_v50 = vld [vmem:[#allocation6 + $0x2c8] sm:$0xff] }
 0x15e   :  { %2273 = vmatprep.subr.bf16.mxu1 %v7180_v51  ;;  %2355 = vmatprep.subr.bf16.mxu0 %v7182_v52  ;;  %v782_v51 = vld [vmem:[#allocation6 + $0x2e8] sm:$0xff]  ;;  %v7235_v52 = vcombine.low %v769_v40, %v773_v41  ;;  %v7244_v54 = vcombine.high %v777_v48, %v781_v49 }
 0x15f   :  { %v7246_v55 = vcombine.high %v778_v50, %v782_v51  ;;  %v7245_v61 = vcombine.low %v778_v50, %v782_v51 }
 0x161   :  { %2274 = vmatpush1.bf16.msra.mxu1 %v7179_v57  ;;  %2356 = vmatpush1.bf16.msra.mxu0 %v7181_v58  ;;  %v789_v57 = vld [vmem:[#allocation6 + $0x320] sm:$0xff]  ;;  %v786_v58 = vld [vmem:[#allocation6 + $0x308] sm:$0xff] }
 0x162   :  { %2275 = vmatprep.subr.bf16.mxu1 %v7188_v59  ;;  %2357 = vmatprep.subr.bf16.mxu0 %v7190_v60  ;;  %v790_v59 = vld [vmem:[#allocation6 + $0x328] sm:$0xff]  ;;  %v7243_v60 = vcombine.low %v777_v48, %v781_v49  ;;  %v7252_v62 = vcombine.high %v785_v56, %v789_v57 }
 0x163   :  { %v7254_v63 = vcombine.high %v786_v58, %v790_v59  ;;  %v7253_v5 = vcombine.low %v786_v58, %v790_v59  ;;  %v826_v58 = vld [vmem:[#allocation6 + $0x448] sm:$0xff] }
 0x164   :  { %v830_v59 = vld [vmem:[#allocation6 + $0x468] sm:$0xff] }
 0x165   :  { %2276 = vmatpush1.bf16.msra.mxu1 %v7187_v1  ;;  %2358 = vmatpush1.bf16.msra.mxu0 %v7189_v2  ;;  %v797_v1 = vld [vmem:[#allocation6 + $0x360] sm:$0xff]  ;;  %v794_v2 = vld [vmem:[#allocation6 + $0x348] sm:$0xff] }
 0x166   :  { %2277 = vmatprep.subr.bf16.mxu1 %v7196_v3  ;;  %2359 = vmatprep.subr.bf16.mxu0 %v7198_v4  ;;  %v798_v3 = vld [vmem:[#allocation6 + $0x368] sm:$0xff]  ;;  %v7251_v4 = vcombine.low %v785_v56, %v789_v57  ;;  %v7260_v6 = vcombine.high %v793_v0, %v797_v1  ;;  %v7259_v8 = vcombine.low %v793_v0, %v797_v1  ;;  %v829_v57 = vld [vmem:[#allocation6 + $0x460] sm:$0xff] }
 0x167   :  { %v7262_v7 = vcombine.high %v794_v2, %v798_v3  ;;  %v7294_v0 = vcombine.high %v826_v58, %v830_v59  ;;  %v837_v1 = vld [vmem:[#allocation6 + $0x4a0] sm:$0xff] }
 0x169   :  { %2278 = vmatpush1.bf16.msra.mxu1 %v7195_v9  ;;  %2360 = vmatpush1.bf16.msra.mxu0 %v7197_v10  ;;  %v7261_v9 = vcombine.low %v794_v2, %v798_v3  ;;  %v801_v10 = vld [vmem:[#allocation6 + $0x380] sm:$0xff]  ;;  %v834_v2 = vld [vmem:[#allocation6 + $0x488] sm:$0xff] }
 0x16a   :  { %2279 = vmatprep.subr.bf16.mxu1 %v7204_v11  ;;  %2361 = vmatprep.subr.bf16.mxu0 %v7206_v12  ;;  %v805_v11 = vld [vmem:[#allocation6 + $0x3a0] sm:$0xff]  ;;  %v802_v12 = vld [vmem:[#allocation6 + $0x388] sm:$0xff] }
 0x16b   :  { %v7268_v13 = vcombine.high %v801_v10, %v805_v11  ;;  %v7267_v17 = vcombine.low %v801_v10, %v805_v11  ;;  %v7269_v19 = vcombine.low %v802_v12, %v806_v14  ;;  %v838_v3 = vld [vmem:[#allocation6 + $0x4a8] sm:$0xff]  ;;  %v845_v10 = vld [vmem:[#allocation6 + $0x4e0] sm:$0xff] }
 0x16c   :  { %v842_v11 = vld [vmem:[#allocation6 + $0x4c8] sm:$0xff] }
 0x16d   :  { %2280 = vmatpush1.bf16.msra.mxu1 %v7203_v20  ;;  %2362 = vmatpush1.bf16.msra.mxu0 %v7205_v21  ;;  %v7270_v20 = vcombine.high %v802_v12, %v806_v14  ;;  %v809_v21 = vld [vmem:[#allocation6 + $0x3c0] sm:$0xff]  ;;  %v846_v12 = vld [vmem:[#allocation6 + $0x4e8] sm:$0xff]  ;;  %v7301_v14 = vcombine.low %v834_v2, %v838_v3 }
 0x16e   :  { %2281 = vmatprep.subr.bf16.mxu1 %v7212_v22  ;;  %2363 = vmatprep.subr.bf16.mxu0 %v7214_v23  ;;  %v813_v22 = vld [vmem:[#allocation6 + $0x3e0] sm:$0xff]  ;;  %v810_v23 = vld [vmem:[#allocation6 + $0x3c8] sm:$0xff] }
 0x16f   :  { %v7276_v24 = vcombine.high %v809_v21, %v813_v22  ;;  %v7275_v26 = vcombine.low %v809_v21, %v813_v22  ;;  %v7277_v27 = vcombine.low %v810_v23, %v814_v25  ;;  %v853_v21 = vld [vmem:[#allocation6 + $0x520] sm:$0xff]  ;;  %v850_v22 = vld [vmem:[#allocation6 + $0x508] sm:$0xff] }
 0x171   :  { %2282 = vmatpush1.bf16.msra.mxu1 %v7211_v28  ;;  %2364 = vmatpush1.bf16.msra.mxu0 %v7213_v29  ;;  %v7278_v28 = vcombine.high %v810_v23, %v814_v25  ;;  %v817_v29 = vld [vmem:[#allocation6 + $0x400] sm:$0xff]  ;;  %v854_v23 = vld [vmem:[#allocation6 + $0x528] sm:$0xff]  ;;  %v7309_v25 = vcombine.low %v842_v11, %v846_v12 }
 0x172   :  { %2283 = vmatprep.subr.bf16.mxu1 %v7220_v30  ;;  %2365 = vmatprep.subr.bf16.mxu0 %v7222_v31  ;;  %v821_v30 = vld [vmem:[#allocation6 + $0x420] sm:$0xff]  ;;  %v818_v31 = vld [vmem:[#allocation6 + $0x408] sm:$0xff] }
 0x173   :  { %v7284_v32 = vcombine.high %v817_v29, %v821_v30  ;;  %v7283_v34 = vcombine.low %v817_v29, %v821_v30  ;;  %v7285_v35 = vcombine.low %v818_v31, %v822_v33  ;;  %v861_v29 = vld [vmem:[#allocation6 + $0x560] sm:$0xff]  ;;  %v858_v30 = vld [vmem:[#allocation6 + $0x548] sm:$0xff] }
 0x175   :  { %2284 = vmatpush1.bf16.msra.mxu1 %v7219_v36  ;;  %2366 = vmatpush1.bf16.msra.mxu0 %v7221_v37  ;;  %v7286_v36 = vcombine.high %v818_v31, %v822_v33  ;;  %v8624_v37 = vld [vmem:[#allocation10 + $0x2] sm:$0xf]  ;;  %v862_v31 = vld [vmem:[#allocation6 + $0x568] sm:$0xff]  ;;  %v7317_v33 = vcombine.low %v850_v22, %v854_v23 }
 0x176   :  { %2285 = vmatprep.subr.bf16.mxu1 %v7228_v38  ;;  %2367 = vmatprep.subr.bf16.mxu0 %v7230_v39  ;;  %v8627_v38 = vsub.s32 3, %v8614_v15  ;;  %v262_v39 = vrot.slane %v8624_v37, %v8617_v16  ;;  %v266_v40 = vrot.slane %v8624_v37, %v8620_v18 }
 0x178   :  { %v274_v41 = vrot.slane %v8624_v37, %v8627_v38 }
 0x179   :  { %2286 = vmatpush1.bf16.msra.mxu1 %v7227_v44  ;;  %2368 = vmatpush1.bf16.msra.mxu0 %v7229_v45 }
 0x17a   :  { %2287 = vmatprep.subr.bf16.mxu1 %v7236_v46  ;;  %2369 = vmatprep.subr.bf16.mxu0 %v7238_v47 }
 0x17d   :  { %2288 = vmatpush1.bf16.msra.mxu1 %v7235_v52  ;;  %2370 = vmatpush1.bf16.msra.mxu0 %v7237_v53 }
 0x17e   :  { %2289 = vmatprep.subr.bf16.mxu1 %v7244_v54  ;;  %2371 = vmatprep.subr.bf16.mxu0 %v7246_v55  ;;  %v825_v55 = vld [vmem:[#allocation6 + $0x440] sm:$0xff] }
 0x181   :  { %2290 = vmatpush1.bf16.msra.mxu1 %v7243_v60  ;;  %2372 = vmatpush1.bf16.msra.mxu0 %v7245_v61 }
 0x182   :  { %2291 = vmatprep.subr.bf16.mxu1 %v7252_v62  ;;  %2373 = vmatprep.subr.bf16.mxu0 %v7254_v63  ;;  %v833_v62 = vld [vmem:[#allocation6 + $0x480] sm:$0xff]  ;;  %v7292_v63 = vcombine.high %v825_v55, %v829_v57 }
 0x185   :  { %2292 = vmatpush1.bf16.msra.mxu1 %v7251_v4  ;;  %2374 = vmatpush1.bf16.msra.mxu0 %v7253_v5  ;;  %v7291_v5 = vcombine.low %v825_v55, %v829_v57  ;;  %v881_v55 = vld [vmem:[#allocation6 + $0x600] sm:$0xff]  ;;  %v882_v57 = vld [vmem:[#allocation6 + $0x608] sm:$0xff] }
 0x186   :  { %2293 = vmatprep.subr.bf16.mxu1 %v7260_v6  ;;  %2375 = vmatprep.subr.bf16.mxu0 %v7262_v7  ;;  %v7293_v6 = vcombine.low %v826_v58, %v830_v59  ;;  %v7300_v7 = vcombine.high %v833_v62, %v837_v1  ;;  %v886_v58 = vld [vmem:[#allocation6 + $0x628] sm:$0xff] }
 0x189   :  { %2294 = vmatpush1.bf16.msra.mxu1 %v7259_v8  ;;  %2376 = vmatpush1.bf16.msra.mxu0 %v7261_v9  ;;  %v7302_v8 = vcombine.high %v834_v2, %v838_v3  ;;  %v841_v9 = vld [vmem:[#allocation6 + $0x4c0] sm:$0xff]  ;;  %v890_v3 = vld [vmem:[#allocation6 + $0x648] sm:$0xff] }
 0x18a   :  { %2295 = vmatprep.subr.bf16.mxu1 %v7268_v13  ;;  %2377 = vmatprep.subr.bf16.mxu0 %v7270_v20  ;;  %v7299_v13 = vcombine.low %v833_v62, %v837_v1  ;;  %v849_v20 = vld [vmem:[#allocation6 + $0x500] sm:$0xff] }
 0x18b   :  { %v889_v1 = vld [vmem:[#allocation6 + $0x640] sm:$0xff] }
 0x18c   :  { %v893_v2 = vld [vmem:[#allocation6 + $0x660] sm:$0xff] }
 0x18d   :  { %2296 = vmatpush1.bf16.msra.mxu1 %v7267_v17  ;;  %2378 = vmatpush1.bf16.msra.mxu0 %v7269_v19  ;;  %v7308_v17 = vcombine.high %v841_v9, %v845_v10  ;;  %v7310_v19 = vcombine.high %v842_v11, %v846_v12  ;;  %v901_v11 = vld [vmem:[#allocation6 + $0x6a0] sm:$0xff]  ;;  %v898_v12 = vld [vmem:[#allocation6 + $0x688] sm:$0xff] }
 0x18e   :  { %2297 = vmatprep.subr.bf16.mxu1 %v7276_v24  ;;  %2379 = vmatprep.subr.bf16.mxu0 %v7278_v28  ;;  %v7307_v24 = vcombine.low %v841_v9, %v845_v10  ;;  %v857_v28 = vld [vmem:[#allocation6 + $0x540] sm:$0xff] }
 0x18f   :  { %v897_v10 = vld [vmem:[#allocation6 + $0x680] sm:$0xff] }
 0x191   :  { %2298 = vmatpush1.bf16.msra.mxu1 %v7275_v26  ;;  %2380 = vmatpush1.bf16.msra.mxu0 %v7277_v27  ;;  %v7316_v26 = vcombine.high %v849_v20, %v853_v21  ;;  %v7318_v27 = vcombine.high %v850_v22, %v854_v23  ;;  %v909_v22 = vld [vmem:[#allocation6 + $0x6e0] sm:$0xff]  ;;  %v906_v23 = vld [vmem:[#allocation6 + $0x6c8] sm:$0xff] }
 0x192   :  { %2308 = vmatprep.subr.bf16.mxu1 %v7284_v32  ;;  %2390 = vmatprep.subr.bf16.mxu0 %v7286_v36  ;;  %v7315_v32 = vcombine.low %v849_v20, %v853_v21  ;;  %v865_v36 = vld [vmem:[#allocation6 + $0x580] sm:$0xff] }
 0x193   :  { %v905_v21 = vld [vmem:[#allocation6 + $0x6c0] sm:$0xff] }
 0x227   :  { %v633_v42 = vpop.f32.mrb[0].mxu1  ;;  %v8635_v43 = vpop.f32.mrb[4].mxu0 }
 0x228   :  { %v634_v44 = vadd.f32 %v633_v42, %v262_v39  ;;  %v635_v45 = vpop.f32.mrb[1].mxu1  ;;  %v676_v46 = vpop.f32.mrb[5].mxu0  ;;  %v869_v39 = vld [vmem:[#allocation6 + $0x5a0] sm:$0xff]  ;;  %v7323_v42 = vcombine.low %v857_v28, %v861_v29 }
 0x229   :  { %v636_v47 = vadd.f32 %v635_v45, %v266_v40  ;;  %v677_v48 = vadd.f32 %v676_v46, %v274_v41  ;;  %v637_v49 = vpop.f32.mrb[2].mxu1  ;;  %v678_v50 = vpop.f32.mrb[6].mxu0  ;;  %v866_v40 = vld [vmem:[#allocation6 + $0x588] sm:$0xff]  ;;  %v7332_v45 = vcombine.high %v865_v36, %v869_v39 }
 0x22a   :  { %v681_v51 = vmax.f32 %v634_v44, 0.0  ;;  %v638_v52 = vpop.f32.mrb[3].mxu1  ;;  %v679_v53 = vpop.f32.mrb[7].mxu0  ;;  %v870_v41 = vld [vmem:[#allocation6 + $0x5a8] sm:$0xff]  ;;  %v7325_v44 = vcombine.low %v858_v30, %v862_v31 }
 0x22b   :  { %v682_v54 = vmax.f32 %v636_v47, 0.0  ;;  %v684_v56 = vmax.f32 %v677_v48, 0.0  ;;  %v7334_v46 = vcombine.high %v866_v40, %v870_v41  ;;  %v873_v47 = vld [vmem:[#allocation6 + $0x5c0] sm:$0xff]  ;;  %v874_v49 = vld [vmem:[#allocation6 + $0x5c8] sm:$0xff]  ;;  %v7333_v52 = vcombine.low %v866_v40, %v870_v41 }
 0x22c   :  { %v8639_v61 = vpack.c.bf16 %v681_v51, %v681_v51  ;;  %v877_v48 = vld [vmem:[#allocation6 + $0x5e0] sm:$0xff]  ;;  %v878_v50 = vld [vmem:[#allocation6 + $0x5e8] sm:$0xff]  ;;  %v7331_v51 = vcombine.low %v865_v36, %v869_v39 }
 0x22d   :  { %v8637_v60 = vpack.c.bf16 %v682_v54, %v682_v54  ;;  %v8643_v4 = vpack.c.bf16 %v684_v56, %v684_v56  ;;  %v7340_v53 = vcombine.high %v873_v47, %v877_v48  ;;  %v7342_v54 = vcombine.high %v874_v49, %v878_v50  ;;  %v885_v56 = vld [vmem:[#allocation6 + $0x620] sm:$0xff]  ;;  %v922_v41 = vld [vmem:[#allocation6 + $0x748] sm:$0xff] }
 0x22e   :  { %v7339_v59 = vcombine.low %v873_v47, %v877_v48  ;;  %v7341_v62 = vcombine.low %v874_v49, %v878_v50  ;;  %v921_v39 = vld [vmem:[#allocation6 + $0x740] sm:$0xff] }
 0x22f   :  { %2299 = vmatprep.mubr.bf16.mxu1 %v8637_v60  ;;  %2381 = vmatprep.mubr.bf16.mxu0 %v8637_v60  ;;  %v925_v40 = vld [vmem:[#allocation6 + $0x760] sm:$0xff] }
 0x230   :  { %2300 = vmatmul.mubr.bf16.vlgmr.msra.gmra.mrb[4].mxu1 %v8639_v61  ;;  %2382 = vmatmul.mubr.bf16.vlgmr.msra.gmra.mrb[8].mxu0 %v8639_v61  ;;  %v7388_v47 = vcombine.high %v921_v39, %v925_v40  ;;  %v929_v49 = vld [vmem:[#allocation6 + $0x780] sm:$0xff] }
 0x231   :  { %2309 = vmatpush1.bf16.msra.mxu1 %v7283_v34  ;;  %2391 = vmatpush1.bf16.msra.mxu0 %v7285_v35  ;;  %v7324_v34 = vcombine.high %v857_v28, %v861_v29  ;;  %v7326_v35 = vcombine.high %v858_v30, %v862_v31  ;;  %v913_v29 = vld [vmem:[#allocation6 + $0x700] sm:$0xff]  ;;  %v914_v31 = vld [vmem:[#allocation6 + $0x708] sm:$0xff] }
 0x232   :  { %2340 = vmatprep.mubr.bf16.mxu1 %v8643_v4  ;;  %2422 = vmatprep.mubr.bf16.mxu0 %v8643_v4  ;;  %v917_v30 = vld [vmem:[#allocation6 + $0x720] sm:$0xff] }
 0x233   :  { %2310 = vmatprep.subr.bf16.mxu1 %v7292_v63  ;;  %2392 = vmatprep.subr.bf16.mxu0 %v7294_v0  ;;  %v7348_v63 = vcombine.high %v881_v55, %v885_v56  ;;  %v7350_v0 = vcombine.high %v882_v57, %v886_v58  ;;  %v933_v50 = vld [vmem:[#allocation6 + $0x7a0] sm:$0xff] }
 0x235   :  { %2311 = vmatpush1.bf16.msra.mxu1 %v7291_v5  ;;  %2393 = vmatpush1.bf16.msra.mxu0 %v7293_v6  ;;  %v894_v5 = vld [vmem:[#allocation6 + $0x668] sm:$0xff]  ;;  %v7347_v6 = vcombine.low %v881_v55, %v885_v56  ;;  %v7396_v56 = vcombine.high %v929_v49, %v933_v50 }
 0x236   :  { %2312 = vmatprep.subr.bf16.mxu1 %v7300_v7  ;;  %2394 = vmatprep.subr.bf16.mxu0 %v7302_v8  ;;  %v7349_v7 = vcombine.low %v882_v57, %v886_v58  ;;  %v7356_v8 = vcombine.high %v889_v1, %v893_v2  ;;  %v7358_v9 = vcombine.high %v890_v3, %v894_v5  ;;  %v937_v58 = vld [vmem:[#allocation6 + $0x7c0] sm:$0xff] }
 0x239   :  { %2313 = vmatpush1.bf16.msra.mxu1 %v7299_v13  ;;  %2395 = vmatpush1.bf16.msra.mxu0 %v7301_v14  ;;  %v902_v13 = vld [vmem:[#allocation6 + $0x6a8] sm:$0xff]  ;;  %v7355_v14 = vcombine.low %v889_v1, %v893_v2 }
 0x23a   :  { %2314 = vmatprep.subr.bf16.mxu1 %v7308_v17  ;;  %2396 = vmatprep.subr.bf16.mxu0 %v7310_v19  ;;  %v7357_v17 = vcombine.low %v890_v3, %v894_v5  ;;  %v7364_v19 = vcombine.high %v897_v10, %v901_v11  ;;  %v7366_v20 = vcombine.high %v898_v12, %v902_v13 }
 0x23d   :  { %2315 = vmatpush1.bf16.msra.mxu1 %v7307_v24  ;;  %2397 = vmatpush1.bf16.msra.mxu0 %v7309_v25  ;;  %v910_v24 = vld [vmem:[#allocation6 + $0x6e8] sm:$0xff]  ;;  %v7363_v25 = vcombine.low %v897_v10, %v901_v11 }
 0x23e   :  { %2316 = vmatprep.subr.bf16.mxu1 %v7316_v26  ;;  %2398 = vmatprep.subr.bf16.mxu0 %v7318_v27  ;;  %v7365_v26 = vcombine.low %v898_v12, %v902_v13  ;;  %v7372_v27 = vcombine.high %v905_v21, %v909_v22  ;;  %v7374_v28 = vcombine.high %v906_v23, %v910_v24 }
 0x241   :  { %2317 = vmatpush1.bf16.msra.mxu1 %v7315_v32  ;;  %2399 = vmatpush1.bf16.msra.mxu0 %v7317_v33  ;;  %v918_v32 = vld [vmem:[#allocation6 + $0x728] sm:$0xff]  ;;  %v7371_v33 = vcombine.low %v905_v21, %v909_v22 }
 0x242   :  { %2318 = vmatprep.subr.bf16.mxu1 %v7324_v34  ;;  %2400 = vmatprep.subr.bf16.mxu0 %v7326_v35  ;;  %v7373_v34 = vcombine.low %v906_v23, %v910_v24  ;;  %v7380_v35 = vcombine.high %v913_v29, %v917_v30  ;;  %v7382_v36 = vcombine.high %v914_v31, %v918_v32 }
 0x245   :  { %2319 = vmatpush1.bf16.msra.mxu1 %v7323_v42  ;;  %2401 = vmatpush1.bf16.msra.mxu0 %v7325_v44  ;;  %v926_v42 = vld [vmem:[#allocation6 + $0x768] sm:$0xff]  ;;  %v7379_v44 = vcombine.low %v913_v29, %v917_v30 }
 0x246   :  { %2320 = vmatprep.subr.bf16.mxu1 %v7332_v45  ;;  %2402 = vmatprep.subr.bf16.mxu0 %v7334_v46  ;;  %v7381_v45 = vcombine.low %v914_v31, %v918_v32  ;;  %v8650_v46 = vsub.s32 2, %v8614_v15  ;;  %v7390_v48 = vcombine.high %v922_v41, %v926_v42 }
 0x248   :  { %v270_v55 = vrot.slane %v8624_v37, %v8650_v46  ;;  %v695_v37 = vld [vmem:[#allocation6 + $0x30] sm:$0xff] }
 0x249   :  { %2321 = vmatpush1.bf16.msra.mxu1 %v7331_v51  ;;  %2403 = vmatpush1.bf16.msra.mxu0 %v7333_v52  ;;  %v930_v51 = vld [vmem:[#allocation6 + $0x788] sm:$0xff] }
 0x24a   :  { %2322 = vmatprep.subr.bf16.mxu1 %v7340_v53  ;;  %2404 = vmatprep.subr.bf16.mxu0 %v7342_v54  ;;  %v934_v52 = vld [vmem:[#allocation6 + $0x7a8] sm:$0xff]  ;;  %v7387_v53 = vcombine.low %v921_v39, %v925_v40  ;;  %v7389_v54 = vcombine.low %v922_v41, %v926_v42  ;;  %v675_v2 = vadd.f32 %v8635_v43, %v270_v55  ;;  %v700_v43 = vld [vmem:[#allocation6 + $0x58] sm:$0xff] }
 0x24b   :  { %v7398_v57 = vcombine.high %v930_v51, %v934_v52  ;;  %v7397_v1 = vcombine.low %v930_v51, %v934_v52  ;;  %v731_v52 = vld [vmem:[#allocation6 + $0x150] sm:$0xff]  ;;  %v736_v55 = vld [vmem:[#allocation6 + $0x178] sm:$0xff] }
 0x24c   :  { %v683_v11 = vmax.f32 %v675_v2, 0.0 }
 0x24d   :  { %2323 = vmatpush1.bf16.msra.mxu1 %v7339_v59  ;;  %2405 = vmatpush1.bf16.msra.mxu0 %v7341_v62  ;;  %v941_v59 = vld [vmem:[#allocation6 + $0x7e0] sm:$0xff]  ;;  %v938_v62 = vld [vmem:[#allocation6 + $0x7c8] sm:$0xff] }
 0x24e   :  { %2324 = vmatprep.subr.bf16.mxu1 %v7348_v63  ;;  %2406 = vmatprep.subr.bf16.mxu0 %v7350_v0  ;;  %v942_v63 = vld [vmem:[#allocation6 + $0x7e8] sm:$0xff]  ;;  %v7395_v0 = vcombine.low %v929_v49, %v933_v50  ;;  %v7404_v3 = vcombine.high %v937_v58, %v941_v59  ;;  %v8655_v21 = vpack.c.bf16 %v683_v11, %v683_v11 }
 0x24f   :  { %v7406_v5 = vcombine.high %v938_v62, %v942_v63  ;;  %v7405_v10 = vcombine.low %v938_v62, %v942_v63  ;;  %v739_v62 = vld [vmem:[#allocation6 + $0x190] sm:$0xff] }
 0x250   :  { %v743_v63 = vld [vmem:[#allocation6 + $0x1b0] sm:$0xff] }
 0x251   :  { %2325 = vmatpush1.bf16.msra.mxu1 %v7347_v6  ;;  %2407 = vmatpush1.bf16.msra.mxu0 %v7349_v7  ;;  %v691_v6 = vld [vmem:[#allocation6 + $0x10] sm:$0xff]  ;;  %v692_v7 = vld [vmem:[#allocation6 + $0x18] sm:$0xff] }
 0x252   :  { %2326 = vmatprep.subr.bf16.mxu1 %v7356_v8  ;;  %2408 = vmatprep.subr.bf16.mxu0 %v7358_v9  ;;  %v696_v8 = vld [vmem:[#allocation6 + $0x38] sm:$0xff]  ;;  %v7403_v9 = vcombine.low %v937_v58, %v941_v59  ;;  %v7160_v12 = vcombine.high %v691_v6, %v695_v37 }
 0x253   :  { %v7162_v13 = vcombine.high %v692_v7, %v696_v8  ;;  %v7161_v22 = vcombine.low %v692_v7, %v696_v8  ;;  %v751_v7 = vld [vmem:[#allocation6 + $0x1f0] sm:$0xff]  ;;  %v748_v8 = vld [vmem:[#allocation6 + $0x1d8] sm:$0xff] }
 0x255   :  { %2327 = vmatpush1.bf16.msra.mxu1 %v7355_v14  ;;  %2409 = vmatpush1.bf16.msra.mxu0 %v7357_v17  ;;  %v699_v14 = vld [vmem:[#allocation6 + $0x50] sm:$0xff] }
 0x256   :  { %2328 = vmatprep.subr.bf16.mxu1 %v7364_v19  ;;  %2410 = vmatprep.subr.bf16.mxu0 %v7366_v20  ;;  %v703_v17 = vld [vmem:[#allocation6 + $0x70] sm:$0xff]  ;;  %v704_v19 = vld [vmem:[#allocation6 + $0x78] sm:$0xff]  ;;  %v7159_v20 = vcombine.low %v691_v6, %v695_v37 }
 0x257   :  { %v7168_v23 = vcombine.high %v699_v14, %v703_v17  ;;  %v7170_v24 = vcombine.high %v700_v43, %v704_v19  ;;  %v7167_v29 = vcombine.low %v699_v14, %v703_v17  ;;  %v7169_v30 = vcombine.low %v700_v43, %v704_v19  ;;  %v747_v37 = vld [vmem:[#allocation6 + $0x1d0] sm:$0xff]  ;;  %v756_v43 = vld [vmem:[#allocation6 + $0x218] sm:$0xff] }
 0x258   :  { %v755_v14 = vld [vmem:[#allocation6 + $0x210] sm:$0xff]  ;;  %v760_v19 = vld [vmem:[#allocation6 + $0x238] sm:$0xff] }
 0x259   :  { %2329 = vmatpush1.bf16.msra.mxu1 %v7363_v25  ;;  %2411 = vmatpush1.bf16.msra.mxu0 %v7365_v26  ;;  %v707_v25 = vld [vmem:[#allocation6 + $0x90] sm:$0xff] }
 0x25a   :  { %2330 = vmatprep.subr.bf16.mxu1 %v7372_v27  ;;  %2412 = vmatprep.subr.bf16.mxu0 %v7374_v28  ;;  %v711_v26 = vld [vmem:[#allocation6 + $0xb0] sm:$0xff]  ;;  %v708_v27 = vld [vmem:[#allocation6 + $0x98] sm:$0xff] }
 0x25b   :  { %v712_v28 = vld [vmem:[#allocation6 + $0xb8] sm:$0xff]  ;;  %v7176_v31 = vcombine.high %v707_v25, %v711_v26  ;;  %v7175_v39 = vcombine.low %v707_v25, %v711_v26  ;;  %v759_v17 = vld [vmem:[#allocation6 + $0x230] sm:$0xff] }
 0x25c   :  { %v7178_v32 = vcombine.high %v708_v27, %v712_v28  ;;  %v7177_v40 = vcombine.low %v708_v27, %v712_v28  ;;  %v763_v25 = vld [vmem:[#allocation6 + $0x250] sm:$0xff]  ;;  %v764_v27 = vld [vmem:[#allocation6 + $0x258] sm:$0xff] }
 0x25d   :  { %2331 = vmatpush1.bf16.msra.mxu1 %v7371_v33  ;;  %2413 = vmatpush1.bf16.msra.mxu0 %v7373_v34  ;;  %v715_v33 = vld [vmem:[#allocation6 + $0xd0] sm:$0xff]  ;;  %v768_v28 = vld [vmem:[#allocation6 + $0x278] sm:$0xff] }
 0x25e   :  { %2332 = vmatprep.subr.bf16.mxu1 %v7380_v35  ;;  %2414 = vmatprep.subr.bf16.mxu0 %v7382_v36  ;;  %v719_v34 = vld [vmem:[#allocation6 + $0xf0] sm:$0xff]  ;;  %v716_v35 = vld [vmem:[#allocation6 + $0xd8] sm:$0xff] }
 0x25f   :  { %v720_v36 = vld [vmem:[#allocation6 + $0xf8] sm:$0xff]  ;;  %v7184_v41 = vcombine.high %v715_v33, %v719_v34  ;;  %v767_v26 = vld [vmem:[#allocation6 + $0x270] sm:$0xff] }
 0x260   :  { %v7186_v42 = vcombine.high %v716_v35, %v720_v36  ;;  %v7185_v49 = vcombine.low %v716_v35, %v720_v36  ;;  %v772_v35 = vld [vmem:[#allocation6 + $0x298] sm:$0xff] }
 0x261   :  { %2333 = vmatpush1.bf16.msra.mxu1 %v7379_v44  ;;  %2415 = vmatpush1.bf16.msra.mxu0 %v7381_v45  ;;  %v723_v44 = vld [vmem:[#allocation6 + $0x110] sm:$0xff]  ;;  %v776_v36 = vld [vmem:[#allocation6 + $0x2b8] sm:$0xff] }
 0x262   :  { %2334 = vmatprep.subr.bf16.mxu1 %v7388_v47  ;;  %2416 = vmatprep.subr.bf16.mxu0 %v7390_v48  ;;  %v727_v45 = vld [vmem:[#allocation6 + $0x130] sm:$0xff]  ;;  %v728_v47 = vld [vmem:[#allocation6 + $0x138] sm:$0xff]  ;;  %v7183_v48 = vcombine.low %v715_v33, %v719_v34 }
 0x263   :  { %v7192_v50 = vcombine.high %v723_v44, %v727_v45  ;;  %v771_v33 = vld [vmem:[#allocation6 + $0x290] sm:$0xff] }
 0x264   :  { %v775_v34 = vld [vmem:[#allocation6 + $0x2b0] sm:$0xff] }
 0x265   :  { %2335 = vmatpush1.bf16.msra.mxu1 %v7387_v53  ;;  %2417 = vmatpush1.bf16.msra.mxu0 %v7389_v54  ;;  %v735_v53 = vld [vmem:[#allocation6 + $0x170] sm:$0xff]  ;;  %v732_v54 = vld [vmem:[#allocation6 + $0x158] sm:$0xff] }
 0x266   :  { %2336 = vmatprep.subr.bf16.mxu1 %v7396_v56  ;;  %2418 = vmatprep.subr.bf16.mxu0 %v7398_v57  ;;  %v7191_v56 = vcombine.low %v723_v44, %v727_v45  ;;  %v7200_v58 = vcombine.high %v731_v52, %v735_v53  ;;  %v7202_v59 = vcombine.high %v732_v54, %v736_v55  ;;  %v779_v44 = vld [vmem:[#allocation6 + $0x2d0] sm:$0xff] }
 0x267   :  { %v7199_v2 = vcombine.low %v731_v52, %v735_v53  ;;  %v783_v45 = vld [vmem:[#allocation6 + $0x2f0] sm:$0xff] }
 0x268   :  { %v787_v52 = vld [vmem:[#allocation6 + $0x310] sm:$0xff] }
 0x269   :  { %2337 = vmatpush1.bf16.msra.mxu1 %v7395_v0  ;;  %2419 = vmatpush1.bf16.msra.mxu0 %v7397_v1  ;;  %v740_v0 = vld [vmem:[#allocation6 + $0x198] sm:$0xff]  ;;  %v791_v53 = vld [vmem:[#allocation6 + $0x330] sm:$0xff] }
 0x26a   :  { %2338 = vmatprep.subr.bf16.mxu1 %v7404_v3  ;;  %2420 = vmatprep.subr.bf16.mxu0 %v7406_v5  ;;  %v744_v1 = vld [vmem:[#allocation6 + $0x1b8] sm:$0xff]  ;;  %v7201_v3 = vcombine.low %v732_v54, %v736_v55  ;;  %v7208_v5 = vcombine.high %v739_v62, %v743_v63 }
 0x26b   :  { %v7210_v6 = vcombine.high %v740_v0, %v744_v1  ;;  %v7209_v11 = vcombine.low %v740_v0, %v744_v1  ;;  %v788_v54 = vld [vmem:[#allocation6 + $0x318] sm:$0xff] }
 0x26c   :  { %v792_v55 = vld [vmem:[#allocation6 + $0x338] sm:$0xff] }
 0x26d   :  { %2339 = vmatpush1.bf16.msra.mxu1 %v7403_v9  ;;  %2421 = vmatpush1.bf16.msra.mxu0 %v7405_v10  ;;  %v752_v9 = vld [vmem:[#allocation6 + $0x1f8] sm:$0xff]  ;;  %v7207_v10 = vcombine.low %v739_v62, %v743_v63  ;;  %v795_v62 = vld [vmem:[#allocation6 + $0x350] sm:$0xff] }
 0x26e   :  { %2431 = vmatprep.subr.bf16.mxu1 %v7160_v12  ;;  %2513 = vmatprep.subr.bf16.mxu0 %v7162_v13  ;;  %v7216_v12 = vcombine.high %v747_v37, %v751_v7  ;;  %v7218_v13 = vcombine.high %v748_v8, %v752_v9  ;;  %v799_v63 = vld [vmem:[#allocation6 + $0x370] sm:$0xff]  ;;  %v796_v0 = vld [vmem:[#allocation6 + $0x358] sm:$0xff] }
 0x26f   :  { %v800_v1 = vld [vmem:[#allocation6 + $0x378] sm:$0xff] }
 0x270   :  { %2341 = vmatmul.mubr.bf16.vlgmr.msra.gmra.mrb[4].mxu1 %v8655_v21  ;;  %2423 = vmatmul.mubr.bf16.vlgmr.msra.gmra.mrb[8].mxu0 %v8655_v21 }
 0x271   :  { %2432 = vmatpush1.bf16.msra.mxu1 %v7159_v20  ;;  %2463 = vmatprep.mubr.bf16.mxu1 %v8637_v60  ;;  %v7215_v20 = vcombine.low %v747_v37, %v751_v7  ;;  %v803_v37 = vld [vmem:[#allocation6 + $0x390] sm:$0xff] }
 0x272   :  { %2514 = vmatpush1.bf16.msra.mxu0 %v7161_v22  ;;  %2545 = vmatprep.mubr.bf16.mxu0 %v8637_v60  ;;  %v724_v60 = vld [vmem:[#allocation6 + $0x118] sm:$0xff]  ;;  %v7217_v22 = vcombine.low %v748_v8, %v752_v9  ;;  %v807_v7 = vld [vmem:[#allocation6 + $0x3b0] sm:$0xff] }
 0x273   :  { %2433 = vmatprep.subr.bf16.mxu1 %v7168_v23  ;;  %2515 = vmatprep.subr.bf16.mxu0 %v7170_v24  ;;  %v7194_v51 = vcombine.high %v724_v60, %v728_v47  ;;  %v7193_v57 = vcombine.low %v724_v60, %v728_v47  ;;  %v7224_v23 = vcombine.high %v755_v14, %v759_v17  ;;  %v780_v60 = vld [vmem:[#allocation6 + $0x2d8] sm:$0xff] }
 0x274   :  { %v7226_v24 = vcombine.high %v756_v43, %v760_v19  ;;  %v784_v47 = vld [vmem:[#allocation6 + $0x2f8] sm:$0xff] }
 0x275   :  { %2434 = vmatpush1.bf16.msra.mxu1 %v7167_v29  ;;  %v7223_v29 = vcombine.low %v755_v14, %v759_v17  ;;  %v804_v8 = vld [vmem:[#allocation6 + $0x398] sm:$0xff]  ;;  %v811_v14 = vld [vmem:[#allocation6 + $0x3d0] sm:$0xff] }
 0x276   :  { %2516 = vmatpush1.bf16.msra.mxu0 %v7169_v30  ;;  %2435 = vmatprep.subr.bf16.mxu1 %v7176_v31  ;;  %v7225_v30 = vcombine.low %v756_v43, %v760_v19  ;;  %v7232_v31 = vcombine.high %v763_v25, %v767_v26  ;;  %v808_v9 = vld [vmem:[#allocation6 + $0x3b8] sm:$0xff]  ;;  %v815_v17 = vld [vmem:[#allocation6 + $0x3f0] sm:$0xff] }
 0x277   :  { %2517 = vmatprep.subr.bf16.mxu0 %v7178_v32  ;;  %v7234_v32 = vcombine.high %v764_v27, %v768_v28  ;;  %v812_v43 = vld [vmem:[#allocation6 + $0x3d8] sm:$0xff] }
 0x278   :  { %v816_v19 = vld [vmem:[#allocation6 + $0x3f8] sm:$0xff] }
 0x279   :  { %2436 = vmatpush1.bf16.msra.mxu1 %v7175_v39  ;;  %v7231_v39 = vcombine.low %v763_v25, %v767_v26  ;;  %v819_v25 = vld [vmem:[#allocation6 + $0x410] sm:$0xff] }
 0x27a   :  { %2518 = vmatpush1.bf16.msra.mxu0 %v7177_v40  ;;  %2437 = vmatprep.subr.bf16.mxu1 %v7184_v41  ;;  %v7233_v40 = vcombine.low %v764_v27, %v768_v28  ;;  %v7240_v41 = vcombine.high %v771_v33, %v775_v34  ;;  %v823_v26 = vld [vmem:[#allocation6 + $0x430] sm:$0xff]  ;;  %v820_v27 = vld [vmem:[#allocation6 + $0x418] sm:$0xff] }
 0x27b   :  { %2519 = vmatprep.subr.bf16.mxu0 %v7186_v42  ;;  %v7242_v42 = vcombine.high %v772_v35, %v776_v36  ;;  %v824_v28 = vld [vmem:[#allocation6 + $0x438] sm:$0xff] }
 0x27d   :  { %2438 = vmatpush1.bf16.msra.mxu1 %v7183_v48  ;;  %v7239_v48 = vcombine.low %v771_v33, %v775_v34  ;;  %v827_v33 = vld [vmem:[#allocation6 + $0x450] sm:$0xff] }
 0x27e   :  { %2520 = vmatpush1.bf16.msra.mxu0 %v7185_v49  ;;  %2439 = vmatprep.subr.bf16.mxu1 %v7192_v50  ;;  %v7241_v49 = vcombine.low %v772_v35, %v776_v36  ;;  %v7248_v50 = vcombine.high %v779_v44, %v783_v45  ;;  %v831_v34 = vld [vmem:[#allocation6 + $0x470] sm:$0xff]  ;;  %v7287_v35 = vcombine.low %v819_v25, %v823_v26  ;;  %v828_v36 = vld [vmem:[#allocation6 + $0x458] sm:$0xff] }
 0x27f   :  { %2521 = vmatprep.subr.bf16.mxu0 %v7194_v51  ;;  %v7250_v51 = vcombine.high %v780_v60, %v784_v47 }
 0x281   :  { %2440 = vmatpush1.bf16.msra.mxu1 %v7191_v56  ;;  %v7247_v56 = vcombine.low %v779_v44, %v783_v45  ;;  %v839_v44 = vld [vmem:[#allocation6 + $0x4b0] sm:$0xff] }
 0x282   :  { %2522 = vmatpush1.bf16.msra.mxu0 %v7193_v57  ;;  %2441 = vmatprep.subr.bf16.mxu1 %v7200_v58  ;;  %v7249_v57 = vcombine.low %v780_v60, %v784_v47  ;;  %v7256_v58 = vcombine.high %v787_v52, %v791_v53  ;;  %v836_v60 = vld [vmem:[#allocation6 + $0x498] sm:$0xff] }
 0x283   :  { %2523 = vmatprep.subr.bf16.mxu0 %v7202_v59  ;;  %v7258_v59 = vcombine.high %v788_v54, %v792_v55  ;;  %v840_v47 = vld [vmem:[#allocation6 + $0x4b8] sm:$0xff] }
 0x285   :  { %2442 = vmatpush1.bf16.msra.mxu1 %v7199_v2  ;;  %v7255_v2 = vcombine.low %v787_v52, %v791_v53  ;;  %v843_v52 = vld [vmem:[#allocation6 + $0x4d0] sm:$0xff] }
 0x286   :  { %2524 = vmatpush1.bf16.msra.mxu0 %v7201_v3  ;;  %2443 = vmatprep.subr.bf16.mxu1 %v7208_v5  ;;  %v7257_v3 = vcombine.low %v788_v54, %v792_v55  ;;  %v7264_v5 = vcombine.high %v795_v62, %v799_v63  ;;  %v847_v53 = vld [vmem:[#allocation6 + $0x4f0] sm:$0xff]  ;;  %v844_v54 = vld [vmem:[#allocation6 + $0x4d8] sm:$0xff] }
 0x287   :  { %2525 = vmatprep.subr.bf16.mxu0 %v7210_v6  ;;  %v7266_v6 = vcombine.high %v796_v0, %v800_v1  ;;  %v848_v55 = vld [vmem:[#allocation6 + $0x4f8] sm:$0xff] }
 0x289   :  { %2444 = vmatpush1.bf16.msra.mxu1 %v7207_v10  ;;  %v7263_v10 = vcombine.low %v795_v62, %v799_v63  ;;  %v855_v62 = vld [vmem:[#allocation6 + $0x530] sm:$0xff]  ;;  %v852_v63 = vld [vmem:[#allocation6 + $0x518] sm:$0xff] }
 0x28a   :  { %2526 = vmatpush1.bf16.msra.mxu0 %v7209_v11  ;;  %2445 = vmatprep.subr.bf16.mxu1 %v7216_v12  ;;  %v7265_v11 = vcombine.low %v796_v0, %v800_v1  ;;  %v7272_v12 = vcombine.high %v803_v37, %v807_v7  ;;  %v856_v0 = vld [vmem:[#allocation6 + $0x538] sm:$0xff]  ;;  %v7313_v1 = vcombine.low %v844_v54, %v848_v55 }
 0x28b   :  { %2527 = vmatprep.subr.bf16.mxu0 %v7218_v13  ;;  %v7274_v13 = vcombine.high %v804_v8, %v808_v9 }
 0x28d   :  { %2446 = vmatpush1.bf16.msra.mxu1 %v7215_v20  ;;  %v7271_v20 = vcombine.low %v803_v37, %v807_v7  ;;  %v860_v37 = vld [vmem:[#allocation6 + $0x558] sm:$0xff] }
 0x28e   :  { %2528 = vmatpush1.bf16.msra.mxu0 %v7217_v22  ;;  %2447 = vmatprep.subr.bf16.mxu1 %v7224_v23  ;;  %v7273_v22 = vcombine.low %v804_v8, %v808_v9  ;;  %v7280_v23 = vcombine.high %v811_v14, %v815_v17  ;;  %v864_v7 = vld [vmem:[#allocation6 + $0x578] sm:$0xff]  ;;  %v7321_v9 = vcombine.low %v852_v63, %v856_v0 }
 0x28f   :  { %2529 = vmatprep.subr.bf16.mxu0 %v7226_v24  ;;  %v7282_v24 = vcombine.high %v812_v43, %v816_v19 }
 0x291   :  { %2448 = vmatpush1.bf16.msra.mxu1 %v7223_v29  ;;  %v7279_v29 = vcombine.low %v811_v14, %v815_v17  ;;  %v868_v14 = vld [vmem:[#allocation6 + $0x598] sm:$0xff] }
 0x292   :  { %2530 = vmatpush1.bf16.msra.mxu0 %v7225_v30  ;;  %2449 = vmatprep.subr.bf16.mxu1 %v7232_v31  ;;  %v7281_v30 = vcombine.low %v812_v43, %v816_v19  ;;  %v7288_v31 = vcombine.high %v819_v25, %v823_v26  ;;  %v872_v17 = vld [vmem:[#allocation6 + $0x5b8] sm:$0xff]  ;;  %v7329_v19 = vcombine.low %v860_v37, %v864_v7 }
 0x293   :  { %2531 = vmatprep.subr.bf16.mxu0 %v7234_v32  ;;  %v7290_v32 = vcombine.high %v820_v27, %v824_v28  ;;  %v876_v25 = vld [vmem:[#allocation6 + $0x5d8] sm:$0xff] }
 0x294   :  { %v880_v26 = vld [vmem:[#allocation6 + $0x5f8] sm:$0xff] }
 0x295   :  { %2450 = vmatpush1.bf16.msra.mxu1 %v7231_v39  ;;  %v832_v39 = vld [vmem:[#allocation6 + $0x478] sm:$0xff] }
 0x296   :  { %2532 = vmatpush1.bf16.msra.mxu0 %v7233_v40  ;;  %2451 = vmatprep.subr.bf16.mxu1 %v7240_v41  ;;  %v7289_v40 = vcombine.low %v820_v27, %v824_v28  ;;  %v7296_v41 = vcombine.high %v827_v33, %v831_v34  ;;  %v7298_v45 = vcombine.high %v828_v36, %v832_v39 }
 0x297   :  { %2533 = vmatprep.subr.bf16.mxu0 %v7242_v42  ;;  %v835_v42 = vld [vmem:[#allocation6 + $0x490] sm:$0xff]  ;;  %v7337_v28 = vcombine.low %v868_v14, %v872_v17 }
 0x299   :  { %2452 = vmatpush1.bf16.msra.mxu1 %v7239_v48  ;;  %v7295_v48 = vcombine.low %v827_v33, %v831_v34  ;;  %v884_v33 = vld [vmem:[#allocation6 + $0x618] sm:$0xff] }
 0x29a   :  { %2534 = vmatpush1.bf16.msra.mxu0 %v7241_v49  ;;  %2453 = vmatprep.subr.bf16.mxu1 %v7248_v50  ;;  %v7297_v49 = vcombine.low %v828_v36, %v832_v39  ;;  %v7304_v50 = vcombine.high %v835_v42, %v839_v44  ;;  %v888_v34 = vld [vmem:[#allocation6 + $0x638] sm:$0xff]  ;;  %v7345_v36 = vcombine.low %v876_v25, %v880_v26 }
 0x29b   :  { %2535 = vmatprep.subr.bf16.mxu0 %v7250_v51  ;;  %v7306_v51 = vcombine.high %v836_v60, %v840_v47 }
 0x29d   :  { %2454 = vmatpush1.bf16.msra.mxu1 %v7247_v56  ;;  %v7303_v56 = vcombine.low %v835_v42, %v839_v44  ;;  %v895_v42 = vld [vmem:[#allocation6 + $0x670] sm:$0xff]  ;;  %v892_v44 = vld [vmem:[#allocation6 + $0x658] sm:$0xff] }
 0x29e   :  { %2536 = vmatpush1.bf16.msra.mxu0 %v7249_v57  ;;  %2455 = vmatprep.subr.bf16.mxu1 %v7256_v58  ;;  %v7312_v57 = vcombine.high %v843_v52, %v847_v53  ;;  %v7314_v58 = vcombine.high %v844_v54, %v848_v55 }
 0x29f   :  { %2537 = vmatprep.subr.bf16.mxu0 %v7258_v59  ;;  %v851_v59 = vld [vmem:[#allocation6 + $0x510] sm:$0xff] }
 0x2a0   :  { %v7319_v8 = vcombine.low %v851_v59, %v855_v62 }
 0x2a1   :  { %2456 = vmatpush1.bf16.msra.mxu1 %v7255_v2  ;;  %v7320_v2 = vcombine.high %v851_v59, %v855_v62  ;;  %v908_v59 = vld [vmem:[#allocation6 + $0x6d8] sm:$0xff] }
 0x2a2   :  { %2538 = vmatpush1.bf16.msra.mxu0 %v7257_v3  ;;  %2457 = vmatprep.subr.bf16.mxu1 %v7264_v5  ;;  %v7322_v3 = vcombine.high %v852_v63, %v856_v0  ;;  %v859_v5 = vld [vmem:[#allocation6 + $0x550] sm:$0xff]  ;;  %v912_v62 = vld [vmem:[#allocation6 + $0x6f8] sm:$0xff] }
 0x2a3   :  { %2539 = vmatprep.subr.bf16.mxu0 %v7266_v6  ;;  %v863_v6 = vld [vmem:[#allocation6 + $0x570] sm:$0xff] }
 0x2a4   :  { %v7327_v43 = vcombine.low %v859_v5, %v863_v6 }
 0x2a5   :  { %2458 = vmatpush1.bf16.msra.mxu1 %v7263_v10  ;;  %v7328_v10 = vcombine.high %v859_v5, %v863_v6  ;;  %v916_v5 = vld [vmem:[#allocation6 + $0x718] sm:$0xff] }
 0x2a6   :  { %2540 = vmatpush1.bf16.msra.mxu0 %v7265_v11  ;;  %2459 = vmatprep.subr.bf16.mxu1 %v7272_v12  ;;  %v7330_v11 = vcombine.high %v860_v37, %v864_v7  ;;  %v867_v12 = vld [vmem:[#allocation6 + $0x590] sm:$0xff]  ;;  %v920_v6 = vld [vmem:[#allocation6 + $0x738] sm:$0xff]  ;;  %v7377_v7 = vcombine.low %v908_v59, %v912_v62 }
 0x2a7   :  { %2541 = vmatprep.subr.bf16.mxu0 %v7274_v13  ;;  %v871_v13 = vld [vmem:[#allocation6 + $0x5b0] sm:$0xff] }
 0x2a8   :  { %v7335_v27 = vcombine.low %v867_v12, %v871_v13 }
 0x2a9   :  { %2460 = vmatpush1.bf16.msra.mxu1 %v7271_v20  ;;  %v7336_v20 = vcombine.high %v867_v12, %v871_v13  ;;  %v924_v12 = vld [vmem:[#allocation6 + $0x758] sm:$0xff] }
 0x2aa   :  { %2542 = vmatpush1.bf16.msra.mxu0 %v7273_v22  ;;  %2461 = vmatprep.subr.bf16.mxu1 %v7280_v23  ;;  %v7338_v22 = vcombine.high %v868_v14, %v872_v17  ;;  %v875_v23 = vld [vmem:[#allocation6 + $0x5d0] sm:$0xff]  ;;  %v928_v13 = vld [vmem:[#allocation6 + $0x778] sm:$0xff]  ;;  %v7385_v17 = vcombine.low %v916_v5, %v920_v6 }
 0x2ab   :  { %2543 = vmatprep.subr.bf16.mxu0 %v7282_v24  ;;  %v879_v24 = vld [vmem:[#allocation6 + $0x5f0] sm:$0xff] }
 0x2ad   :  { %2462 = vmatpush1.bf16.msra.mxu1 %v7279_v29  ;;  %v7344_v29 = vcombine.high %v875_v23, %v879_v24 }
 0x2ae   :  { %2544 = vmatpush1.bf16.msra.mxu0 %v7281_v30  ;;  %2472 = vmatprep.subr.bf16.mxu1 %v7288_v31  ;;  %v7346_v30 = vcombine.high %v876_v25, %v880_v26  ;;  %v883_v31 = vld [vmem:[#allocation6 + $0x610] sm:$0xff]  ;;  %v7393_v26 = vcombine.low %v924_v12, %v928_v13 }
 0x2af   :  { %2554 = vmatprep.subr.bf16.mxu0 %v7290_v32  ;;  %v887_v32 = vld [vmem:[#allocation6 + $0x630] sm:$0xff] }
 0x2b0   :  { %2464 = vmatmul.mubr.bf16.vlgmr.msra.gmra.mrb[8].mxu1 %v8639_v61  ;;  %v7352_v39 = vcombine.high %v883_v31, %v887_v32 }
 0x2b1   :  { %2546 = vmatmul.mubr.bf16.vlgmr.msra.gmra.mrb[12].mxu0 %v8639_v61  ;;  %2473 = vmatpush1.bf16.msra.mxu1 %v7287_v35  ;;  %v7305_v61 = vcombine.low %v836_v60, %v840_v47  ;;  %v7343_v35 = vcombine.low %v875_v23, %v879_v24  ;;  %v7351_v60 = vcombine.low %v883_v31, %v887_v32  ;;  %v932_v23 = vld [vmem:[#allocation6 + $0x798] sm:$0xff] }
 0x2b2   :  { %2504 = vmatprep.mubr.bf16.mxu1 %v8643_v4  ;;  %2555 = vmatpush1.bf16.msra.mxu0 %v7289_v40  ;;  %v7354_v40 = vcombine.high %v884_v33, %v888_v34  ;;  %v7353_v47 = vcombine.low %v884_v33, %v888_v34  ;;  %v936_v24 = vld [vmem:[#allocation6 + $0x7b8] sm:$0xff] }
 0x2b3   :  { %2586 = vmatprep.mubr.bf16.mxu0 %v8643_v4  ;;  %2474 = vmatprep.subr.bf16.mxu1 %v7296_v41  ;;  %v7311_v4 = vcombine.low %v843_v52, %v847_v53  ;;  %v891_v41 = vld [vmem:[#allocation6 + $0x650] sm:$0xff]  ;;  %v900_v52 = vld [vmem:[#allocation6 + $0x698] sm:$0xff]  ;;  %v7401_v34 = vcombine.low %v932_v23, %v936_v24 }
 0x2b4   :  { %2556 = vmatprep.subr.bf16.mxu0 %v7298_v45  ;;  %v896_v45 = vld [vmem:[#allocation6 + $0x678] sm:$0xff]  ;;  %v7359_v54 = vcombine.low %v891_v41, %v895_v42 }
 0x2b5   :  { %2475 = vmatpush1.bf16.msra.mxu1 %v7295_v48  ;;  %v7360_v48 = vcombine.high %v891_v41, %v895_v42  ;;  %v904_v53 = vld [vmem:[#allocation6 + $0x6b8] sm:$0xff]  ;;  %v7361_v55 = vcombine.low %v892_v44, %v896_v45  ;;  %v2612_v41 = vld [vmem:[#allocation7 + $0x8] sm:$0xff] }
 0x2b6   :  { %2557 = vmatpush1.bf16.msra.mxu0 %v7297_v49  ;;  %2476 = vmatprep.subr.bf16.mxu1 %v7304_v50  ;;  %v7362_v49 = vcombine.high %v892_v44, %v896_v45  ;;  %v899_v50 = vld [vmem:[#allocation6 + $0x690] sm:$0xff]  ;;  %v7369_v0 = vcombine.low %v900_v52, %v904_v53  ;;  %v940_v31 = vld [vmem:[#allocation6 + $0x7d8] sm:$0xff]  ;;  %v2616_v42 = vld [vmem:[#allocation7 + $0x28] sm:$0xff] }
 0x2b7   :  { %2558 = vmatprep.subr.bf16.mxu0 %v7306_v51  ;;  %v903_v51 = vld [vmem:[#allocation6 + $0x6b0] sm:$0xff]  ;;  %v944_v32 = vld [vmem:[#allocation6 + $0x7f8] sm:$0xff] }
 0x2b8   :  { %v7367_v63 = vcombine.low %v899_v50, %v903_v51  ;;  %v7409_v45 = vcombine.low %v940_v31, %v944_v32 }
 0x2b9   :  { %2477 = vmatpush1.bf16.msra.mxu1 %v7303_v56  ;;  %v7368_v56 = vcombine.high %v899_v50, %v903_v51  ;;  %v2620_v50 = vld [vmem:[#allocation7 + $0x48] sm:$0xff] }
 0x2ba   :  { %2559 = vmatpush1.bf16.msra.mxu0 %v7305_v61  ;;  %2478 = vmatprep.subr.bf16.mxu1 %v7312_v57  ;;  %v7370_v61 = vcombine.high %v900_v52, %v904_v53  ;;  %v907_v57 = vld [vmem:[#allocation6 + $0x6d0] sm:$0xff]  ;;  %v2624_v51 = vld [vmem:[#allocation7 + $0x68] sm:$0xff]  ;;  %v7413_v53 = vcombine.low %v2612_v41, %v2616_v42 }
 0x2bb   :  { %2560 = vmatprep.subr.bf16.mxu0 %v7314_v58  ;;  %v911_v58 = vld [vmem:[#allocation6 + $0x6f0] sm:$0xff] }
 0x2bc   :  { %v7375_v37 = vcombine.low %v907_v57, %v911_v58 }
 0x2bd   :  { %2479 = vmatpush1.bf16.msra.mxu1 %v7311_v4  ;;  %v7376_v4 = vcombine.high %v907_v57, %v911_v58  ;;  %v2628_v57 = vld [vmem:[#allocation7 + $0x88] sm:$0xff] }
 0x2be   :  { %2561 = vmatpush1.bf16.msra.mxu0 %v7313_v1  ;;  %2480 = vmatprep.subr.bf16.mxu1 %v7320_v2  ;;  %v7378_v1 = vcombine.high %v908_v59, %v912_v62  ;;  %v915_v2 = vld [vmem:[#allocation6 + $0x710] sm:$0xff]  ;;  %v2632_v58 = vld [vmem:[#allocation7 + $0xa8] sm:$0xff]  ;;  %v7421_v62 = vcombine.low %v2620_v50, %v2624_v51 }
 0x2bf   :  { %2562 = vmatprep.subr.bf16.mxu0 %v7322_v3  ;;  %v919_v3 = vld [vmem:[#allocation6 + $0x730] sm:$0xff] }
 0x2c0   :  { %v7383_v14 = vcombine.low %v915_v2, %v919_v3 }
 0x2c1   :  { %2481 = vmatpush1.bf16.msra.mxu1 %v7319_v8  ;;  %v7384_v8 = vcombine.high %v915_v2, %v919_v3  ;;  %v2636_v2 = vld [vmem:[#allocation7 + $0xc8] sm:$0xff] }
 0x2c2   :  { %2563 = vmatpush1.bf16.msra.mxu0 %v7321_v9  ;;  %2482 = vmatprep.subr.bf16.mxu1 %v7328_v10  ;;  %v7386_v9 = vcombine.high %v916_v5, %v920_v6  ;;  %v923_v10 = vld [vmem:[#allocation6 + $0x750] sm:$0xff]  ;;  %v2640_v3 = vld [vmem:[#allocation7 + $0xe8] sm:$0xff]  ;;  %v7429_v6 = vcombine.low %v2628_v57, %v2632_v58 }
 0x2c3   :  { %2564 = vmatprep.subr.bf16.mxu0 %v7330_v11  ;;  %v927_v11 = vld [vmem:[#allocation6 + $0x770] sm:$0xff] }
 0x2c4   :  { %v7391_v25 = vcombine.low %v923_v10, %v927_v11 }
 0x2c5   :  { %2483 = vmatpush1.bf16.msra.mxu1 %v7327_v43  ;;  %v7392_v43 = vcombine.high %v923_v10, %v927_v11  ;;  %v2648_v10 = vld [vmem:[#allocation7 + $0x128] sm:$0xff] }
 0x2c6   :  { %2565 = vmatpush1.bf16.msra.mxu0 %v7329_v19  ;;  %2484 = vmatprep.subr.bf16.mxu1 %v7336_v20  ;;  %v7394_v19 = vcombine.high %v924_v12, %v928_v13  ;;  %v931_v20 = vld [vmem:[#allocation6 + $0x790] sm:$0xff]  ;;  %v7437_v12 = vcombine.low %v2636_v2, %v2640_v3 }
 0x2c7   :  { %2566 = vmatprep.subr.bf16.mxu0 %v7338_v22  ;;  %v935_v22 = vld [vmem:[#allocation6 + $0x7b0] sm:$0xff] }
 0x2c8   :  { %v7399_v33 = vcombine.low %v931_v20, %v935_v22 }
 0x2c9   :  { %2485 = vmatpush1.bf16.msra.mxu1 %v7335_v27  ;;  %v7400_v27 = vcombine.high %v931_v20, %v935_v22  ;;  %v2656_v20 = vld [vmem:[#allocation7 + $0x168] sm:$0xff] }
 0x2ca   :  { %2567 = vmatpush1.bf16.msra.mxu0 %v7337_v28  ;;  %2486 = vmatprep.subr.bf16.mxu1 %v7344_v29  ;;  %v7402_v28 = vcombine.high %v932_v23, %v936_v24  ;;  %v939_v29 = vld [vmem:[#allocation6 + $0x7d0] sm:$0xff] }
 0x2cb   :  { %2568 = vmatprep.subr.bf16.mxu0 %v7346_v30  ;;  %v943_v30 = vld [vmem:[#allocation6 + $0x7f0] sm:$0xff] }
 0x2cc   :  { %v7407_v44 = vcombine.low %v939_v29, %v943_v30 }
 0x2cd   :  { %2487 = vmatpush1.bf16.msra.mxu1 %v7343_v35  ;;  %v7408_v35 = vcombine.high %v939_v29, %v943_v30  ;;  %v2664_v29 = vld [vmem:[#allocation7 + $0x1a8] sm:$0xff] }
 0x2ce   :  { %2569 = vmatpush1.bf16.msra.mxu0 %v7345_v36  ;;  %2488 = vmatprep.subr.bf16.mxu1 %v7352_v39  ;;  %v7410_v36 = vcombine.high %v940_v31, %v944_v32  ;;  %v2611_v39 = vld [vmem:[#allocation7] sm:$0xff] }
 0x2cf   :  { %2570 = vmatprep.subr.bf16.mxu0 %v7354_v40  ;;  %v2615_v40 = vld [vmem:[#allocation7 + $0x20] sm:$0xff] }
 0x2d0   :  { %v7411_v52 = vcombine.low %v2611_v39, %v2615_v40 }
 0x2d1   :  { %2489 = vmatpush1.bf16.msra.mxu1 %v7351_v60  ;;  %v7412_v60 = vcombine.high %v2611_v39, %v2615_v40  ;;  %v2672_v39 = vld [vmem:[#allocation7 + $0x1e8] sm:$0xff] }
 0x2d2   :  { %2571 = vmatpush1.bf16.msra.mxu0 %v7353_v47  ;;  %2490 = vmatprep.subr.bf16.mxu1 %v7360_v48  ;;  %v7414_v47 = vcombine.high %v2612_v41, %v2616_v42  ;;  %v2619_v48 = vld [vmem:[#allocation7 + $0x40] sm:$0xff] }
 0x2d3   :  { %2572 = vmatprep.subr.bf16.mxu0 %v7362_v49  ;;  %v2623_v49 = vld [vmem:[#allocation7 + $0x60] sm:$0xff] }
 0x2d4   :  { %v7419_v59 = vcombine.low %v2619_v48, %v2623_v49 }
 0x2d5   :  { %2491 = vmatpush1.bf16.msra.mxu1 %v7359_v54  ;;  %v7420_v54 = vcombine.high %v2619_v48, %v2623_v49  ;;  %v2680_v48 = vld [vmem:[#allocation7 + $0x228] sm:$0xff] }
 0x2d6   :  { %2573 = vmatpush1.bf16.msra.mxu0 %v7361_v55  ;;  %2492 = vmatprep.subr.bf16.mxu1 %v7368_v56  ;;  %v7422_v55 = vcombine.high %v2620_v50, %v2624_v51  ;;  %v2627_v56 = vld [vmem:[#allocation7 + $0x80] sm:$0xff] }
 0x2d7   :  { %2574 = vmatprep.subr.bf16.mxu0 %v7370_v61  ;;  %v2631_v61 = vld [vmem:[#allocation7 + $0xa0] sm:$0xff] }
 0x2d8   :  { %v7427_v5 = vcombine.low %v2627_v56, %v2631_v61 }
 0x2d9   :  { %2493 = vmatpush1.bf16.msra.mxu1 %v7367_v63  ;;  %v7428_v63 = vcombine.high %v2627_v56, %v2631_v61  ;;  %v2688_v56 = vld [vmem:[#allocation7 + $0x268] sm:$0xff] }
 0x2da   :  { %2575 = vmatpush1.bf16.msra.mxu0 %v7369_v0  ;;  %2494 = vmatprep.subr.bf16.mxu1 %v7376_v4  ;;  %v7430_v0 = vcombine.high %v2628_v57, %v2632_v58  ;;  %v2635_v4 = vld [vmem:[#allocation7 + $0xc0] sm:$0xff] }
 0x2db   :  { %2576 = vmatprep.subr.bf16.mxu0 %v7378_v1  ;;  %v2639_v1 = vld [vmem:[#allocation7 + $0xe0] sm:$0xff] }
 0x2dc   :  { %v7435_v11 = vcombine.low %v2635_v4, %v2639_v1 }
 0x2dd   :  { %2495 = vmatpush1.bf16.msra.mxu1 %v7375_v37  ;;  %v7436_v37 = vcombine.high %v2635_v4, %v2639_v1  ;;  %v2696_v4 = vld [vmem:[#allocation7 + $0x2a8] sm:$0xff] }
 0x2de   :  { %2577 = vmatpush1.bf16.msra.mxu0 %v7377_v7  ;;  %2496 = vmatprep.subr.bf16.mxu1 %v7384_v8  ;;  %v2643_v7 = vld [vmem:[#allocation7 + $0x100] sm:$0xff] }
 0x2df   :  { %2578 = vmatprep.subr.bf16.mxu0 %v7386_v9  ;;  %v2647_v8 = vld [vmem:[#allocation7 + $0x120] sm:$0xff]  ;;  %v2644_v9 = vld [vmem:[#allocation7 + $0x108] sm:$0xff] }
 0x2e0   :  { %v7444_v13 = vcombine.high %v2643_v7, %v2647_v8  ;;  %v7443_v22 = vcombine.low %v2643_v7, %v2647_v8  ;;  %v7445_v23 = vcombine.low %v2644_v9, %v2648_v10  ;;  %v2704_v7 = vld [vmem:[#allocation7 + $0x2e8] sm:$0xff] }
 0x2e1   :  { %2497 = vmatpush1.bf16.msra.mxu1 %v7383_v14  ;;  %v7446_v14 = vcombine.high %v2644_v9, %v2648_v10 }
 0x2e2   :  { %2579 = vmatpush1.bf16.msra.mxu0 %v7385_v17  ;;  %2498 = vmatprep.subr.bf16.mxu1 %v7392_v43  ;;  %v2651_v17 = vld [vmem:[#allocation7 + $0x140] sm:$0xff] }
 0x2e3   :  { %2580 = vmatprep.subr.bf16.mxu0 %v7394_v19  ;;  %v2655_v43 = vld [vmem:[#allocation7 + $0x160] sm:$0xff]  ;;  %v2652_v19 = vld [vmem:[#allocation7 + $0x148] sm:$0xff] }
 0x2e4   :  { %v7452_v24 = vcombine.high %v2651_v17, %v2655_v43  ;;  %v7451_v30 = vcombine.low %v2651_v17, %v2655_v43  ;;  %v7453_v31 = vcombine.low %v2652_v19, %v2656_v20  ;;  %v2712_v17 = vld [vmem:[#allocation7 + $0x328] sm:$0xff] }
 0x2e5   :  { %2499 = vmatpush1.bf16.msra.mxu1 %v7391_v25  ;;  %v7454_v25 = vcombine.high %v2652_v19, %v2656_v20 }
 0x2e6   :  { %2581 = vmatpush1.bf16.msra.mxu0 %v7393_v26  ;;  %2500 = vmatprep.subr.bf16.mxu1 %v7400_v27  ;;  %v2659_v26 = vld [vmem:[#allocation7 + $0x180] sm:$0xff] }
 0x2e7   :  { %2582 = vmatprep.subr.bf16.mxu0 %v7402_v28  ;;  %v2663_v27 = vld [vmem:[#allocation7 + $0x1a0] sm:$0xff]  ;;  %v2660_v28 = vld [vmem:[#allocation7 + $0x188] sm:$0xff] }
 0x2e8   :  { %v7460_v32 = vcombine.high %v2659_v26, %v2663_v27  ;;  %v7459_v40 = vcombine.low %v2659_v26, %v2663_v27  ;;  %v7461_v41 = vcombine.low %v2660_v28, %v2664_v29  ;;  %v2720_v26 = vld [vmem:[#allocation7 + $0x368] sm:$0xff] }
 0x2e9   :  { %2501 = vmatpush1.bf16.msra.mxu1 %v7399_v33  ;;  %v7462_v33 = vcombine.high %v2660_v28, %v2664_v29 }
 0x2ea   :  { %2583 = vmatpush1.bf16.msra.mxu0 %v7401_v34  ;;  %2502 = vmatprep.subr.bf16.mxu1 %v7408_v35  ;;  %v2667_v34 = vld [vmem:[#allocation7 + $0x1c0] sm:$0xff] }
 0x2eb   :  { %2584 = vmatprep.subr.bf16.mxu0 %v7410_v36  ;;  %v2671_v35 = vld [vmem:[#allocation7 + $0x1e0] sm:$0xff]  ;;  %v2668_v36 = vld [vmem:[#allocation7 + $0x1c8] sm:$0xff] }
 0x2ec   :  { %v7468_v42 = vcombine.high %v2667_v34, %v2671_v35  ;;  %v7467_v49 = vcombine.low %v2667_v34, %v2671_v35  ;;  %v7469_v50 = vcombine.low %v2668_v36, %v2672_v39  ;;  %v2728_v34 = vld [vmem:[#allocation7 + $0x3a8] sm:$0xff] }
 0x2ed   :  { %2503 = vmatpush1.bf16.msra.mxu1 %v7407_v44  ;;  %v7470_v44 = vcombine.high %v2668_v36, %v2672_v39 }
 0x2ee   :  { %2585 = vmatpush1.bf16.msra.mxu0 %v7409_v45  ;;  %5725 = vmatprep.subr.bf16.mxu1 %v7412_v60  ;;  %v2675_v45 = vld [vmem:[#allocation7 + $0x200] sm:$0xff] }
 0x2ef   :  { %5889 = vmatprep.subr.bf16.mxu0 %v7414_v47  ;;  %v2679_v60 = vld [vmem:[#allocation7 + $0x220] sm:$0xff]  ;;  %v2676_v47 = vld [vmem:[#allocation7 + $0x208] sm:$0xff] }
 0x2f0   :  { %2505 = vmatmul.mubr.bf16.vlgmr.msra.gmra.mrb[8].mxu1 %v8655_v21  ;;  %v7476_v51 = vcombine.high %v2675_v45, %v2679_v60  ;;  %v7475_v61 = vcombine.low %v2675_v45, %v2679_v60  ;;  %v7477_v57 = vcombine.low %v2676_v47, %v2680_v48  ;;  %v2736_v45 = vld [vmem:[#allocation7 + $0x3e8] sm:$0xff] }
 0x2f1   :  { %2587 = vmatmul.mubr.bf16.vlgmr.msra.gmra.mrb[12].mxu0 %v8655_v21  ;;  %5726 = vmatpush1.bf16.msra.mxu1 %v7411_v52  ;;  %v7438_v21 = vcombine.high %v2636_v2, %v2640_v3  ;;  %v7478_v52 = vcombine.high %v2676_v47, %v2680_v48 }
 0x2f2   :  { %5890 = vmatpush1.bf16.msra.mxu0 %v7413_v53  ;;  %5727 = vmatprep.subr.bf16.mxu1 %v7420_v54  ;;  %v2683_v53 = vld [vmem:[#allocation7 + $0x240] sm:$0xff] }
 0x2f3   :  { %5891 = vmatprep.subr.bf16.mxu0 %v7422_v55  ;;  %v2687_v54 = vld [vmem:[#allocation7 + $0x260] sm:$0xff]  ;;  %v2684_v55 = vld [vmem:[#allocation7 + $0x248] sm:$0xff] }
 0x2f4   :  { %v7484_v58 = vcombine.high %v2683_v53, %v2687_v54  ;;  %v7483_v1 = vcombine.low %v2683_v53, %v2687_v54  ;;  %v7485_v2 = vcombine.low %v2684_v55, %v2688_v56  ;;  %v2744_v53 = vld [vmem:[#allocation7 + $0x428] sm:$0xff] }
 0x2f5   :  { %5728 = vmatpush1.bf16.msra.mxu1 %v7419_v59  ;;  %v7486_v59 = vcombine.high %v2684_v55, %v2688_v56 }
 0x2f6   :  { %5892 = vmatpush1.bf16.msra.mxu0 %v7421_v62  ;;  %5729 = vmatprep.subr.bf16.mxu1 %v7428_v63  ;;  %v2691_v62 = vld [vmem:[#allocation7 + $0x280] sm:$0xff] }
 0x2f7   :  { %5893 = vmatprep.subr.bf16.mxu0 %v7430_v0  ;;  %v2695_v63 = vld [vmem:[#allocation7 + $0x2a0] sm:$0xff]  ;;  %v2692_v0 = vld [vmem:[#allocation7 + $0x288] sm:$0xff] }
 0x2f8   :  { %v7492_v3 = vcombine.high %v2691_v62, %v2695_v63  ;;  %v7491_v8 = vcombine.low %v2691_v62, %v2695_v63  ;;  %v7493_v9 = vcombine.low %v2692_v0, %v2696_v4 }
 0x2f9   :  { %5730 = vmatpush1.bf16.msra.mxu1 %v7427_v5  ;;  %v7494_v5 = vcombine.high %v2692_v0, %v2696_v4 }
 0x2fa   :  { %5894 = vmatpush1.bf16.msra.mxu0 %v7429_v6  ;;  %5731 = vmatprep.subr.bf16.mxu1 %v7436_v37  ;;  %v2699_v6 = vld [vmem:[#allocation7 + $0x2c0] sm:$0xff] }
 0x2fb   :  { %5895 = vmatprep.subr.bf16.mxu0 %v7438_v21  ;;  %v2703_v37 = vld [vmem:[#allocation7 + $0x2e0] sm:$0xff]  ;;  %v2700_v21 = vld [vmem:[#allocation7 + $0x2c8] sm:$0xff] }
 0x2fc   :  { %v7500_v10 = vcombine.high %v2699_v6, %v2703_v37  ;;  %v7499_v43 = vcombine.low %v2699_v6, %v2703_v37  ;;  %v7501_v19 = vcombine.low %v2700_v21, %v2704_v7 }
 0x2fd   :  { %5732 = vmatpush1.bf16.msra.mxu1 %v7435_v11  ;;  %v7502_v11 = vcombine.high %v2700_v21, %v2704_v7 }
 0x2fe   :  { %5896 = vmatpush1.bf16.msra.mxu0 %v7437_v12  ;;  %5733 = vmatprep.subr.bf16.mxu1 %v7444_v13  ;;  %v2707_v12 = vld [vmem:[#allocation7 + $0x300] sm:$0xff] }
 0x2ff   :  { %5897 = vmatprep.subr.bf16.mxu0 %v7446_v14  ;;  %v2711_v13 = vld [vmem:[#allocation7 + $0x320] sm:$0xff]  ;;  %v2708_v14 = vld [vmem:[#allocation7 + $0x308] sm:$0xff] }
 0x300   :  { %v7508_v20 = vcombine.high %v2707_v12, %v2711_v13  ;;  %v7507_v27 = vcombine.low %v2707_v12, %v2711_v13  ;;  %v7509_v28 = vcombine.low %v2708_v14, %v2712_v17  ;;  %v2751_v12 = vld [vmem:[#allocation7 + $0x460] sm:$0xff]  ;;  %v2748_v13 = vld [vmem:[#allocation7 + $0x448] sm:$0xff] }
 0x301   :  { %5734 = vmatpush1.bf16.msra.mxu1 %v7443_v22  ;;  %v7510_v22 = vcombine.high %v2708_v14, %v2712_v17  ;;  %v2752_v14 = vld [vmem:[#allocation7 + $0x468] sm:$0xff] }
 0x302   :  { %5898 = vmatpush1.bf16.msra.mxu0 %v7445_v23  ;;  %5735 = vmatprep.subr.bf16.mxu1 %v7452_v24  ;;  %v2715_v23 = vld [vmem:[#allocation7 + $0x340] sm:$0xff] }
 0x303   :  { %5899 = vmatprep.subr.bf16.mxu0 %v7454_v25  ;;  %v2719_v24 = vld [vmem:[#allocation7 + $0x360] sm:$0xff]  ;;  %v2716_v25 = vld [vmem:[#allocation7 + $0x348] sm:$0xff] }
 0x304   :  { %v7516_v29 = vcombine.high %v2715_v23, %v2719_v24  ;;  %v7515_v35 = vcombine.low %v2715_v23, %v2719_v24  ;;  %v7517_v36 = vcombine.low %v2716_v25, %v2720_v26  ;;  %v7550_v24 = vcombine.high %v2748_v13, %v2752_v14 }
 0x305   :  { %5736 = vmatpush1.bf16.msra.mxu1 %v7451_v30  ;;  %v7518_v30 = vcombine.high %v2716_v25, %v2720_v26  ;;  %v2759_v25 = vld [vmem:[#allocation7 + $0x4a0] sm:$0xff]  ;;  %v2756_v26 = vld [vmem:[#allocation7 + $0x488] sm:$0xff] }
 0x306   :  { %5900 = vmatpush1.bf16.msra.mxu0 %v7453_v31  ;;  %5737 = vmatprep.subr.bf16.mxu1 %v7460_v32  ;;  %v2723_v31 = vld [vmem:[#allocation7 + $0x380] sm:$0xff] }
 0x307   :  { %5901 = vmatprep.subr.bf16.mxu0 %v7462_v33  ;;  %v2727_v32 = vld [vmem:[#allocation7 + $0x3a0] sm:$0xff]  ;;  %v2724_v33 = vld [vmem:[#allocation7 + $0x388] sm:$0xff] }
 0x308   :  { %v7524_v39 = vcombine.high %v2723_v31, %v2727_v32  ;;  %v7523_v60 = vcombine.low %v2723_v31, %v2727_v32  ;;  %v7525_v47 = vcombine.low %v2724_v33, %v2728_v34 }
 0x309   :  { %5738 = vmatpush1.bf16.msra.mxu1 %v7459_v40  ;;  %v7526_v40 = vcombine.high %v2724_v33, %v2728_v34  ;;  %v2763_v33 = vld [vmem:[#allocation7 + $0x4c0] sm:$0xff] }
 0x30a   :  { %5902 = vmatpush1.bf16.msra.mxu0 %v7461_v41  ;;  %5739 = vmatprep.subr.bf16.mxu1 %v7468_v42  ;;  %v2731_v41 = vld [vmem:[#allocation7 + $0x3c0] sm:$0xff] }
 0x30b   :  { %5903 = vmatprep.subr.bf16.mxu0 %v7470_v44  ;;  %v2735_v42 = vld [vmem:[#allocation7 + $0x3e0] sm:$0xff]  ;;  %v2732_v44 = vld [vmem:[#allocation7 + $0x3c8] sm:$0xff] }
 0x30c   :  { %v7532_v48 = vcombine.high %v2731_v41, %v2735_v42  ;;  %v7531_v54 = vcombine.low %v2731_v41, %v2735_v42  ;;  %v7533_v55 = vcombine.low %v2732_v44, %v2736_v45  ;;  %v2767_v34 = vld [vmem:[#allocation7 + $0x4e0] sm:$0xff] }
 0x30d   :  { %5740 = vmatpush1.bf16.msra.mxu1 %v7467_v49  ;;  %v7534_v49 = vcombine.high %v2732_v44, %v2736_v45  ;;  %v7564_v41 = vcombine.high %v2763_v33, %v2767_v34  ;;  %v2771_v44 = vld [vmem:[#allocation7 + $0x500] sm:$0xff] }
 0x30e   :  { %5904 = vmatpush1.bf16.msra.mxu0 %v7469_v50  ;;  %5741 = vmatprep.subr.bf16.mxu1 %v7476_v51  ;;  %v2739_v50 = vld [vmem:[#allocation7 + $0x400] sm:$0xff] }
 0x30f   :  { %5905 = vmatprep.subr.bf16.mxu0 %v7478_v52  ;;  %v2743_v51 = vld [vmem:[#allocation7 + $0x420] sm:$0xff]  ;;  %v2740_v52 = vld [vmem:[#allocation7 + $0x408] sm:$0xff] }
 0x310   :  { %v7540_v56 = vcombine.high %v2739_v50, %v2743_v51  ;;  %v2775_v45 = vld [vmem:[#allocation7 + $0x520] sm:$0xff] }
 0x311   :  { %5742 = vmatpush1.bf16.msra.mxu1 %v7475_v61  ;;  %v7542_v61 = vcombine.high %v2740_v52, %v2744_v53 }
 0x312   :  { %5906 = vmatpush1.bf16.msra.mxu0 %v7477_v57  ;;  %5743 = vmatprep.subr.bf16.mxu1 %v7484_v58  ;;  %v8667_v57 = vld [vmem:[#allocation10 + $0x6] sm:$0xff] }
 0x313   :  { %5907 = vmatprep.subr.bf16.mxu0 %v7486_v59  ;;  %v950_v58 = vrot.slane %v8667_v57, %v8617_v16  ;;  %v954_v59 = vrot.slane %v8667_v57, %v8620_v18  ;;  %v962_v62 = vrot.slane %v8667_v57, %v8627_v38 }
 0x315   :  { %5744 = vmatpush1.bf16.msra.mxu1 %v7483_v1 }
 0x316   :  { %5908 = vmatpush1.bf16.msra.mxu0 %v7485_v2  ;;  %5745 = vmatprep.subr.bf16.mxu1 %v7492_v3 }
 0x317   :  { %5909 = vmatprep.subr.bf16.mxu0 %v7494_v5 }
 0x319   :  { %5746 = vmatpush1.bf16.msra.mxu1 %v7491_v8 }
 0x31a   :  { %5910 = vmatpush1.bf16.msra.mxu0 %v7493_v9  ;;  %5747 = vmatprep.subr.bf16.mxu1 %v7500_v10  ;;  %v2747_v10 = vld [vmem:[#allocation7 + $0x440] sm:$0xff] }
 0x31b   :  { %5911 = vmatprep.subr.bf16.mxu0 %v7502_v11  ;;  %v7548_v23 = vcombine.high %v2747_v10, %v2751_v12 }
 0x31d   :  { %5748 = vmatpush1.bf16.msra.mxu1 %v7499_v43  ;;  %v7539_v43 = vcombine.low %v2739_v50, %v2743_v51  ;;  %v7572_v50 = vcombine.high %v2771_v44, %v2775_v45 }
 0x31e   :  { %5912 = vmatpush1.bf16.msra.mxu0 %v7501_v19  ;;  %5749 = vmatprep.subr.bf16.mxu1 %v7508_v20  ;;  %v7541_v19 = vcombine.low %v2740_v52, %v2744_v53  ;;  %v2779_v52 = vld [vmem:[#allocation7 + $0x540] sm:$0xff] }
 0x31f   :  { %5913 = vmatprep.subr.bf16.mxu0 %v7510_v22  ;;  %v2755_v22 = vld [vmem:[#allocation7 + $0x480] sm:$0xff] }
 0x320   :  { %v7556_v31 = vcombine.high %v2755_v22, %v2759_v25  ;;  %v2783_v53 = vld [vmem:[#allocation7 + $0x560] sm:$0xff] }
 0x321   :  { %5750 = vmatpush1.bf16.msra.mxu1 %v7507_v27  ;;  %v2760_v27 = vld [vmem:[#allocation7 + $0x4a8] sm:$0xff] }
 0x322   :  { %5914 = vmatpush1.bf16.msra.mxu0 %v7509_v28  ;;  %5751 = vmatprep.subr.bf16.mxu1 %v7516_v29  ;;  %v7547_v29 = vcombine.low %v2747_v10, %v2751_v12  ;;  %v7558_v32 = vcombine.high %v2756_v26, %v2760_v27 }
 0x323   :  { %5915 = vmatprep.subr.bf16.mxu0 %v7518_v30  ;;  %v7549_v30 = vcombine.low %v2748_v13, %v2752_v14  ;;  %v2803_v13 = vld [vmem:[#allocation7 + $0x600] sm:$0xff] }
 0x324   :  { %v2807_v14 = vld [vmem:[#allocation7 + $0x620] sm:$0xff] }
 0x325   :  { %5752 = vmatpush1.bf16.msra.mxu1 %v7515_v35  ;;  %v2764_v35 = vld [vmem:[#allocation7 + $0x4c8] sm:$0xff] }
 0x326   :  { %5916 = vmatpush1.bf16.msra.mxu0 %v7517_v36  ;;  %5753 = vmatprep.subr.bf16.mxu1 %v7524_v39  ;;  %v2768_v36 = vld [vmem:[#allocation7 + $0x4e8] sm:$0xff]  ;;  %v7555_v39 = vcombine.low %v2755_v22, %v2759_v25 }
 0x327   :  { %5917 = vmatprep.subr.bf16.mxu0 %v7526_v40  ;;  %v7557_v40 = vcombine.low %v2756_v26, %v2760_v27  ;;  %v7566_v42 = vcombine.high %v2764_v35, %v2768_v36  ;;  %v2811_v26 = vld [vmem:[#allocation7 + $0x640] sm:$0xff] }
 0x328   :  { %v2815_v27 = vld [vmem:[#allocation7 + $0x660] sm:$0xff] }
 0x329   :  { %5754 = vmatpush1.bf16.msra.mxu1 %v7523_v60  ;;  %v2772_v60 = vld [vmem:[#allocation7 + $0x508] sm:$0xff] }
 0x32a   :  { %5918 = vmatpush1.bf16.msra.mxu0 %v7525_v47  ;;  %5755 = vmatprep.subr.bf16.mxu1 %v7532_v48  ;;  %v2776_v47 = vld [vmem:[#allocation7 + $0x528] sm:$0xff]  ;;  %v7563_v48 = vcombine.low %v2763_v33, %v2767_v34  ;;  %v7612_v33 = vcombine.high %v2811_v26, %v2815_v27 }
 0x32b   :  { %5919 = vmatprep.subr.bf16.mxu0 %v7534_v49  ;;  %v7565_v49 = vcombine.low %v2764_v35, %v2768_v36  ;;  %v7574_v51 = vcombine.high %v2772_v60, %v2776_v47  ;;  %v2819_v35 = vld [vmem:[#allocation7 + $0x680] sm:$0xff] }
 0x32c   :  { %v2823_v36 = vld [vmem:[#allocation7 + $0x6a0] sm:$0xff] }
 0x32d   :  { %5756 = vmatpush1.bf16.msra.mxu1 %v7531_v54  ;;  %v2780_v54 = vld [vmem:[#allocation7 + $0x548] sm:$0xff] }
 0x32e   :  { %5920 = vmatpush1.bf16.msra.mxu0 %v7533_v55  ;;  %5766 = vmatprep.subr.bf16.mxu1 %v7540_v56  ;;  %v2784_v55 = vld [vmem:[#allocation7 + $0x568] sm:$0xff]  ;;  %v7571_v56 = vcombine.low %v2771_v44, %v2775_v45  ;;  %v7620_v44 = vcombine.high %v2819_v35, %v2823_v36 }
 0x32f   :  { %5930 = vmatprep.subr.bf16.mxu0 %v7542_v61  ;;  %v7573_v61 = vcombine.low %v2772_v60, %v2776_v47  ;;  %v2827_v60 = vld [vmem:[#allocation7 + $0x6c0] sm:$0xff] }
 0x330   :  { %v2831_v47 = vld [vmem:[#allocation7 + $0x6e0] sm:$0xff] }
 0x343   :  { %v2342_v63 = vpop.f32.mrb[4].mxu1  ;;  %v8675_v0 = vpop.f32.mrb[8].mxu0 }
 0x344   :  { %v8076_v4 = vadd.f32 %v2342_v63, %v950_v58  ;;  %v2344_v1 = vpop.f32.mrb[5].mxu1  ;;  %v2426_v2 = vpop.f32.mrb[9].mxu0  ;;  %v7580_v58 = vcombine.high %v2779_v52, %v2783_v53  ;;  %v2791_v63 = vld [vmem:[#allocation7 + $0x5a0] sm:$0xff] }
 0x345   :  { %v8077_v3 = vadd.f32 %v2344_v1, %v954_v59  ;;  %v8079_v5 = vadd.f32 %v2426_v2, %v962_v62  ;;  %v2346_v6 = vpop.f32.mrb[6].mxu1  ;;  %v2428_v37 = vpop.f32.mrb[10].mxu0  ;;  %v7582_v59 = vcombine.high %v2780_v54, %v2784_v55  ;;  %v2787_v62 = vld [vmem:[#allocation7 + $0x580] sm:$0xff]  ;;  %v2792_v1 = vld [vmem:[#allocation7 + $0x5a8] sm:$0xff]  ;;  %v7579_v2 = vcombine.low %v2779_v52, %v2783_v53 }
 0x346   :  { %v2595_v21 = vmax.f32 %v8076_v4, 0.0  ;;  %v2347_v7 = vpop.f32.mrb[7].mxu1  ;;  %v2429_v8 = vpop.f32.mrb[11].mxu0  ;;  %v2788_v4 = vld [vmem:[#allocation7 + $0x588] sm:$0xff]  ;;  %v2795_v37 = vld [vmem:[#allocation7 + $0x5c0] sm:$0xff]  ;;  %v7628_v52 = vcombine.high %v2827_v60, %v2831_v47 }
 0x347   :  { %v2596_v9 = vmax.f32 %v8077_v3, 0.0  ;;  %v2598_v11 = vmax.f32 %v8079_v5, 0.0  ;;  %v7581_v3 = vcombine.low %v2780_v54, %v2784_v55  ;;  %v7588_v5 = vcombine.high %v2787_v62, %v2791_v63  ;;  %v2796_v7 = vld [vmem:[#allocation7 + $0x5c8] sm:$0xff]  ;;  %v2835_v54 = vld [vmem:[#allocation7 + $0x700] sm:$0xff] }
 0x348   :  { %v8679_v20 = vpack.c.bf16 %v2595_v21, %v2595_v21  ;;  %v7590_v6 = vcombine.high %v2788_v4, %v2792_v1  ;;  %v2799_v21 = vld [vmem:[#allocation7 + $0x5e0] sm:$0xff]  ;;  %v2800_v8 = vld [vmem:[#allocation7 + $0x5e8] sm:$0xff]  ;;  %v7589_v10 = vcombine.low %v2788_v4, %v2792_v1 }
 0x349   :  { %v8677_v17 = vpack.c.bf16 %v2596_v9, %v2596_v9  ;;  %v8683_v28 = vpack.c.bf16 %v2598_v11, %v2598_v11  ;;  %v7587_v9 = vcombine.low %v2787_v62, %v2791_v63  ;;  %v7596_v11 = vcombine.high %v2795_v37, %v2799_v21  ;;  %v2839_v55 = vld [vmem:[#allocation7 + $0x720] sm:$0xff] }
 0x34a   :  { %v7598_v12 = vcombine.high %v2796_v7, %v2800_v8  ;;  %v7595_v22 = vcombine.low %v2795_v37, %v2799_v21  ;;  %v7636_v62 = vcombine.high %v2835_v54, %v2839_v55  ;;  %v2843_v4 = vld [vmem:[#allocation7 + $0x740] sm:$0xff] }
 0x34b   :  { %5757 = vmatprep.mubr.bf16.mxu1 %v8677_v17  ;;  %5921 = vmatprep.mubr.bf16.mxu0 %v8677_v17  ;;  %v2847_v1 = vld [vmem:[#allocation7 + $0x760] sm:$0xff] }
 0x34c   :  { %5758 = vmatmul.mubr.bf16.vlgmr.msra.gmra.mrb[12].mxu1 %v8679_v20  ;;  %5922 = vmatmul.mubr.bf16.vlgmr.msra.gmra.mrb[16].mxu0 %v8679_v20  ;;  %v7644_v37 = vcombine.high %v2843_v4, %v2847_v1 }
 0x34d   :  { %5767 = vmatpush1.bf16.msra.mxu1 %v7539_v43  ;;  %5931 = vmatpush1.bf16.msra.mxu0 %v7541_v19  ;;  %v2804_v43 = vld [vmem:[#allocation7 + $0x608] sm:$0xff] }
 0x34e   :  { %5798 = vmatprep.mubr.bf16.mxu1 %v8683_v28  ;;  %5962 = vmatprep.mubr.bf16.mxu0 %v8683_v28  ;;  %v2808_v19 = vld [vmem:[#allocation7 + $0x628] sm:$0xff] }
 0x34f   :  { %5768 = vmatprep.subr.bf16.mxu1 %v7548_v23  ;;  %5932 = vmatprep.subr.bf16.mxu0 %v7550_v24  ;;  %v7597_v23 = vcombine.low %v2796_v7, %v2800_v8  ;;  %v7604_v24 = vcombine.high %v2803_v13, %v2807_v14  ;;  %v7606_v25 = vcombine.high %v2804_v43, %v2808_v19  ;;  %v2851_v7 = vld [vmem:[#allocation7 + $0x780] sm:$0xff] }
 0x350   :  { %v2855_v8 = vld [vmem:[#allocation7 + $0x7a0] sm:$0xff] }
 0x351   :  { %5769 = vmatpush1.bf16.msra.mxu1 %v7547_v29  ;;  %5933 = vmatpush1.bf16.msra.mxu0 %v7549_v30  ;;  %v2812_v29 = vld [vmem:[#allocation7 + $0x648] sm:$0xff] }
 0x352   :  { %5770 = vmatprep.subr.bf16.mxu1 %v7556_v31  ;;  %5934 = vmatprep.subr.bf16.mxu0 %v7558_v32  ;;  %v2816_v30 = vld [vmem:[#allocation7 + $0x668] sm:$0xff]  ;;  %v7603_v31 = vcombine.low %v2803_v13, %v2807_v14  ;;  %v7605_v32 = vcombine.low %v2804_v43, %v2808_v19  ;;  %v958_v13 = vrot.slane %v8667_v57, %v8650_v46  ;;  %v2859_v19 = vld [vmem:[#allocation7 + $0x7c0] sm:$0xff] }
 0x353   :  { %v7614_v34 = vcombine.high %v2812_v29, %v2816_v30  ;;  %v7652_v14 = vcombine.high %v2851_v7, %v2855_v8 }
 0x355   :  { %5771 = vmatpush1.bf16.msra.mxu1 %v7555_v39  ;;  %5935 = vmatpush1.bf16.msra.mxu0 %v7557_v40  ;;  %v2820_v39 = vld [vmem:[#allocation7 + $0x688] sm:$0xff] }
 0x356   :  { %5772 = vmatprep.subr.bf16.mxu1 %v7564_v41  ;;  %5936 = vmatprep.subr.bf16.mxu0 %v7566_v42  ;;  %v2824_v40 = vld [vmem:[#allocation7 + $0x6a8] sm:$0xff]  ;;  %v7611_v41 = vcombine.low %v2811_v26, %v2815_v27  ;;  %v7613_v42 = vcombine.low %v2812_v29, %v2816_v30  ;;  %v8078_v27 = vadd.f32 %v8675_v0, %v958_v13  ;;  %v2911_v13 = vld [vmem:[#allocation7 + $0x960] sm:$0xff] }
 0x357   :  { %v7622_v45 = vcombine.high %v2820_v39, %v2824_v40  ;;  %v2876_v0 = vld [vmem:[#allocation7 + $0x848] sm:$0xff] }
 0x359   :  { %5773 = vmatpush1.bf16.msra.mxu1 %v7563_v48  ;;  %5937 = vmatpush1.bf16.msra.mxu0 %v7565_v49  ;;  %v2828_v48 = vld [vmem:[#allocation7 + $0x6c8] sm:$0xff] }
 0x35a   :  { %5774 = vmatprep.subr.bf16.mxu1 %v7572_v50  ;;  %5938 = vmatprep.subr.bf16.mxu0 %v7574_v51  ;;  %v2832_v49 = vld [vmem:[#allocation7 + $0x6e8] sm:$0xff]  ;;  %v7619_v50 = vcombine.low %v2819_v35, %v2823_v36  ;;  %v7621_v51 = vcombine.low %v2820_v39, %v2824_v40  ;;  %v2597_v39 = vmax.f32 %v8078_v27, 0.0 }
 0x35b   :  { %v7630_v53 = vcombine.high %v2828_v48, %v2832_v49  ;;  %v2916_v27 = vld [vmem:[#allocation7 + $0x988] sm:$0xff] }
 0x35d   :  { %5775 = vmatpush1.bf16.msra.mxu1 %v7571_v56  ;;  %5939 = vmatpush1.bf16.msra.mxu0 %v7573_v61  ;;  %v2836_v56 = vld [vmem:[#allocation7 + $0x708] sm:$0xff] }
 0x35e   :  { %5776 = vmatprep.subr.bf16.mxu1 %v7580_v58  ;;  %5940 = vmatprep.subr.bf16.mxu0 %v7582_v59  ;;  %v2840_v61 = vld [vmem:[#allocation7 + $0x728] sm:$0xff]  ;;  %v7627_v58 = vcombine.low %v2827_v60, %v2831_v47  ;;  %v7629_v59 = vcombine.low %v2828_v48, %v2832_v49  ;;  %v8692_v48 = vpack.c.bf16 %v2597_v39, %v2597_v39 }
 0x35f   :  { %v7638_v63 = vcombine.high %v2836_v56, %v2840_v61  ;;  %v2928_v39 = vld [vmem:[#allocation7 + $0x9e8] sm:$0xff] }
 0x361   :  { %5777 = vmatpush1.bf16.msra.mxu1 %v7579_v2  ;;  %5941 = vmatpush1.bf16.msra.mxu0 %v7581_v3  ;;  %v2844_v2 = vld [vmem:[#allocation7 + $0x748] sm:$0xff] }
 0x362   :  { %5778 = vmatprep.subr.bf16.mxu1 %v7588_v5  ;;  %5942 = vmatprep.subr.bf16.mxu0 %v7590_v6  ;;  %v2848_v3 = vld [vmem:[#allocation7 + $0x768] sm:$0xff]  ;;  %v7635_v5 = vcombine.low %v2835_v54, %v2839_v55  ;;  %v7637_v6 = vcombine.low %v2836_v56, %v2840_v61 }
 0x363   :  { %v7646_v21 = vcombine.high %v2844_v2, %v2848_v3  ;;  %v2888_v54 = vld [vmem:[#allocation7 + $0x8a8] sm:$0xff] }
 0x365   :  { %5779 = vmatpush1.bf16.msra.mxu1 %v7587_v9  ;;  %5943 = vmatpush1.bf16.msra.mxu0 %v7589_v10  ;;  %v2852_v9 = vld [vmem:[#allocation7 + $0x788] sm:$0xff] }
 0x366   :  { %5780 = vmatprep.subr.bf16.mxu1 %v7596_v11  ;;  %5944 = vmatprep.subr.bf16.mxu0 %v7598_v12  ;;  %v2856_v10 = vld [vmem:[#allocation7 + $0x7a8] sm:$0xff]  ;;  %v7643_v11 = vcombine.low %v2843_v4, %v2847_v1  ;;  %v7645_v12 = vcombine.low %v2844_v2, %v2848_v3 }
 0x367   :  { %v7654_v43 = vcombine.high %v2852_v9, %v2856_v10  ;;  %v7653_v26 = vcombine.low %v2852_v9, %v2856_v10  ;;  %v2896_v4 = vld [vmem:[#allocation7 + $0x8e8] sm:$0xff] }
 0x369   :  { %5781 = vmatpush1.bf16.msra.mxu1 %v7595_v22  ;;  %5945 = vmatpush1.bf16.msra.mxu0 %v7597_v23  ;;  %v2863_v22 = vld [vmem:[#allocation7 + $0x7e0] sm:$0xff]  ;;  %v2860_v23 = vld [vmem:[#allocation7 + $0x7c8] sm:$0xff] }
 0x36a   :  { %5782 = vmatprep.subr.bf16.mxu1 %v7604_v24  ;;  %5946 = vmatprep.subr.bf16.mxu0 %v7606_v25  ;;  %v2864_v24 = vld [vmem:[#allocation7 + $0x7e8] sm:$0xff]  ;;  %v7651_v25 = vcombine.low %v2851_v7, %v2855_v8  ;;  %v7660_v29 = vcombine.high %v2859_v19, %v2863_v22  ;;  %v7659_v35 = vcombine.low %v2859_v19, %v2863_v22 }
 0x36b   :  { %v7662_v30 = vcombine.high %v2860_v23, %v2864_v24  ;;  %v7661_v36 = vcombine.low %v2860_v23, %v2864_v24  ;;  %v2904_v7 = vld [vmem:[#allocation7 + $0x928] sm:$0xff] }
 0x36d   :  { %5783 = vmatpush1.bf16.msra.mxu1 %v7603_v31  ;;  %5947 = vmatpush1.bf16.msra.mxu0 %v7605_v32  ;;  %v2867_v31 = vld [vmem:[#allocation7 + $0x800] sm:$0xff] }
 0x36e   :  { %5784 = vmatprep.subr.bf16.mxu1 %v7612_v33  ;;  %5948 = vmatprep.subr.bf16.mxu0 %v7614_v34  ;;  %v2871_v32 = vld [vmem:[#allocation7 + $0x820] sm:$0xff]  ;;  %v2868_v33 = vld [vmem:[#allocation7 + $0x808] sm:$0xff] }
 0x36f   :  { %v2872_v34 = vld [vmem:[#allocation7 + $0x828] sm:$0xff]  ;;  %v7668_v40 = vcombine.high %v2867_v31, %v2871_v32  ;;  %v7667_v60 = vcombine.low %v2867_v31, %v2871_v32 }
 0x370   :  { %v7669_v47 = vcombine.low %v2868_v33, %v2872_v34 }
 0x371   :  { %5785 = vmatpush1.bf16.msra.mxu1 %v7611_v41  ;;  %5949 = vmatpush1.bf16.msra.mxu0 %v7613_v42  ;;  %v7670_v41 = vcombine.high %v2868_v33, %v2872_v34  ;;  %v2875_v42 = vld [vmem:[#allocation7 + $0x840] sm:$0xff] }
 0x372   :  { %5786 = vmatprep.subr.bf16.mxu1 %v7620_v44  ;;  %5950 = vmatprep.subr.bf16.mxu0 %v7622_v45  ;;  %v2879_v44 = vld [vmem:[#allocation7 + $0x860] sm:$0xff]  ;;  %v2880_v45 = vld [vmem:[#allocation7 + $0x868] sm:$0xff] }
 0x373   :  { %v7676_v49 = vcombine.high %v2875_v42, %v2879_v44  ;;  %v7675_v55 = vcombine.low %v2875_v42, %v2879_v44  ;;  %v7677_v56 = vcombine.low %v2876_v0, %v2880_v45  ;;  %v2923_v34 = vld [vmem:[#allocation7 + $0x9c0] sm:$0xff] }
 0x375   :  { %5787 = vmatpush1.bf16.msra.mxu1 %v7619_v50  ;;  %5951 = vmatpush1.bf16.msra.mxu0 %v7621_v51  ;;  %v7678_v50 = vcombine.high %v2876_v0, %v2880_v45  ;;  %v2883_v51 = vld [vmem:[#allocation7 + $0x880] sm:$0xff] }
 0x376   :  { %5788 = vmatprep.subr.bf16.mxu1 %v7628_v52  ;;  %5952 = vmatprep.subr.bf16.mxu0 %v7630_v53  ;;  %v2887_v52 = vld [vmem:[#allocation7 + $0x8a0] sm:$0xff]  ;;  %v2884_v53 = vld [vmem:[#allocation7 + $0x888] sm:$0xff] }
 0x377   :  { %v7684_v61 = vcombine.high %v2883_v51, %v2887_v52  ;;  %v7683_v1 = vcombine.low %v2883_v51, %v2887_v52  ;;  %v7685_v2 = vcombine.low %v2884_v53, %v2888_v54  ;;  %v2931_v0 = vld [vmem:[#allocation7 + $0xa00] sm:$0xff] }
 0x378   :  { %v2935_v45 = vld [vmem:[#allocation7 + $0xa20] sm:$0xff] }
 0x379   :  { %5789 = vmatpush1.bf16.msra.mxu1 %v7627_v58  ;;  %5953 = vmatpush1.bf16.msra.mxu0 %v7629_v59  ;;  %v7686_v58 = vcombine.high %v2884_v53, %v2888_v54  ;;  %v2891_v59 = vld [vmem:[#allocation7 + $0x8c0] sm:$0xff]  ;;  %v7732_v51 = vcombine.high %v2931_v0, %v2935_v45 }
 0x37a   :  { %5790 = vmatprep.subr.bf16.mxu1 %v7636_v62  ;;  %5954 = vmatprep.subr.bf16.mxu0 %v7638_v63  ;;  %v2895_v62 = vld [vmem:[#allocation7 + $0x8e0] sm:$0xff]  ;;  %v2892_v63 = vld [vmem:[#allocation7 + $0x8c8] sm:$0xff] }
 0x37b   :  { %v7692_v3 = vcombine.high %v2891_v59, %v2895_v62  ;;  %v7691_v8 = vcombine.low %v2891_v59, %v2895_v62  ;;  %v7693_v9 = vcombine.low %v2892_v63, %v2896_v4  ;;  %v2939_v53 = vld [vmem:[#allocation7 + $0xa40] sm:$0xff] }
 0x37c   :  { %v2943_v54 = vld [vmem:[#allocation7 + $0xa60] sm:$0xff] }
 0x37d   :  { %5791 = vmatpush1.bf16.msra.mxu1 %v7635_v5  ;;  %5955 = vmatpush1.bf16.msra.mxu0 %v7637_v6  ;;  %v7694_v5 = vcombine.high %v2892_v63, %v2896_v4  ;;  %v2899_v6 = vld [vmem:[#allocation7 + $0x900] sm:$0xff]  ;;  %v7740_v59 = vcombine.high %v2939_v53, %v2943_v54 }
 0x37e   :  { %5792 = vmatprep.subr.bf16.mxu1 %v7644_v37  ;;  %5956 = vmatprep.subr.bf16.mxu0 %v7646_v21  ;;  %v2903_v37 = vld [vmem:[#allocation7 + $0x920] sm:$0xff]  ;;  %v2900_v21 = vld [vmem:[#allocation7 + $0x908] sm:$0xff] }
 0x37f   :  { %v7700_v10 = vcombine.high %v2899_v6, %v2903_v37  ;;  %v7699_v19 = vcombine.low %v2899_v6, %v2903_v37  ;;  %v7701_v22 = vcombine.low %v2900_v21, %v2904_v7  ;;  %v2947_v63 = vld [vmem:[#allocation7 + $0xa80] sm:$0xff] }
 0x380   :  { %v2951_v4 = vld [vmem:[#allocation7 + $0xaa0] sm:$0xff] }
 0x381   :  { %5793 = vmatpush1.bf16.msra.mxu1 %v7643_v11  ;;  %5957 = vmatpush1.bf16.msra.mxu0 %v7645_v12  ;;  %v7702_v11 = vcombine.high %v2900_v21, %v2904_v7  ;;  %v2907_v12 = vld [vmem:[#allocation7 + $0x940] sm:$0xff]  ;;  %v7748_v6 = vcombine.high %v2947_v63, %v2951_v4 }
 0x382   :  { %5794 = vmatprep.subr.bf16.mxu1 %v7652_v14  ;;  %5958 = vmatprep.subr.bf16.mxu0 %v7654_v43  ;;  %v2908_v14 = vld [vmem:[#allocation7 + $0x948] sm:$0xff]  ;;  %v7708_v23 = vcombine.high %v2907_v12, %v2911_v13  ;;  %v2955_v21 = vld [vmem:[#allocation7 + $0xac0] sm:$0xff] }
 0x383   :  { %v2912_v43 = vld [vmem:[#allocation7 + $0x968] sm:$0xff]  ;;  %v2959_v7 = vld [vmem:[#allocation7 + $0xae0] sm:$0xff] }
 0x384   :  { %v7710_v24 = vcombine.high %v2908_v14, %v2912_v43  ;;  %v7709_v31 = vcombine.low %v2908_v14, %v2912_v43  ;;  %v2963_v14 = vld [vmem:[#allocation7 + $0xb00] sm:$0xff] }
 0x385   :  { %5795 = vmatpush1.bf16.msra.mxu1 %v7651_v25  ;;  %5959 = vmatpush1.bf16.msra.mxu0 %v7653_v26  ;;  %v2915_v25 = vld [vmem:[#allocation7 + $0x980] sm:$0xff] }
 0x386   :  { %5796 = vmatprep.subr.bf16.mxu1 %v7660_v29  ;;  %5960 = vmatprep.subr.bf16.mxu0 %v7662_v30  ;;  %v2919_v26 = vld [vmem:[#allocation7 + $0x9a0] sm:$0xff]  ;;  %v2920_v29 = vld [vmem:[#allocation7 + $0x9a8] sm:$0xff]  ;;  %v7707_v30 = vcombine.low %v2907_v12, %v2911_v13  ;;  %v7756_v12 = vcombine.high %v2955_v21, %v2959_v7 }
 0x387   :  { %v7716_v32 = vcombine.high %v2915_v25, %v2919_v26  ;;  %v7718_v33 = vcombine.high %v2916_v27, %v2920_v29  ;;  %v2967_v43 = vld [vmem:[#allocation7 + $0xb20] sm:$0xff] }
 0x389   :  { %5797 = vmatpush1.bf16.msra.mxu1 %v7659_v35  ;;  %5961 = vmatpush1.bf16.msra.mxu0 %v7661_v36  ;;  %v2927_v35 = vld [vmem:[#allocation7 + $0x9e0] sm:$0xff]  ;;  %v2924_v36 = vld [vmem:[#allocation7 + $0x9c8] sm:$0xff] }
 0x38a   :  { %5807 = vmatprep.subr.bf16.mxu1 %v7668_v40  ;;  %5971 = vmatprep.subr.bf16.mxu0 %v7670_v41  ;;  %v7715_v40 = vcombine.low %v2915_v25, %v2919_v26  ;;  %v7717_v41 = vcombine.low %v2916_v27, %v2920_v29  ;;  %v7724_v42 = vcombine.high %v2923_v34, %v2927_v35  ;;  %v2971_v27 = vld [vmem:[#allocation7 + $0xb40] sm:$0xff] }
 0x38b   :  { %v7726_v44 = vcombine.high %v2924_v36, %v2928_v39  ;;  %v7764_v25 = vcombine.high %v2963_v14, %v2967_v43  ;;  %v2975_v29 = vld [vmem:[#allocation7 + $0xb60] sm:$0xff] }
 0x38c   :  { %5799 = vmatmul.mubr.bf16.vlgmr.msra.gmra.mrb[12].mxu1 %v8692_v48  ;;  %5963 = vmatmul.mubr.bf16.vlgmr.msra.gmra.mrb[16].mxu0 %v8692_v48 }
 0x38d   :  { %5808 = vmatpush1.bf16.msra.mxu1 %v7667_v60  ;;  %5972 = vmatpush1.bf16.msra.mxu0 %v7669_v47  ;;  %v2932_v60 = vld [vmem:[#allocation7 + $0xa08] sm:$0xff] }
 0x38e   :  { %5809 = vmatprep.subr.bf16.mxu1 %v7676_v49  ;;  %5973 = vmatprep.subr.bf16.mxu0 %v7678_v50  ;;  %v2936_v47 = vld [vmem:[#allocation7 + $0xa28] sm:$0xff]  ;;  %v7723_v49 = vcombine.low %v2923_v34, %v2927_v35  ;;  %v7725_v50 = vcombine.low %v2924_v36, %v2928_v39  ;;  %v7772_v34 = vcombine.high %v2971_v27, %v2975_v29  ;;  %v2979_v36 = vld [vmem:[#allocation7 + $0xb80] sm:$0xff] }
 0x38f   :  { %v7734_v52 = vcombine.high %v2932_v60, %v2936_v47  ;;  %v2983_v39 = vld [vmem:[#allocation7 + $0xba0] sm:$0xff] }
 0x391   :  { %5810 = vmatpush1.bf16.msra.mxu1 %v7675_v55  ;;  %5974 = vmatpush1.bf16.msra.mxu0 %v7677_v56  ;;  %v2940_v55 = vld [vmem:[#allocation7 + $0xa48] sm:$0xff] }
 0x392   :  { %5811 = vmatprep.subr.bf16.mxu1 %v7684_v61  ;;  %5975 = vmatprep.subr.bf16.mxu0 %v7686_v58  ;;  %v2944_v56 = vld [vmem:[#allocation7 + $0xa68] sm:$0xff]  ;;  %v7731_v61 = vcombine.low %v2931_v0, %v2935_v45  ;;  %v7733_v58 = vcombine.low %v2932_v60, %v2936_v47  ;;  %v969_v45 = vsub.s32 5, %v8614_v15  ;;  %v7780_v60 = vcombine.high %v2979_v36, %v2983_v39 }
 0x393   :  { %v7742_v62 = vcombine.high %v2940_v55, %v2944_v56 }
 0x395   :  { %5812 = vmatpush1.bf16.msra.mxu1 %v7683_v1  ;;  %5976 = vmatpush1.bf16.msra.mxu0 %v7685_v2  ;;  %v2948_v1 = vld [vmem:[#allocation7 + $0xa88] sm:$0xff] }
 0x396   :  { %5813 = vmatprep.subr.bf16.mxu1 %v7692_v3  ;;  %5977 = vmatprep.subr.bf16.mxu0 %v7694_v5  ;;  %v2952_v2 = vld [vmem:[#allocation7 + $0xaa8] sm:$0xff]  ;;  %v7739_v3 = vcombine.low %v2939_v53, %v2943_v54  ;;  %v7741_v5 = vcombine.low %v2940_v55, %v2944_v56  ;;  %v7779_v55 = vcombine.low %v2979_v36, %v2983_v39  ;;  %v3015_v36 = vld [vmem:[#allocation7 + $0xca0] sm:$0xff] }
 0x397   :  { %v7750_v37 = vcombine.high %v2948_v1, %v2952_v2  ;;  %v2992_v53 = vld [vmem:[#allocation7 + $0xbe8] sm:$0xff] }
 0x398   :  { %v3012_v39 = vld [vmem:[#allocation7 + $0xc88] sm:$0xff] }
 0x399   :  { %5814 = vmatpush1.bf16.msra.mxu1 %v7691_v8  ;;  %5978 = vmatpush1.bf16.msra.mxu0 %v7693_v9  ;;  %v2956_v8 = vld [vmem:[#allocation7 + $0xac8] sm:$0xff] }
 0x39a   :  { %5815 = vmatprep.subr.bf16.mxu1 %v7700_v10  ;;  %5979 = vmatprep.subr.bf16.mxu0 %v7702_v11  ;;  %v2960_v9 = vld [vmem:[#allocation7 + $0xae8] sm:$0xff]  ;;  %v7747_v10 = vcombine.low %v2947_v63, %v2951_v4  ;;  %v7749_v11 = vcombine.low %v2948_v1, %v2952_v2  ;;  %v2995_v63 = vld [vmem:[#allocation7 + $0xc00] sm:$0xff] }
 0x39b   :  { %v7758_v13 = vcombine.high %v2956_v8, %v2960_v9  ;;  %v2999_v1 = vld [vmem:[#allocation7 + $0xc20] sm:$0xff]  ;;  %v2996_v2 = vld [vmem:[#allocation7 + $0xc08] sm:$0xff] }
 0x39d   :  { %5816 = vmatpush1.bf16.msra.mxu1 %v7699_v19  ;;  %5980 = vmatpush1.bf16.msra.mxu0 %v7701_v22  ;;  %v2964_v19 = vld [vmem:[#allocation7 + $0xb08] sm:$0xff] }
 0x39e   :  { %5817 = vmatprep.subr.bf16.mxu1 %v7708_v23  ;;  %5981 = vmatprep.subr.bf16.mxu0 %v7710_v24  ;;  %v2968_v22 = vld [vmem:[#allocation7 + $0xb28] sm:$0xff]  ;;  %v7755_v23 = vcombine.low %v2955_v21, %v2959_v7  ;;  %v7757_v24 = vcombine.low %v2956_v8, %v2960_v9 }
 0x39f   :  { %v7766_v26 = vcombine.high %v2964_v19, %v2968_v22 }
 0x3a1   :  { %5818 = vmatpush1.bf16.msra.mxu1 %v7707_v30  ;;  %5982 = vmatpush1.bf16.msra.mxu0 %v7709_v31  ;;  %v2972_v30 = vld [vmem:[#allocation7 + $0xb48] sm:$0xff] }
 0x3a2   :  { %5819 = vmatprep.subr.bf16.mxu1 %v7716_v32  ;;  %5983 = vmatprep.subr.bf16.mxu0 %v7718_v33  ;;  %v2976_v31 = vld [vmem:[#allocation7 + $0xb68] sm:$0xff]  ;;  %v7763_v32 = vcombine.low %v2963_v14, %v2967_v43  ;;  %v7765_v33 = vcombine.low %v2964_v19, %v2968_v22  ;;  %v7796_v14 = vcombine.high %v2995_v63, %v2999_v1 }
 0x3a3   :  { %v7774_v35 = vcombine.high %v2972_v30, %v2976_v31  ;;  %v7773_v0 = vcombine.low %v2972_v30, %v2976_v31  ;;  %v7795_v30 = vcombine.low %v2995_v63, %v2999_v1  ;;  %v3032_v63 = vld [vmem:[#allocation7 + $0xd28] sm:$0xff] }
 0x3a5   :  { %5820 = vmatpush1.bf16.msra.mxu1 %v7715_v40  ;;  %5984 = vmatpush1.bf16.msra.mxu0 %v7717_v41  ;;  %v2980_v40 = vld [vmem:[#allocation7 + $0xb88] sm:$0xff] }
 0x3a6   :  { %5821 = vmatprep.subr.bf16.mxu1 %v7724_v42  ;;  %5985 = vmatprep.subr.bf16.mxu0 %v7726_v44  ;;  %v2984_v41 = vld [vmem:[#allocation7 + $0xba8] sm:$0xff]  ;;  %v965_v42 = vsub.s32 4, %v8614_v15  ;;  %v7771_v44 = vcombine.low %v2971_v27, %v2975_v29 }
 0x3a7   :  { %v7782_v47 = vcombine.high %v2980_v40, %v2984_v41  ;;  %v7781_v56 = vcombine.low %v2980_v40, %v2984_v41  ;;  %v3008_v27 = vld [vmem:[#allocation7 + $0xc68] sm:$0xff] }
 0x3a8   :  { %v966_v54 = vrot.slane %v8667_v57, %v965_v42  ;;  %v3016_v40 = vld [vmem:[#allocation7 + $0xca8] sm:$0xff] }
 0x3a9   :  { %5822 = vmatpush1.bf16.msra.mxu1 %v7723_v49  ;;  %5986 = vmatpush1.bf16.msra.mxu0 %v7725_v50  ;;  %v977_v49 = vsub.s32 7, %v8614_v15  ;;  %v2987_v50 = vld [vmem:[#allocation7 + $0xbc0] sm:$0xff] }
 0x3aa   :  { %5823 = vmatprep.subr.bf16.mxu1 %v7732_v51  ;;  %5987 = vmatprep.subr.bf16.mxu0 %v7734_v52  ;;  %v2991_v51 = vld [vmem:[#allocation7 + $0xbe0] sm:$0xff]  ;;  %v2988_v52 = vld [vmem:[#allocation7 + $0xbc8] sm:$0xff] }
 0x3ab   :  { %v7787_v9 = vcombine.low %v2987_v50, %v2991_v51 }
 0x3ad   :  { %5824 = vmatpush1.bf16.msra.mxu1 %v7731_v61  ;;  %5988 = vmatpush1.bf16.msra.mxu0 %v7733_v58  ;;  %v970_v61 = vrot.slane %v8667_v57, %v969_v45  ;;  %v978_v58 = vrot.slane %v8667_v57, %v977_v49 }
 0x3ae   :  { %5825 = vmatprep.subr.bf16.mxu1 %v7740_v59  ;;  %5989 = vmatprep.subr.bf16.mxu0 %v7742_v62  ;;  %v7788_v59 = vcombine.high %v2987_v50, %v2991_v51  ;;  %v7790_v62 = vcombine.high %v2988_v52, %v2992_v53  ;;  %v3019_v50 = vld [vmem:[#allocation7 + $0xcc0] sm:$0xff] }
 0x3af   :  { %v3023_v51 = vld [vmem:[#allocation7 + $0xce0] sm:$0xff] }
 0x3b1   :  { %5826 = vmatpush1.bf16.msra.mxu1 %v7739_v3  ;;  %5990 = vmatpush1.bf16.msra.mxu0 %v7741_v5  ;;  %v3000_v3 = vld [vmem:[#allocation7 + $0xc28] sm:$0xff] }
 0x3b2   :  { %5827 = vmatprep.subr.bf16.mxu1 %v7748_v6  ;;  %5991 = vmatprep.subr.bf16.mxu0 %v7750_v37  ;;  %v7798_v43 = vcombine.high %v2996_v2, %v3000_v3  ;;  %v7797_v31 = vcombine.low %v2996_v2, %v3000_v3 }
 0x3b5   :  { %5828 = vmatpush1.bf16.msra.mxu1 %v7747_v10  ;;  %5992 = vmatpush1.bf16.msra.mxu0 %v7749_v11  ;;  %v7789_v10 = vcombine.low %v2988_v52, %v2992_v53  ;;  %v3020_v52 = vld [vmem:[#allocation7 + $0xcc8] sm:$0xff] }
 0x3b6   :  { %5829 = vmatprep.subr.bf16.mxu1 %v7756_v12  ;;  %5993 = vmatprep.subr.bf16.mxu0 %v7758_v13  ;;  %v3024_v53 = vld [vmem:[#allocation7 + $0xce8] sm:$0xff] }
 0x3b7   :  { %v7821_v1 = vcombine.low %v3020_v52, %v3024_v53 }
 0x3b9   :  { %5830 = vmatpush1.bf16.msra.mxu1 %v7755_v23  ;;  %5994 = vmatpush1.bf16.msra.mxu0 %v7757_v24  ;;  %v3003_v23 = vld [vmem:[#allocation7 + $0xc40] sm:$0xff] }
 0x3ba   :  { %5831 = vmatprep.subr.bf16.mxu1 %v7764_v25  ;;  %5995 = vmatprep.subr.bf16.mxu0 %v7766_v26  ;;  %v3007_v25 = vld [vmem:[#allocation7 + $0xc60] sm:$0xff]  ;;  %v3004_v26 = vld [vmem:[#allocation7 + $0xc48] sm:$0xff] }
 0x3bd   :  { %5832 = vmatpush1.bf16.msra.mxu1 %v7763_v32  ;;  %5996 = vmatpush1.bf16.msra.mxu0 %v7765_v33  ;;  %v3011_v33 = vld [vmem:[#allocation7 + $0xc80] sm:$0xff] }
 0x3be   :  { %5833 = vmatprep.subr.bf16.mxu1 %v7772_v34  ;;  %5997 = vmatprep.subr.bf16.mxu0 %v7774_v35  ;;  %v7804_v34 = vcombine.high %v3003_v23, %v3007_v25  ;;  %v7806_v35 = vcombine.high %v3004_v26, %v3008_v27 }
 0x3c1   :  { %5834 = vmatpush1.bf16.msra.mxu1 %v7771_v44  ;;  %5998 = vmatpush1.bf16.msra.mxu0 %v7773_v0  ;;  %v7803_v44 = vcombine.low %v3003_v23, %v3007_v25  ;;  %v7805_v0 = vcombine.low %v3004_v26, %v3008_v27  ;;  %v3055_v25 = vld [vmem:[#allocation7 + $0xde0] sm:$0xff]  ;;  %v3052_v26 = vld [vmem:[#allocation7 + $0xdc8] sm:$0xff] }
 0x3c2   :  { %5835 = vmatprep.subr.bf16.mxu1 %v7780_v60  ;;  %5999 = vmatprep.subr.bf16.mxu0 %v7782_v47  ;;  %v7812_v60 = vcombine.high %v3011_v33, %v3015_v36  ;;  %v7814_v47 = vcombine.high %v3012_v39, %v3016_v40  ;;  %v3056_v27 = vld [vmem:[#allocation7 + $0xde8] sm:$0xff] }
 0x3c3   :  { %v2506_v4 = vpop.f32.mrb[8].mxu1 }
 0x3c4   :  { %v8080_v5 = vadd.f32 %v2506_v4, %v966_v54  ;;  %v8708_v6 = vpop.f32.mrb[12].mxu0  ;;  %v2508_v37 = vpop.f32.mrb[9].mxu1  ;;  %v7811_v54 = vcombine.low %v3011_v33, %v3015_v36  ;;  %v7819_v4 = vcombine.low %v3019_v50, %v3023_v51  ;;  %v3063_v36 = vld [vmem:[#allocation7 + $0xe20] sm:$0xff] }
 0x3c5   :  { %v8081_v21 = vadd.f32 %v2508_v37, %v970_v61  ;;  %v2590_v7 = vpop.f32.mrb[13].mxu0  ;;  %5836 = vmatpush1.bf16.msra.mxu1 %v7779_v55  ;;  %6000 = vmatpush1.bf16.msra.mxu0 %v7781_v56  ;;  %v2510_v8 = vpop.f32.mrb[10].mxu1  ;;  %v7813_v55 = vcombine.low %v3012_v39, %v3016_v40  ;;  %v7820_v56 = vcombine.high %v3019_v50, %v3023_v51  ;;  %v3039_v37 = vld [vmem:[#allocation7 + $0xd60] sm:$0xff]  ;;  %v3060_v39 = vld [vmem:[#allocation7 + $0xe08] sm:$0xff] }
 0x3c6   :  { %v2599_v11 = vmax.f32 %v8080_v5, 0.0  ;;  %v8083_v57 = vadd.f32 %v2590_v7, %v978_v58  ;;  %v2592_v12 = vpop.f32.mrb[14].mxu0  ;;  %v2511_v13 = vpop.f32.mrb[11].mxu1  ;;  %5837 = vmatprep.subr.bf16.mxu1 %v7788_v59  ;;  %6001 = vmatprep.subr.bf16.mxu0 %v7790_v62  ;;  %v7822_v61 = vcombine.high %v3020_v52, %v3024_v53  ;;  %v3027_v58 = vld [vmem:[#allocation7 + $0xd00] sm:$0xff]  ;;  %v3028_v62 = vld [vmem:[#allocation7 + $0xd08] sm:$0xff] }
 0x3c7   :  { %v2600_v19 = vmax.f32 %v8081_v21, 0.0  ;;  %v2593_v22 = vpop.f32.mrb[15].mxu0  ;;  %v3031_v59 = vld [vmem:[#allocation7 + $0xd20] sm:$0xff]  ;;  %v7830_v3 = vcombine.high %v3028_v62, %v3032_v63  ;;  %v3036_v21 = vld [vmem:[#allocation7 + $0xd48] sm:$0xff] }
 0x3c8   :  { %v2602_v24 = vmax.f32 %v8083_v57, 0.0  ;;  %v8712_v32 = vpack.c.bf16 %v2599_v11, %v2599_v11  ;;  %v7828_v2 = vcombine.high %v3027_v58, %v3031_v59  ;;  %v3035_v5 = vld [vmem:[#allocation7 + $0xd40] sm:$0xff]  ;;  %v3040_v7 = vld [vmem:[#allocation7 + $0xd68] sm:$0xff]  ;;  %v7827_v8 = vcombine.low %v3027_v58, %v3031_v59 }
 0x3c9   :  { %v8710_v29 = vpack.c.bf16 %v2600_v19, %v2600_v19  ;;  %5838 = vmatpush1.bf16.msra.mxu1 %v7787_v9  ;;  %6002 = vmatpush1.bf16.msra.mxu0 %v7789_v10  ;;  %v7829_v9 = vcombine.low %v3028_v62, %v3032_v63  ;;  %v7836_v10 = vcombine.high %v3035_v5, %v3039_v37  ;;  %v3043_v57 = vld [vmem:[#allocation7 + $0xd80] sm:$0xff]  ;;  %v3044_v13 = vld [vmem:[#allocation7 + $0xd88] sm:$0xff] }
 0x3ca   :  { %5848 = vmatprep.subr.bf16.mxu1 %v7796_v14  ;;  %6012 = vmatprep.subr.bf16.mxu0 %v7798_v43  ;;  %v8716_v41 = vpack.c.bf16 %v2602_v24, %v2602_v24  ;;  %v7838_v11 = vcombine.high %v3036_v21, %v3040_v7  ;;  %v3047_v12 = vld [vmem:[#allocation7 + $0xda0] sm:$0xff]  ;;  %v3048_v14 = vld [vmem:[#allocation7 + $0xda8] sm:$0xff]  ;;  %v7835_v43 = vcombine.low %v3035_v5, %v3039_v37 }
 0x3cb   :  { %5839 = vmatprep.mubr.bf16.mxu1 %v8710_v29  ;;  %6003 = vmatprep.mubr.bf16.mxu0 %v8710_v29  ;;  %v7837_v19 = vcombine.low %v3036_v21, %v3040_v7  ;;  %v7844_v22 = vcombine.high %v3043_v57, %v3047_v12  ;;  %v7846_v23 = vcombine.high %v3044_v13, %v3048_v14  ;;  %v3051_v24 = vld [vmem:[#allocation7 + $0xdc0] sm:$0xff]  ;;  %v3064_v40 = vld [vmem:[#allocation7 + $0xe28] sm:$0xff] }
 0x3cc   :  { %5840 = vmatmul.mubr.bf16.vlgmr.msra.gmra.mrb[12].mxu1 %v8712_v32  ;;  %6004 = vmatmul.mubr.bf16.vlgmr.msra.gmra.mrb[16].mxu0 %v8712_v32  ;;  %v7852_v33 = vcombine.high %v3051_v24, %v3055_v25  ;;  %v3067_v50 = vld [vmem:[#allocation7 + $0xe40] sm:$0xff]  ;;  %v3068_v52 = vld [vmem:[#allocation7 + $0xe48] sm:$0xff] }
 0x3cd   :  { %5849 = vmatpush1.bf16.msra.mxu1 %v7795_v30  ;;  %6013 = vmatpush1.bf16.msra.mxu0 %v7797_v31  ;;  %v7843_v30 = vcombine.low %v3043_v57, %v3047_v12  ;;  %v7845_v31 = vcombine.low %v3044_v13, %v3048_v14  ;;  %v3071_v51 = vld [vmem:[#allocation7 + $0xe60] sm:$0xff]  ;;  %v3072_v53 = vld [vmem:[#allocation7 + $0xe68] sm:$0xff] }
 0x3ce   :  { %5880 = vmatprep.mubr.bf16.mxu1 %v8716_v41  ;;  %6044 = vmatprep.mubr.bf16.mxu0 %v8716_v41  ;;  %v3075_v58 = vld [vmem:[#allocation7 + $0xe80] sm:$0xff]  ;;  %v3076_v62 = vld [vmem:[#allocation7 + $0xe88] sm:$0xff] }
 0x3cf   :  { %5850 = vmatprep.subr.bf16.mxu1 %v7804_v34  ;;  %6014 = vmatprep.subr.bf16.mxu0 %v7806_v35  ;;  %v7854_v34 = vcombine.high %v3052_v26, %v3056_v27  ;;  %v3059_v35 = vld [vmem:[#allocation7 + $0xe00] sm:$0xff]  ;;  %v3080_v63 = vld [vmem:[#allocation7 + $0xea8] sm:$0xff] }
 0x3d0   :  { %v3079_v59 = vld [vmem:[#allocation7 + $0xea0] sm:$0xff]  ;;  %v3084_v21 = vld [vmem:[#allocation7 + $0xec8] sm:$0xff] }
 0x3d1   :  { %5851 = vmatpush1.bf16.msra.mxu1 %v7803_v44  ;;  %6015 = vmatpush1.bf16.msra.mxu0 %v7805_v0  ;;  %v7851_v44 = vcombine.low %v3051_v24, %v3055_v25  ;;  %v7853_v0 = vcombine.low %v3052_v26, %v3056_v27  ;;  %v3083_v5 = vld [vmem:[#allocation7 + $0xec0] sm:$0xff]  ;;  %v3088_v7 = vld [vmem:[#allocation7 + $0xee8] sm:$0xff] }
 0x3d2   :  { %5852 = vmatprep.subr.bf16.mxu1 %v7812_v60  ;;  %6016 = vmatprep.subr.bf16.mxu0 %v7814_v47  ;;  %v7860_v60 = vcombine.high %v3059_v35, %v3063_v36  ;;  %v7862_v47 = vcombine.high %v3060_v39, %v3064_v40  ;;  %v3087_v37 = vld [vmem:[#allocation7 + $0xee0] sm:$0xff]  ;;  %v3092_v13 = vld [vmem:[#allocation7 + $0xf08] sm:$0xff] }
 0x3d3   :  { %v3091_v57 = vld [vmem:[#allocation7 + $0xf00] sm:$0xff]  ;;  %v3096_v14 = vld [vmem:[#allocation7 + $0xf28] sm:$0xff] }
 0x3d4   :  { %v3095_v12 = vld [vmem:[#allocation7 + $0xf20] sm:$0xff]  ;;  %v3100_v26 = vld [vmem:[#allocation7 + $0xf48] sm:$0xff] }
 0x3d5   :  { %5853 = vmatpush1.bf16.msra.mxu1 %v7811_v54  ;;  %6017 = vmatpush1.bf16.msra.mxu0 %v7813_v55  ;;  %v7859_v54 = vcombine.low %v3059_v35, %v3063_v36  ;;  %v7861_v55 = vcombine.low %v3060_v39, %v3064_v40  ;;  %v3099_v24 = vld [vmem:[#allocation7 + $0xf40] sm:$0xff]  ;;  %v3104_v27 = vld [vmem:[#allocation7 + $0xf68] sm:$0xff] }
 0x3d6   :  { %5854 = vmatprep.subr.bf16.mxu1 %v7820_v56  ;;  %6018 = vmatprep.subr.bf16.mxu0 %v7822_v61  ;;  %v7868_v56 = vcombine.high %v3067_v50, %v3071_v51  ;;  %v7870_v61 = vcombine.high %v3068_v52, %v3072_v53  ;;  %v3103_v25 = vld [vmem:[#allocation7 + $0xf60] sm:$0xff]  ;;  %v7902_v35 = vcombine.high %v3100_v26, %v3104_v27  ;;  %v3108_v40 = vld [vmem:[#allocation7 + $0xf88] sm:$0xff] }
 0x3d7   :  { %v3107_v36 = vld [vmem:[#allocation7 + $0xf80] sm:$0xff] }
 0x3d8   :  { %v3111_v39 = vld [vmem:[#allocation7 + $0xfa0] sm:$0xff] }
 0x3d9   :  { %5855 = vmatpush1.bf16.msra.mxu1 %v7819_v4  ;;  %6019 = vmatpush1.bf16.msra.mxu0 %v7821_v1  ;;  %v7867_v4 = vcombine.low %v3067_v50, %v3071_v51  ;;  %v7869_v1 = vcombine.low %v3068_v52, %v3072_v53  ;;  %v7908_v51 = vcombine.high %v3107_v36, %v3111_v39  ;;  %v3115_v53 = vld [vmem:[#allocation7 + $0xfc0] sm:$0xff] }
 0x3da   :  { %5856 = vmatprep.subr.bf16.mxu1 %v7828_v2  ;;  %6020 = vmatprep.subr.bf16.mxu0 %v7830_v3  ;;  %v7876_v2 = vcombine.high %v3075_v58, %v3079_v59  ;;  %v7878_v3 = vcombine.high %v3076_v62, %v3080_v63 }
 0x3dd   :  { %5857 = vmatpush1.bf16.msra.mxu1 %v7827_v8  ;;  %6021 = vmatpush1.bf16.msra.mxu0 %v7829_v9  ;;  %v7875_v8 = vcombine.low %v3075_v58, %v3079_v59  ;;  %v7877_v9 = vcombine.low %v3076_v62, %v3080_v63 }
 0x3de   :  { %5858 = vmatprep.subr.bf16.mxu1 %v7836_v10  ;;  %6022 = vmatprep.subr.bf16.mxu0 %v7838_v11  ;;  %v7884_v10 = vcombine.high %v3083_v5, %v3087_v37  ;;  %v7886_v11 = vcombine.high %v3084_v21, %v3088_v7 }
 0x3e1   :  { %5859 = vmatpush1.bf16.msra.mxu1 %v7835_v43  ;;  %6023 = vmatpush1.bf16.msra.mxu0 %v7837_v19  ;;  %v7883_v43 = vcombine.low %v3083_v5, %v3087_v37  ;;  %v7885_v19 = vcombine.low %v3084_v21, %v3088_v7 }
 0x3e2   :  { %5860 = vmatprep.subr.bf16.mxu1 %v7844_v22  ;;  %6024 = vmatprep.subr.bf16.mxu0 %v7846_v23  ;;  %v7892_v22 = vcombine.high %v3091_v57, %v3095_v12  ;;  %v7894_v23 = vcombine.high %v3092_v13, %v3096_v14 }
 0x3e5   :  { %5861 = vmatpush1.bf16.msra.mxu1 %v7843_v30  ;;  %6025 = vmatpush1.bf16.msra.mxu0 %v7845_v31  ;;  %v7891_v30 = vcombine.low %v3091_v57, %v3095_v12  ;;  %v7893_v31 = vcombine.low %v3092_v13, %v3096_v14 }
 0x3e6   :  { %5862 = vmatprep.subr.bf16.mxu1 %v7852_v33  ;;  %6026 = vmatprep.subr.bf16.mxu0 %v7854_v34  ;;  %v973_v33 = vsub.s32 6, %v8614_v15  ;;  %v7900_v34 = vcombine.high %v3099_v24, %v3103_v25 }
 0x3e9   :  { %5863 = vmatpush1.bf16.msra.mxu1 %v7851_v44  ;;  %6027 = vmatpush1.bf16.msra.mxu0 %v7853_v0  ;;  %v3112_v44 = vld [vmem:[#allocation7 + $0xfa8] sm:$0xff]  ;;  %v7899_v0 = vcombine.low %v3099_v24, %v3103_v25  ;;  %v2634_v24 = vld [vmem:[#allocation7 + $0xb8] sm:$0xff] }
 0x3ea   :  { %5864 = vmatprep.subr.bf16.mxu1 %v7860_v60  ;;  %6028 = vmatprep.subr.bf16.mxu0 %v7862_v47  ;;  %v7901_v60 = vcombine.low %v3100_v26, %v3104_v27  ;;  %v8337_v47 = vld [vmem:[#allocation10 + $0x6] sm:$0xff]  ;;  %v7910_v52 = vcombine.high %v3108_v40, %v3112_v44  ;;  %v7909_v58 = vcombine.low %v3108_v40, %v3112_v44 }
 0x3eb   :  { %v974_v50 = vrot.slane %v8337_v47, %v973_v33  ;;  %v2649_v47 = vld [vmem:[#allocation7 + $0x130] sm:$0xff] }
 0x3ed   :  { %5865 = vmatpush1.bf16.msra.mxu1 %v7859_v54  ;;  %6029 = vmatpush1.bf16.msra.mxu0 %v7861_v55  ;;  %v3119_v54 = vld [vmem:[#allocation7 + $0xfe0] sm:$0xff]  ;;  %v3116_v55 = vld [vmem:[#allocation7 + $0xfc8] sm:$0xff]  ;;  %v8082_v59 = vadd.f32 %v8708_v6, %v974_v50  ;;  %v2622_v6 = vld [vmem:[#allocation7 + $0x58] sm:$0xff] }
 0x3ee   :  { %5866 = vmatprep.subr.bf16.mxu1 %v7868_v56  ;;  %6030 = vmatprep.subr.bf16.mxu0 %v7870_v61  ;;  %v3120_v56 = vld [vmem:[#allocation7 + $0xfe8] sm:$0xff]  ;;  %v7907_v61 = vcombine.low %v3107_v36, %v3111_v39  ;;  %v7916_v62 = vcombine.high %v3115_v53, %v3119_v54  ;;  %v7915_v5 = vcombine.low %v3115_v53, %v3119_v54  ;;  %v2642_v36 = vld [vmem:[#allocation7 + $0xf8] sm:$0xff] }
 0x3ef   :  { %v7918_v63 = vcombine.high %v3116_v55, %v3120_v56  ;;  %v7917_v37 = vcombine.low %v3116_v55, %v3120_v56  ;;  %v2601_v21 = vmax.f32 %v8082_v59, 0.0  ;;  %v2650_v50 = vld [vmem:[#allocation7 + $0x138] sm:$0xff]  ;;  %v2653_v55 = vld [vmem:[#allocation7 + $0x150] sm:$0xff] }
 0x3f0   :  { %v2657_v56 = vld [vmem:[#allocation7 + $0x170] sm:$0xff] }
 0x3f1   :  { %5867 = vmatpush1.bf16.msra.mxu1 %v7867_v4  ;;  %6031 = vmatpush1.bf16.msra.mxu0 %v7869_v1  ;;  %v2613_v4 = vld [vmem:[#allocation7 + $0x10] sm:$0xff]  ;;  %v8726_v12 = vpack.c.bf16 %v2601_v21, %v2601_v21 }
 0x3f2   :  { %5868 = vmatprep.subr.bf16.mxu1 %v7876_v2  ;;  %6032 = vmatprep.subr.bf16.mxu0 %v7878_v3  ;;  %v2617_v1 = vld [vmem:[#allocation7 + $0x30] sm:$0xff]  ;;  %v2614_v2 = vld [vmem:[#allocation7 + $0x18] sm:$0xff] }
 0x3f3   :  { %v2618_v3 = vld [vmem:[#allocation7 + $0x38] sm:$0xff]  ;;  %v7416_v7 = vcombine.high %v2613_v4, %v2617_v1  ;;  %v7415_v57 = vcombine.low %v2613_v4, %v2617_v1  ;;  %v2661_v1 = vld [vmem:[#allocation7 + $0x190] sm:$0xff] }
 0x3f4   :  { %v7417_v13 = vcombine.low %v2614_v2, %v2618_v3 }
 0x3f5   :  { %5869 = vmatpush1.bf16.msra.mxu1 %v7875_v8  ;;  %6033 = vmatpush1.bf16.msra.mxu0 %v7877_v9  ;;  %v7418_v8 = vcombine.high %v2614_v2, %v2618_v3  ;;  %v2621_v9 = vld [vmem:[#allocation7 + $0x50] sm:$0xff]  ;;  %v2662_v3 = vld [vmem:[#allocation7 + $0x198] sm:$0xff] }
 0x3f6   :  { %5870 = vmatprep.subr.bf16.mxu1 %v7884_v10  ;;  %6034 = vmatprep.subr.bf16.mxu0 %v7886_v11  ;;  %v2625_v10 = vld [vmem:[#allocation7 + $0x70] sm:$0xff]  ;;  %v2626_v11 = vld [vmem:[#allocation7 + $0x78] sm:$0xff] }
 0x3f7   :  { %v7424_v14 = vcombine.high %v2621_v9, %v2625_v10  ;;  %v7423_v25 = vcombine.low %v2621_v9, %v2625_v10  ;;  %v7425_v26 = vcombine.low %v2622_v6, %v2626_v11  ;;  %v2665_v2 = vld [vmem:[#allocation7 + $0x1b0] sm:$0xff] }
 0x3f8   :  { %v2669_v9 = vld [vmem:[#allocation7 + $0x1d0] sm:$0xff] }
 0x3f9   :  { %5871 = vmatpush1.bf16.msra.mxu1 %v7883_v43  ;;  %6035 = vmatpush1.bf16.msra.mxu0 %v7885_v19  ;;  %v7426_v43 = vcombine.high %v2622_v6, %v2626_v11  ;;  %v2629_v19 = vld [vmem:[#allocation7 + $0x90] sm:$0xff]  ;;  %v2670_v6 = vld [vmem:[#allocation7 + $0x1d8] sm:$0xff] }
 0x3fa   :  { %5872 = vmatprep.subr.bf16.mxu1 %v7892_v22  ;;  %6036 = vmatprep.subr.bf16.mxu0 %v7894_v23  ;;  %v2633_v22 = vld [vmem:[#allocation7 + $0xb0] sm:$0xff]  ;;  %v2630_v23 = vld [vmem:[#allocation7 + $0x98] sm:$0xff] }
 0x3fb   :  { %v7432_v27 = vcombine.high %v2629_v19, %v2633_v22  ;;  %v7431_v39 = vcombine.low %v2629_v19, %v2633_v22  ;;  %v7433_v40 = vcombine.low %v2630_v23, %v2634_v24  ;;  %v2673_v10 = vld [vmem:[#allocation7 + $0x1f0] sm:$0xff]  ;;  %v2674_v11 = vld [vmem:[#allocation7 + $0x1f8] sm:$0xff] }
 0x3fc   :  { %v2677_v19 = vld [vmem:[#allocation7 + $0x210] sm:$0xff] }
 0x3fd   :  { %5873 = vmatpush1.bf16.msra.mxu1 %v7891_v30  ;;  %6037 = vmatpush1.bf16.msra.mxu0 %v7893_v31  ;;  %v7434_v30 = vcombine.high %v2630_v23, %v2634_v24  ;;  %v2637_v31 = vld [vmem:[#allocation7 + $0xd0] sm:$0xff]  ;;  %v2678_v23 = vld [vmem:[#allocation7 + $0x218] sm:$0xff] }
 0x3fe   :  { %5874 = vmatprep.subr.bf16.mxu1 %v7900_v34  ;;  %6038 = vmatprep.subr.bf16.mxu0 %v7902_v35  ;;  %v2641_v34 = vld [vmem:[#allocation7 + $0xf0] sm:$0xff]  ;;  %v2638_v35 = vld [vmem:[#allocation7 + $0xd8] sm:$0xff] }
 0x3ff   :  { %v7440_v44 = vcombine.high %v2637_v31, %v2641_v34  ;;  %v2681_v22 = vld [vmem:[#allocation7 + $0x230] sm:$0xff]  ;;  %v2682_v24 = vld [vmem:[#allocation7 + $0x238] sm:$0xff] }
 0x401   :  { %5875 = vmatpush1.bf16.msra.mxu1 %v7899_v0  ;;  %6039 = vmatpush1.bf16.msra.mxu0 %v7901_v60  ;;  %v7442_v0 = vcombine.high %v2638_v35, %v2642_v36  ;;  %v2645_v60 = vld [vmem:[#allocation7 + $0x110] sm:$0xff] }
 0x402   :  { %5876 = vmatprep.subr.bf16.mxu1 %v7908_v51  ;;  %6040 = vmatprep.subr.bf16.mxu0 %v7910_v52  ;;  %v7439_v51 = vcombine.low %v2637_v31, %v2641_v34  ;;  %v7441_v52 = vcombine.low %v2638_v35, %v2642_v36  ;;  %v7448_v53 = vcombine.high %v2645_v60, %v2649_v47  ;;  %v2685_v31 = vld [vmem:[#allocation7 + $0x250] sm:$0xff]  ;;  %v2686_v35 = vld [vmem:[#allocation7 + $0x258] sm:$0xff] }
 0x403   :  { %v7447_v59 = vcombine.low %v2645_v60, %v2649_v47  ;;  %v2689_v34 = vld [vmem:[#allocation7 + $0x270] sm:$0xff]  ;;  %v2690_v36 = vld [vmem:[#allocation7 + $0x278] sm:$0xff] }
 0x404   :  { %v2693_v60 = vld [vmem:[#allocation7 + $0x290] sm:$0xff] }
 0x405   :  { %5877 = vmatpush1.bf16.msra.mxu1 %v7907_v61  ;;  %6041 = vmatpush1.bf16.msra.mxu0 %v7909_v58  ;;  %v2654_v61 = vld [vmem:[#allocation7 + $0x158] sm:$0xff]  ;;  %v2697_v47 = vld [vmem:[#allocation7 + $0x2b0] sm:$0xff] }
 0x406   :  { %5878 = vmatprep.subr.bf16.mxu1 %v7916_v62  ;;  %6042 = vmatprep.subr.bf16.mxu0 %v7918_v63  ;;  %v2658_v58 = vld [vmem:[#allocation7 + $0x178] sm:$0xff]  ;;  %v7456_v63 = vcombine.high %v2653_v55, %v2657_v56 }
 0x407   :  { %v7458_v4 = vcombine.high %v2654_v61, %v2658_v58  ;;  %v7457_v21 = vcombine.low %v2654_v61, %v2658_v58  ;;  %v2702_v61 = vld [vmem:[#allocation7 + $0x2d8] sm:$0xff] }
 0x408   :  { %v2706_v58 = vld [vmem:[#allocation7 + $0x2f8] sm:$0xff] }
 0x409   :  { %5879 = vmatpush1.bf16.msra.mxu1 %v7915_v5  ;;  %6043 = vmatpush1.bf16.msra.mxu0 %v7917_v37  ;;  %v2666_v5 = vld [vmem:[#allocation7 + $0x1b8] sm:$0xff]  ;;  %v7455_v37 = vcombine.low %v2653_v55, %v2657_v56  ;;  %v2701_v55 = vld [vmem:[#allocation7 + $0x2d0] sm:$0xff] }
 0x40a   :  { %6053 = vmatprep.subr.bf16.mxu1 %v7416_v7  ;;  %6217 = vmatprep.subr.bf16.mxu0 %v7418_v8  ;;  %v7464_v7 = vcombine.high %v2661_v1, %v2665_v2  ;;  %v7466_v8 = vcombine.high %v2662_v3, %v2666_v5  ;;  %v2705_v56 = vld [vmem:[#allocation7 + $0x2f0] sm:$0xff] }
 0x40c   :  { %5881 = vmatmul.mubr.bf16.vlgmr.msra.gmra.mrb[12].mxu1 %v8726_v12  ;;  %6045 = vmatmul.mubr.bf16.vlgmr.msra.gmra.mrb[16].mxu0 %v8726_v12 }
 0x40d   :  { %6054 = vmatpush1.bf16.msra.mxu1 %v7415_v57  ;;  %6085 = vmatprep.mubr.bf16.mxu1 %v8677_v17  ;;  %v7463_v57 = vcombine.low %v2661_v1, %v2665_v2  ;;  %v2709_v1 = vld [vmem:[#allocation7 + $0x310] sm:$0xff] }
 0x40e   :  { %6218 = vmatpush1.bf16.msra.mxu0 %v7417_v13  ;;  %6249 = vmatprep.mubr.bf16.mxu0 %v8677_v17  ;;  %v2646_v17 = vld [vmem:[#allocation7 + $0x118] sm:$0xff]  ;;  %v7465_v13 = vcombine.low %v2662_v3, %v2666_v5  ;;  %v2713_v2 = vld [vmem:[#allocation7 + $0x330] sm:$0xff] }
 0x40f   :  { %6055 = vmatprep.subr.bf16.mxu1 %v7424_v14  ;;  %6219 = vmatprep.subr.bf16.mxu0 %v7426_v43  ;;  %v7450_v54 = vcombine.high %v2646_v17, %v2650_v50  ;;  %v7449_v62 = vcombine.low %v2646_v17, %v2650_v50  ;;  %v7472_v14 = vcombine.high %v2669_v9, %v2673_v10  ;;  %v2694_v17 = vld [vmem:[#allocation7 + $0x298] sm:$0xff] }
 0x410   :  { %v7474_v43 = vcombine.high %v2670_v6, %v2674_v11  ;;  %v2698_v50 = vld [vmem:[#allocation7 + $0x2b8] sm:$0xff] }
 0x411   :  { %6056 = vmatpush1.bf16.msra.mxu1 %v7423_v25  ;;  %v7471_v25 = vcombine.low %v2669_v9, %v2673_v10  ;;  %v2710_v3 = vld [vmem:[#allocation7 + $0x318] sm:$0xff]  ;;  %v2717_v9 = vld [vmem:[#allocation7 + $0x350] sm:$0xff] }
 0x412   :  { %6220 = vmatpush1.bf16.msra.mxu0 %v7425_v26  ;;  %6057 = vmatprep.subr.bf16.mxu1 %v7432_v27  ;;  %v7473_v26 = vcombine.low %v2670_v6, %v2674_v11  ;;  %v7480_v27 = vcombine.high %v2677_v19, %v2681_v22  ;;  %v2714_v5 = vld [vmem:[#allocation7 + $0x338] sm:$0xff]  ;;  %v2721_v10 = vld [vmem:[#allocation7 + $0x370] sm:$0xff] }
 0x413   :  { %6221 = vmatprep.subr.bf16.mxu0 %v7434_v30  ;;  %v7482_v30 = vcombine.high %v2678_v23, %v2682_v24  ;;  %v2718_v6 = vld [vmem:[#allocation7 + $0x358] sm:$0xff] }
 0x414   :  { %v2722_v11 = vld [vmem:[#allocation7 + $0x378] sm:$0xff] }
 0x415   :  { %6058 = vmatpush1.bf16.msra.mxu1 %v7431_v39  ;;  %v7479_v39 = vcombine.low %v2677_v19, %v2681_v22  ;;  %v2725_v19 = vld [vmem:[#allocation7 + $0x390] sm:$0xff] }
 0x416   :  { %6222 = vmatpush1.bf16.msra.mxu0 %v7433_v40  ;;  %6059 = vmatprep.subr.bf16.mxu1 %v7440_v44  ;;  %v7481_v40 = vcombine.low %v2678_v23, %v2682_v24  ;;  %v7488_v44 = vcombine.high %v2685_v31, %v2689_v34  ;;  %v2729_v22 = vld [vmem:[#allocation7 + $0x3b0] sm:$0xff]  ;;  %v2726_v23 = vld [vmem:[#allocation7 + $0x398] sm:$0xff] }
 0x417   :  { %6223 = vmatprep.subr.bf16.mxu0 %v7442_v0  ;;  %v7490_v0 = vcombine.high %v2686_v35, %v2690_v36  ;;  %v2730_v24 = vld [vmem:[#allocation7 + $0x3b8] sm:$0xff] }
 0x419   :  { %6060 = vmatpush1.bf16.msra.mxu1 %v7439_v51  ;;  %v7487_v51 = vcombine.low %v2685_v31, %v2689_v34  ;;  %v2733_v31 = vld [vmem:[#allocation7 + $0x3d0] sm:$0xff] }
 0x41a   :  { %6224 = vmatpush1.bf16.msra.mxu0 %v7441_v52  ;;  %6061 = vmatprep.subr.bf16.mxu1 %v7448_v53  ;;  %v7489_v52 = vcombine.low %v2686_v35, %v2690_v36  ;;  %v7496_v53 = vcombine.high %v2693_v60, %v2697_v47  ;;  %v2737_v34 = vld [vmem:[#allocation7 + $0x3f0] sm:$0xff]  ;;  %v2734_v35 = vld [vmem:[#allocation7 + $0x3d8] sm:$0xff] }
 0x41b   :  { %6225 = vmatprep.subr.bf16.mxu0 %v7450_v54  ;;  %v7498_v54 = vcombine.high %v2694_v17, %v2698_v50  ;;  %v2738_v36 = vld [vmem:[#allocation7 + $0x3f8] sm:$0xff] }
 0x41d   :  { %6062 = vmatpush1.bf16.msra.mxu1 %v7447_v59  ;;  %v7495_v59 = vcombine.low %v2693_v60, %v2697_v47  ;;  %v2741_v60 = vld [vmem:[#allocation7 + $0x410] sm:$0xff] }
 0x41e   :  { %6226 = vmatpush1.bf16.msra.mxu0 %v7449_v62  ;;  %6063 = vmatprep.subr.bf16.mxu1 %v7456_v63  ;;  %v7497_v62 = vcombine.low %v2694_v17, %v2698_v50  ;;  %v7504_v63 = vcombine.high %v2701_v55, %v2705_v56  ;;  %v2745_v47 = vld [vmem:[#allocation7 + $0x430] sm:$0xff]  ;;  %v2742_v17 = vld [vmem:[#allocation7 + $0x418] sm:$0xff] }
 0x41f   :  { %6227 = vmatprep.subr.bf16.mxu0 %v7458_v4  ;;  %v7506_v4 = vcombine.high %v2702_v61, %v2706_v58  ;;  %v2746_v50 = vld [vmem:[#allocation7 + $0x438] sm:$0xff] }
 0x421   :  { %6064 = vmatpush1.bf16.msra.mxu1 %v7455_v37  ;;  %v7503_v37 = vcombine.low %v2701_v55, %v2705_v56  ;;  %v2749_v55 = vld [vmem:[#allocation7 + $0x450] sm:$0xff] }
 0x422   :  { %6228 = vmatpush1.bf16.msra.mxu0 %v7457_v21  ;;  %6065 = vmatprep.subr.bf16.mxu1 %v7464_v7  ;;  %v7505_v21 = vcombine.low %v2702_v61, %v2706_v58  ;;  %v7512_v7 = vcombine.high %v2709_v1, %v2713_v2  ;;  %v2753_v56 = vld [vmem:[#allocation7 + $0x470] sm:$0xff]  ;;  %v7543_v61 = vcombine.low %v2741_v60, %v2745_v47  ;;  %v2750_v58 = vld [vmem:[#allocation7 + $0x458] sm:$0xff] }
 0x423   :  { %6229 = vmatprep.subr.bf16.mxu0 %v7466_v8  ;;  %v7514_v8 = vcombine.high %v2710_v3, %v2714_v5 }
 0x425   :  { %6066 = vmatpush1.bf16.msra.mxu1 %v7463_v57  ;;  %v7511_v57 = vcombine.low %v2709_v1, %v2713_v2  ;;  %v2761_v1 = vld [vmem:[#allocation7 + $0x4b0] sm:$0xff] }
 0x426   :  { %6230 = vmatpush1.bf16.msra.mxu0 %v7465_v13  ;;  %6067 = vmatprep.subr.bf16.mxu1 %v7472_v14  ;;  %v7513_v13 = vcombine.low %v2710_v3, %v2714_v5  ;;  %v7520_v14 = vcombine.high %v2717_v9, %v2721_v10  ;;  %v2758_v3 = vld [vmem:[#allocation7 + $0x498] sm:$0xff] }
 0x427   :  { %6231 = vmatprep.subr.bf16.mxu0 %v7474_v43  ;;  %v7522_v43 = vcombine.high %v2718_v6, %v2722_v11  ;;  %v2762_v5 = vld [vmem:[#allocation7 + $0x4b8] sm:$0xff] }
 0x429   :  { %6068 = vmatpush1.bf16.msra.mxu1 %v7471_v25  ;;  %v7519_v25 = vcombine.low %v2717_v9, %v2721_v10  ;;  %v2765_v9 = vld [vmem:[#allocation7 + $0x4d0] sm:$0xff] }
 0x42a   :  { %6232 = vmatpush1.bf16.msra.mxu0 %v7473_v26  ;;  %6069 = vmatprep.subr.bf16.mxu1 %v7480_v27  ;;  %v7521_v26 = vcombine.low %v2718_v6, %v2722_v11  ;;  %v7528_v27 = vcombine.high %v2725_v19, %v2729_v22  ;;  %v2769_v10 = vld [vmem:[#allocation7 + $0x4f0] sm:$0xff]  ;;  %v2766_v6 = vld [vmem:[#allocation7 + $0x4d8] sm:$0xff] }
 0x42b   :  { %6233 = vmatprep.subr.bf16.mxu0 %v7482_v30  ;;  %v7530_v30 = vcombine.high %v2726_v23, %v2730_v24  ;;  %v2770_v11 = vld [vmem:[#allocation7 + $0x4f8] sm:$0xff] }
 0x42d   :  { %6070 = vmatpush1.bf16.msra.mxu1 %v7479_v39  ;;  %v7527_v39 = vcombine.low %v2725_v19, %v2729_v22  ;;  %v2777_v19 = vld [vmem:[#allocation7 + $0x530] sm:$0xff]  ;;  %v2774_v22 = vld [vmem:[#allocation7 + $0x518] sm:$0xff] }
 0x42e   :  { %6234 = vmatpush1.bf16.msra.mxu0 %v7481_v40  ;;  %6071 = vmatprep.subr.bf16.mxu1 %v7488_v44  ;;  %v7529_v40 = vcombine.low %v2726_v23, %v2730_v24  ;;  %v7536_v44 = vcombine.high %v2733_v31, %v2737_v34  ;;  %v2778_v23 = vld [vmem:[#allocation7 + $0x538] sm:$0xff]  ;;  %v7569_v24 = vcombine.low %v2766_v6, %v2770_v11 }
 0x42f   :  { %6235 = vmatprep.subr.bf16.mxu0 %v7490_v0  ;;  %v7538_v0 = vcombine.high %v2734_v35, %v2738_v36 }
 0x431   :  { %6072 = vmatpush1.bf16.msra.mxu1 %v7487_v51  ;;  %v7535_v51 = vcombine.low %v2733_v31, %v2737_v34  ;;  %v2782_v31 = vld [vmem:[#allocation7 + $0x558] sm:$0xff] }
 0x432   :  { %6236 = vmatpush1.bf16.msra.mxu0 %v7489_v52  ;;  %6073 = vmatprep.subr.bf16.mxu1 %v7496_v53  ;;  %v7537_v52 = vcombine.low %v2734_v35, %v2738_v36  ;;  %v7544_v53 = vcombine.high %v2741_v60, %v2745_v47  ;;  %v2786_v34 = vld [vmem:[#allocation7 + $0x578] sm:$0xff]  ;;  %v7577_v36 = vcombine.low %v2774_v22, %v2778_v23 }
 0x433   :  { %6237 = vmatprep.subr.bf16.mxu0 %v7498_v54  ;;  %v7546_v54 = vcombine.high %v2742_v17, %v2746_v50  ;;  %v2790_v60 = vld [vmem:[#allocation7 + $0x598] sm:$0xff] }
 0x434   :  { %v2794_v47 = vld [vmem:[#allocation7 + $0x5b8] sm:$0xff] }
 0x435   :  { %6074 = vmatpush1.bf16.msra.mxu1 %v7495_v59  ;;  %v2754_v59 = vld [vmem:[#allocation7 + $0x478] sm:$0xff] }
 0x436   :  { %6238 = vmatpush1.bf16.msra.mxu0 %v7497_v62  ;;  %6075 = vmatprep.subr.bf16.mxu1 %v7504_v63  ;;  %v7545_v62 = vcombine.low %v2742_v17, %v2746_v50  ;;  %v7552_v63 = vcombine.high %v2749_v55, %v2753_v56  ;;  %v7554_v2 = vcombine.high %v2750_v58, %v2754_v59 }
 0x437   :  { %6239 = vmatprep.subr.bf16.mxu0 %v7506_v4  ;;  %v2757_v4 = vld [vmem:[#allocation7 + $0x490] sm:$0xff]  ;;  %v7585_v50 = vcombine.low %v2782_v31, %v2786_v34 }
 0x439   :  { %6076 = vmatpush1.bf16.msra.mxu1 %v7503_v37  ;;  %v7551_v37 = vcombine.low %v2749_v55, %v2753_v56  ;;  %v2798_v55 = vld [vmem:[#allocation7 + $0x5d8] sm:$0xff] }
 0x43a   :  { %6240 = vmatpush1.bf16.msra.mxu0 %v7505_v21  ;;  %6077 = vmatprep.subr.bf16.mxu1 %v7512_v7  ;;  %v7553_v21 = vcombine.low %v2750_v58, %v2754_v59  ;;  %v7560_v7 = vcombine.high %v2757_v4, %v2761_v1  ;;  %v2802_v56 = vld [vmem:[#allocation7 + $0x5f8] sm:$0xff]  ;;  %v7593_v58 = vcombine.low %v2790_v60, %v2794_v47 }
 0x43b   :  { %6241 = vmatprep.subr.bf16.mxu0 %v7514_v8  ;;  %v7562_v8 = vcombine.high %v2758_v3, %v2762_v5 }
 0x43d   :  { %6078 = vmatpush1.bf16.msra.mxu1 %v7511_v57  ;;  %v7559_v57 = vcombine.low %v2757_v4, %v2761_v1  ;;  %v2809_v4 = vld [vmem:[#allocation7 + $0x630] sm:$0xff]  ;;  %v2806_v1 = vld [vmem:[#allocation7 + $0x618] sm:$0xff] }
 0x43e   :  { %6242 = vmatpush1.bf16.msra.mxu0 %v7513_v13  ;;  %6079 = vmatprep.subr.bf16.mxu1 %v7520_v14  ;;  %v7568_v13 = vcombine.high %v2765_v9, %v2769_v10  ;;  %v7570_v14 = vcombine.high %v2766_v6, %v2770_v11 }
 0x43f   :  { %6243 = vmatprep.subr.bf16.mxu0 %v7522_v43  ;;  %v2773_v43 = vld [vmem:[#allocation7 + $0x510] sm:$0xff] }
 0x440   :  { %v7575_v35 = vcombine.low %v2773_v43, %v2777_v19 }
 0x441   :  { %6080 = vmatpush1.bf16.msra.mxu1 %v7519_v25  ;;  %v7576_v25 = vcombine.high %v2773_v43, %v2777_v19  ;;  %v2822_v43 = vld [vmem:[#allocation7 + $0x698] sm:$0xff] }
 0x442   :  { %6244 = vmatpush1.bf16.msra.mxu0 %v7521_v26  ;;  %6081 = vmatprep.subr.bf16.mxu1 %v7528_v27  ;;  %v7578_v26 = vcombine.high %v2774_v22, %v2778_v23  ;;  %v2781_v27 = vld [vmem:[#allocation7 + $0x550] sm:$0xff]  ;;  %v2826_v19 = vld [vmem:[#allocation7 + $0x6b8] sm:$0xff] }
 0x443   :  { %6245 = vmatprep.subr.bf16.mxu0 %v7530_v30  ;;  %v2785_v30 = vld [vmem:[#allocation7 + $0x570] sm:$0xff] }
 0x444   :  { %v7583_v17 = vcombine.low %v2781_v27, %v2785_v30 }
 0x445   :  { %6082 = vmatpush1.bf16.msra.mxu1 %v7527_v39  ;;  %v7584_v39 = vcombine.high %v2781_v27, %v2785_v30  ;;  %v2830_v27 = vld [vmem:[#allocation7 + $0x6d8] sm:$0xff] }
 0x446   :  { %6246 = vmatpush1.bf16.msra.mxu0 %v7529_v40  ;;  %6083 = vmatprep.subr.bf16.mxu1 %v7536_v44  ;;  %v7586_v40 = vcombine.high %v2782_v31, %v2786_v34  ;;  %v2789_v44 = vld [vmem:[#allocation7 + $0x590] sm:$0xff]  ;;  %v2834_v30 = vld [vmem:[#allocation7 + $0x6f8] sm:$0xff]  ;;  %v7625_v34 = vcombine.low %v2822_v43, %v2826_v19 }
 0x447   :  { %6247 = vmatprep.subr.bf16.mxu0 %v7538_v0  ;;  %v2793_v0 = vld [vmem:[#allocation7 + $0x5b0] sm:$0xff] }
 0x449   :  { %6084 = vmatpush1.bf16.msra.mxu1 %v7535_v51  ;;  %v7592_v51 = vcombine.high %v2789_v44, %v2793_v0 }
 0x44a   :  { %6248 = vmatpush1.bf16.msra.mxu0 %v7537_v52  ;;  %6094 = vmatprep.subr.bf16.mxu1 %v7544_v53  ;;  %v7594_v52 = vcombine.high %v2790_v60, %v2794_v47  ;;  %v2797_v53 = vld [vmem:[#allocation7 + $0x5d0] sm:$0xff]  ;;  %v7633_v47 = vcombine.low %v2830_v27, %v2834_v30 }
 0x44b   :  { %6258 = vmatprep.subr.bf16.mxu0 %v7546_v54  ;;  %v2801_v54 = vld [vmem:[#allocation7 + $0x5f0] sm:$0xff] }
 0x44c   :  { %6086 = vmatmul.mubr.bf16.vlgmr.msra.gmra.mrb[16].mxu1 %v8679_v20  ;;  %v7600_v59 = vcombine.high %v2797_v53, %v2801_v54 }
 0x44d   :  { %6250 = vmatmul.mubr.bf16.vlgmr.msra.gmra.mrb[20].mxu0 %v8679_v20  ;;  %6095 = vmatpush1.bf16.msra.mxu1 %v7543_v61  ;;  %v7561_v20 = vcombine.low %v2758_v3, %v2762_v5  ;;  %v7591_v61 = vcombine.low %v2789_v44, %v2793_v0  ;;  %v7599_v3 = vcombine.low %v2797_v53, %v2801_v54  ;;  %v2838_v44 = vld [vmem:[#allocation7 + $0x718] sm:$0xff] }
 0x44e   :  { %6126 = vmatprep.mubr.bf16.mxu1 %v8683_v28  ;;  %6259 = vmatpush1.bf16.msra.mxu0 %v7545_v62  ;;  %v7602_v62 = vcombine.high %v2798_v55, %v2802_v56  ;;  %v7601_v5 = vcombine.low %v2798_v55, %v2802_v56  ;;  %v2842_v0 = vld [vmem:[#allocation7 + $0x738] sm:$0xff] }
 0x44f   :  { %6290 = vmatprep.mubr.bf16.mxu0 %v8683_v28  ;;  %6096 = vmatprep.subr.bf16.mxu1 %v7552_v63  ;;  %v7567_v28 = vcombine.low %v2765_v9, %v2769_v10  ;;  %v2805_v63 = vld [vmem:[#allocation7 + $0x610] sm:$0xff]  ;;  %v2814_v9 = vld [vmem:[#allocation7 + $0x658] sm:$0xff]  ;;  %v7641_v56 = vcombine.low %v2838_v44, %v2842_v0 }
 0x450   :  { %6260 = vmatprep.subr.bf16.mxu0 %v7554_v2  ;;  %v2810_v2 = vld [vmem:[#allocation7 + $0x638] sm:$0xff]  ;;  %v7607_v6 = vcombine.low %v2805_v63, %v2809_v4 }
 0x451   :  { %6097 = vmatpush1.bf16.msra.mxu1 %v7551_v37  ;;  %v7608_v37 = vcombine.high %v2805_v63, %v2809_v4  ;;  %v2818_v10 = vld [vmem:[#allocation7 + $0x678] sm:$0xff]  ;;  %v7609_v11 = vcombine.low %v2806_v1, %v2810_v2 }
 0x452   :  { %6261 = vmatpush1.bf16.msra.mxu0 %v7553_v21  ;;  %6098 = vmatprep.subr.bf16.mxu1 %v7560_v7  ;;  %v7610_v21 = vcombine.high %v2806_v1, %v2810_v2  ;;  %v2813_v7 = vld [vmem:[#allocation7 + $0x650] sm:$0xff]  ;;  %v7617_v23 = vcombine.low %v2814_v9, %v2818_v10  ;;  %v2846_v53 = vld [vmem:[#allocation7 + $0x758] sm:$0xff] }
 0x453   :  { %6262 = vmatprep.subr.bf16.mxu0 %v7562_v8  ;;  %v2817_v8 = vld [vmem:[#allocation7 + $0x670] sm:$0xff]  ;;  %v2850_v54 = vld [vmem:[#allocation7 + $0x778] sm:$0xff] }
 0x454   :  { %v7615_v22 = vcombine.low %v2813_v7, %v2817_v8  ;;  %v2854_v63 = vld [vmem:[#allocation7 + $0x798] sm:$0xff]  ;;  %v7649_v2 = vcombine.low %v2846_v53, %v2850_v54 }
 0x455   :  { %6099 = vmatpush1.bf16.msra.mxu1 %v7559_v57  ;;  %v7616_v57 = vcombine.high %v2813_v7, %v2817_v8  ;;  %v2858_v4 = vld [vmem:[#allocation7 + $0x7b8] sm:$0xff] }
 0x456   :  { %6263 = vmatpush1.bf16.msra.mxu0 %v7561_v20  ;;  %6100 = vmatprep.subr.bf16.mxu1 %v7568_v13  ;;  %v7618_v20 = vcombine.high %v2814_v9, %v2818_v10  ;;  %v2821_v13 = vld [vmem:[#allocation7 + $0x690] sm:$0xff]  ;;  %v2862_v7 = vld [vmem:[#allocation7 + $0x7d8] sm:$0xff]  ;;  %v7657_v10 = vcombine.low %v2854_v63, %v2858_v4 }
 0x457   :  { %6264 = vmatprep.subr.bf16.mxu0 %v7570_v14  ;;  %v2825_v14 = vld [vmem:[#allocation7 + $0x6b0] sm:$0xff]  ;;  %v2866_v8 = vld [vmem:[#allocation7 + $0x7f8] sm:$0xff] }
 0x458   :  { %v7623_v31 = vcombine.low %v2821_v13, %v2825_v14 }
 0x459   :  { %6101 = vmatpush1.bf16.msra.mxu1 %v7567_v28  ;;  %v7624_v28 = vcombine.high %v2821_v13, %v2825_v14  ;;  %v2870_v13 = vld [vmem:[#allocation7 + $0x818] sm:$0xff] }
 0x45a   :  { %6265 = vmatpush1.bf16.msra.mxu0 %v7569_v24  ;;  %6102 = vmatprep.subr.bf16.mxu1 %v7576_v25  ;;  %v7626_v24 = vcombine.high %v2822_v43, %v2826_v19  ;;  %v2829_v25 = vld [vmem:[#allocation7 + $0x6d0] sm:$0xff]  ;;  %v2874_v14 = vld [vmem:[#allocation7 + $0x838] sm:$0xff]  ;;  %v7665_v19 = vcombine.low %v2862_v7, %v2866_v8 }
 0x45b   :  { %6266 = vmatprep.subr.bf16.mxu0 %v7578_v26  ;;  %v2833_v26 = vld [vmem:[#allocation7 + $0x6f0] sm:$0xff] }
 0x45c   :  { %v7631_v60 = vcombine.low %v2829_v25, %v2833_v26 }
 0x45d   :  { %6103 = vmatpush1.bf16.msra.mxu1 %v7575_v35  ;;  %v7632_v35 = vcombine.high %v2829_v25, %v2833_v26  ;;  %v2878_v26 = vld [vmem:[#allocation7 + $0x858] sm:$0xff] }
 0x45e   :  { %6267 = vmatpush1.bf16.msra.mxu0 %v7577_v36  ;;  %6104 = vmatprep.subr.bf16.mxu1 %v7584_v39  ;;  %v7634_v36 = vcombine.high %v2830_v27, %v2834_v30  ;;  %v2837_v39 = vld [vmem:[#allocation7 + $0x710] sm:$0xff]  ;;  %v2882_v27 = vld [vmem:[#allocation7 + $0x878] sm:$0xff]  ;;  %v7673_v30 = vcombine.low %v2870_v13, %v2874_v14 }
 0x45f   :  { %6268 = vmatprep.subr.bf16.mxu0 %v7586_v40  ;;  %v2841_v40 = vld [vmem:[#allocation7 + $0x730] sm:$0xff] }
 0x460   :  { %v7639_v55 = vcombine.low %v2837_v39, %v2841_v40 }
 0x461   :  { %6105 = vmatpush1.bf16.msra.mxu1 %v7583_v17  ;;  %v7640_v17 = vcombine.high %v2837_v39, %v2841_v40  ;;  %v2886_v39 = vld [vmem:[#allocation7 + $0x898] sm:$0xff] }
 0x462   :  { %6269 = vmatpush1.bf16.msra.mxu0 %v7585_v50  ;;  %6106 = vmatprep.subr.bf16.mxu1 %v7592_v51  ;;  %v7642_v50 = vcombine.high %v2838_v44, %v2842_v0  ;;  %v2845_v51 = vld [vmem:[#allocation7 + $0x750] sm:$0xff]  ;;  %v2890_v40 = vld [vmem:[#allocation7 + $0x8b8] sm:$0xff]  ;;  %v7681_v0 = vcombine.low %v2878_v26, %v2882_v27 }
 0x463   :  { %6270 = vmatprep.subr.bf16.mxu0 %v7594_v52  ;;  %v2849_v52 = vld [vmem:[#allocation7 + $0x770] sm:$0xff] }
 0x464   :  { %v7647_v1 = vcombine.low %v2845_v51, %v2849_v52 }
 0x465   :  { %6107 = vmatpush1.bf16.msra.mxu1 %v7591_v61  ;;  %v7648_v61 = vcombine.high %v2845_v51, %v2849_v52  ;;  %v2894_v51 = vld [vmem:[#allocation7 + $0x8d8] sm:$0xff] }
 0x466   :  { %6271 = vmatpush1.bf16.msra.mxu0 %v7593_v58  ;;  %6108 = vmatprep.subr.bf16.mxu1 %v7600_v59  ;;  %v7650_v58 = vcombine.high %v2846_v53, %v2850_v54  ;;  %v2853_v59 = vld [vmem:[#allocation7 + $0x790] sm:$0xff]  ;;  %v2898_v52 = vld [vmem:[#allocation7 + $0x8f8] sm:$0xff] }
 0x467   :  { %6272 = vmatprep.subr.bf16.mxu0 %v7602_v62  ;;  %v2857_v62 = vld [vmem:[#allocation7 + $0x7b0] sm:$0xff] }
 0x468   :  { %v7655_v9 = vcombine.low %v2853_v59, %v2857_v62 }
 0x469   :  { %6109 = vmatpush1.bf16.msra.mxu1 %v7599_v3  ;;  %v7656_v3 = vcombine.high %v2853_v59, %v2857_v62  ;;  %v2906_v59 = vld [vmem:[#allocation7 + $0x938] sm:$0xff]  ;;  %v7697_v62 = vcombine.low %v2894_v51, %v2898_v52 }
 0x46a   :  { %6273 = vmatpush1.bf16.msra.mxu0 %v7601_v5  ;;  %6110 = vmatprep.subr.bf16.mxu1 %v7608_v37  ;;  %v7658_v5 = vcombine.high %v2854_v63, %v2858_v4  ;;  %v2861_v37 = vld [vmem:[#allocation7 + $0x7d0] sm:$0xff] }
 0x46b   :  { %6274 = vmatprep.subr.bf16.mxu0 %v7610_v21  ;;  %v2865_v21 = vld [vmem:[#allocation7 + $0x7f0] sm:$0xff] }
 0x46c   :  { %v7663_v43 = vcombine.low %v2861_v37, %v2865_v21 }
 0x46d   :  { %6111 = vmatpush1.bf16.msra.mxu1 %v7607_v6  ;;  %v7664_v6 = vcombine.high %v2861_v37, %v2865_v21 }
 0x46e   :  { %6275 = vmatpush1.bf16.msra.mxu0 %v7609_v11  ;;  %6112 = vmatprep.subr.bf16.mxu1 %v7616_v57  ;;  %v7666_v11 = vcombine.high %v2862_v7, %v2866_v8  ;;  %v2869_v57 = vld [vmem:[#allocation7 + $0x810] sm:$0xff] }
 0x46f   :  { %6276 = vmatprep.subr.bf16.mxu0 %v7618_v20  ;;  %v2873_v20 = vld [vmem:[#allocation7 + $0x830] sm:$0xff] }
 0x470   :  { %v7671_v25 = vcombine.low %v2869_v57, %v2873_v20 }
 0x471   :  { %6113 = vmatpush1.bf16.msra.mxu1 %v7615_v22  ;;  %v7672_v22 = vcombine.high %v2869_v57, %v2873_v20 }
 0x472   :  { %6277 = vmatpush1.bf16.msra.mxu0 %v7617_v23  ;;  %6114 = vmatprep.subr.bf16.mxu1 %v7624_v28  ;;  %v7674_v23 = vcombine.high %v2870_v13, %v2874_v14  ;;  %v2877_v28 = vld [vmem:[#allocation7 + $0x850] sm:$0xff] }
 0x473   :  { %6278 = vmatprep.subr.bf16.mxu0 %v7626_v24  ;;  %v2881_v24 = vld [vmem:[#allocation7 + $0x870] sm:$0xff] }
 0x474   :  { %v7679_v44 = vcombine.low %v2877_v28, %v2881_v24 }
 0x475   :  { %6115 = vmatpush1.bf16.msra.mxu1 %v7623_v31  ;;  %v7680_v31 = vcombine.high %v2877_v28, %v2881_v24 }
 0x476   :  { %6279 = vmatpush1.bf16.msra.mxu0 %v7625_v34  ;;  %6116 = vmatprep.subr.bf16.mxu1 %v7632_v35  ;;  %v2885_v34 = vld [vmem:[#allocation7 + $0x890] sm:$0xff] }
 0x477   :  { %6280 = vmatprep.subr.bf16.mxu0 %v7634_v36  ;;  %v2889_v35 = vld [vmem:[#allocation7 + $0x8b0] sm:$0xff]  ;;  %v7682_v36 = vcombine.high %v2878_v26, %v2882_v27 }
 0x478   :  { %v7687_v53 = vcombine.low %v2885_v34, %v2889_v35  ;;  %v2933_v27 = vld [vmem:[#allocation7 + $0xa10] sm:$0xff] }
 0x479   :  { %6117 = vmatpush1.bf16.msra.mxu1 %v7631_v60  ;;  %v7688_v60 = vcombine.high %v2885_v34, %v2889_v35  ;;  %v2938_v34 = vld [vmem:[#allocation7 + $0xa38] sm:$0xff] }
 0x47a   :  { %6281 = vmatpush1.bf16.msra.mxu0 %v7633_v47  ;;  %6118 = vmatprep.subr.bf16.mxu1 %v7640_v17  ;;  %v7690_v47 = vcombine.high %v2886_v39, %v2890_v40  ;;  %v2893_v17 = vld [vmem:[#allocation7 + $0x8d0] sm:$0xff] }
 0x47b   :  { %6282 = vmatprep.subr.bf16.mxu0 %v7642_v50  ;;  %v2897_v50 = vld [vmem:[#allocation7 + $0x8f0] sm:$0xff] }
 0x47c   :  { %v7696_v54 = vcombine.high %v2893_v17, %v2897_v50 }
 0x47d   :  { %6119 = vmatpush1.bf16.msra.mxu1 %v7639_v55  ;;  %v7698_v55 = vcombine.high %v2894_v51, %v2898_v52 }
 0x47e   :  { %6283 = vmatpush1.bf16.msra.mxu0 %v7641_v56  ;;  %6120 = vmatprep.subr.bf16.mxu1 %v7648_v61  ;;  %v2901_v56 = vld [vmem:[#allocation7 + $0x910] sm:$0xff] }
 0x47f   :  { %6284 = vmatprep.subr.bf16.mxu0 %v7650_v58  ;;  %v2905_v61 = vld [vmem:[#allocation7 + $0x930] sm:$0xff]  ;;  %v2902_v58 = vld [vmem:[#allocation7 + $0x918] sm:$0xff] }
 0x480   :  { %v7704_v63 = vcombine.high %v2901_v56, %v2905_v61  ;;  %v7706_v4 = vcombine.high %v2902_v58, %v2906_v59  ;;  %v7703_v37 = vcombine.low %v2901_v56, %v2905_v61  ;;  %v7705_v21 = vcombine.low %v2902_v58, %v2906_v59 }
 0x481   :  { %6121 = vmatpush1.bf16.msra.mxu1 %v7647_v1  ;;  %v2909_v1 = vld [vmem:[#allocation7 + $0x950] sm:$0xff] }
 0x482   :  { %6285 = vmatpush1.bf16.msra.mxu0 %v7649_v2  ;;  %6122 = vmatprep.subr.bf16.mxu1 %v7656_v3  ;;  %v2913_v2 = vld [vmem:[#allocation7 + $0x970] sm:$0xff]  ;;  %v2910_v3 = vld [vmem:[#allocation7 + $0x958] sm:$0xff] }
 0x483   :  { %6286 = vmatprep.subr.bf16.mxu0 %v7658_v5  ;;  %v2914_v5 = vld [vmem:[#allocation7 + $0x978] sm:$0xff]  ;;  %v7712_v7 = vcombine.high %v2909_v1, %v2913_v2  ;;  %v7711_v57 = vcombine.low %v2909_v1, %v2913_v2 }
 0x484   :  { %v7714_v8 = vcombine.high %v2910_v3, %v2914_v5  ;;  %v7713_v20 = vcombine.low %v2910_v3, %v2914_v5 }
 0x485   :  { %6123 = vmatpush1.bf16.msra.mxu1 %v7655_v9  ;;  %v2917_v9 = vld [vmem:[#allocation7 + $0x990] sm:$0xff] }
 0x486   :  { %6287 = vmatpush1.bf16.msra.mxu0 %v7657_v10  ;;  %6124 = vmatprep.subr.bf16.mxu1 %v7664_v6  ;;  %v2921_v10 = vld [vmem:[#allocation7 + $0x9b0] sm:$0xff]  ;;  %v2918_v6 = vld [vmem:[#allocation7 + $0x998] sm:$0xff] }
 0x487   :  { %6288 = vmatprep.subr.bf16.mxu0 %v7666_v11  ;;  %v2922_v11 = vld [vmem:[#allocation7 + $0x9b8] sm:$0xff]  ;;  %v7720_v13 = vcombine.high %v2917_v9, %v2921_v10  ;;  %v7719_v28 = vcombine.low %v2917_v9, %v2921_v10 }
 0x488   :  { %v7722_v14 = vcombine.high %v2918_v6, %v2922_v11  ;;  %v7721_v24 = vcombine.low %v2918_v6, %v2922_v11 }
 0x489   :  { %6125 = vmatpush1.bf16.msra.mxu1 %v7663_v43  ;;  %v2925_v43 = vld [vmem:[#allocation7 + $0x9d0] sm:$0xff] }
 0x48a   :  { %6289 = vmatpush1.bf16.msra.mxu0 %v7665_v19  ;;  %6135 = vmatprep.subr.bf16.mxu1 %v7672_v22  ;;  %v2929_v19 = vld [vmem:[#allocation7 + $0x9f0] sm:$0xff]  ;;  %v2926_v22 = vld [vmem:[#allocation7 + $0x9d8] sm:$0xff] }
 0x48b   :  { %6299 = vmatprep.subr.bf16.mxu0 %v7674_v23  ;;  %v2930_v23 = vld [vmem:[#allocation7 + $0x9f8] sm:$0xff]  ;;  %v7727_v35 = vcombine.low %v2925_v43, %v2929_v19 }
 0x48c   :  { %6127 = vmatmul.mubr.bf16.vlgmr.msra.gmra.mrb[16].mxu1 %v8692_v48  ;;  %v7730_v26 = vcombine.high %v2926_v22, %v2930_v23 }
 0x48d   :  { %6291 = vmatmul.mubr.bf16.vlgmr.msra.gmra.mrb[20].mxu0 %v8692_v48  ;;  %6136 = vmatpush1.bf16.msra.mxu1 %v7671_v25  ;;  %v7689_v48 = vcombine.low %v2886_v39, %v2890_v40  ;;  %v7728_v25 = vcombine.high %v2925_v43, %v2929_v19 }
 0x48e   :  { %6167 = vmatprep.mubr.bf16.mxu1 %v8710_v29  ;;  %6300 = vmatpush1.bf16.msra.mxu0 %v7673_v30  ;;  %v2937_v30 = vld [vmem:[#allocation7 + $0xa30] sm:$0xff] }
 0x48f   :  { %6331 = vmatprep.mubr.bf16.mxu0 %v8710_v29  ;;  %6137 = vmatprep.subr.bf16.mxu1 %v7680_v31  ;;  %v7695_v29 = vcombine.low %v2893_v17, %v2897_v50  ;;  %v2934_v31 = vld [vmem:[#allocation7 + $0xa18] sm:$0xff]  ;;  %v7736_v39 = vcombine.high %v2933_v27, %v2937_v30  ;;  %v7735_v17 = vcombine.low %v2933_v27, %v2937_v30 }
 0x490   :  { %6301 = vmatprep.subr.bf16.mxu0 %v7682_v36  ;;  %v7729_v36 = vcombine.low %v2926_v22, %v2930_v23  ;;  %v7738_v40 = vcombine.high %v2934_v31, %v2938_v34  ;;  %v7737_v50 = vcombine.low %v2934_v31, %v2938_v34 }
 0x491   :  { %6138 = vmatpush1.bf16.msra.mxu1 %v7679_v44  ;;  %v2941_v44 = vld [vmem:[#allocation7 + $0xa50] sm:$0xff] }
 0x492   :  { %6302 = vmatpush1.bf16.msra.mxu0 %v7681_v0  ;;  %6139 = vmatprep.subr.bf16.mxu1 %v7688_v60  ;;  %v2945_v0 = vld [vmem:[#allocation7 + $0xa70] sm:$0xff]  ;;  %v2942_v60 = vld [vmem:[#allocation7 + $0xa58] sm:$0xff] }
 0x493   :  { %6303 = vmatprep.subr.bf16.mxu0 %v7690_v47  ;;  %v2946_v47 = vld [vmem:[#allocation7 + $0xa78] sm:$0xff]  ;;  %v7744_v51 = vcombine.high %v2941_v44, %v2945_v0  ;;  %v7743_v56 = vcombine.low %v2941_v44, %v2945_v0 }
 0x494   :  { %v7746_v52 = vcombine.high %v2942_v60, %v2946_v47  ;;  %v7745_v61 = vcombine.low %v2942_v60, %v2946_v47 }
 0x495   :  { %6140 = vmatpush1.bf16.msra.mxu1 %v7687_v53  ;;  %v2949_v53 = vld [vmem:[#allocation7 + $0xa90] sm:$0xff] }
 0x496   :  { %6304 = vmatpush1.bf16.msra.mxu0 %v7689_v48  ;;  %6141 = vmatprep.subr.bf16.mxu1 %v7696_v54  ;;  %v2953_v48 = vld [vmem:[#allocation7 + $0xab0] sm:$0xff]  ;;  %v2950_v54 = vld [vmem:[#allocation7 + $0xa98] sm:$0xff] }
 0x497   :  { %6305 = vmatprep.subr.bf16.mxu0 %v7698_v55  ;;  %v2954_v55 = vld [vmem:[#allocation7 + $0xab8] sm:$0xff]  ;;  %v7752_v58 = vcombine.high %v2949_v53, %v2953_v48  ;;  %v7751_v1 = vcombine.low %v2949_v53, %v2953_v48 }
 0x498   :  { %v7754_v59 = vcombine.high %v2950_v54, %v2954_v55  ;;  %v7753_v2 = vcombine.low %v2950_v54, %v2954_v55 }
 0x499   :  { %6142 = vmatpush1.bf16.msra.mxu1 %v7695_v29  ;;  %v2957_v29 = vld [vmem:[#allocation7 + $0xad0] sm:$0xff] }
 0x49a   :  { %6306 = vmatpush1.bf16.msra.mxu0 %v7697_v62  ;;  %6143 = vmatprep.subr.bf16.mxu1 %v7704_v63  ;;  %v2961_v62 = vld [vmem:[#allocation7 + $0xaf0] sm:$0xff]  ;;  %v2958_v63 = vld [vmem:[#allocation7 + $0xad8] sm:$0xff] }
 0x49b   :  { %6307 = vmatprep.subr.bf16.mxu0 %v7706_v4  ;;  %v2962_v4 = vld [vmem:[#allocation7 + $0xaf8] sm:$0xff]  ;;  %v7760_v3 = vcombine.high %v2957_v29, %v2961_v62  ;;  %v7759_v9 = vcombine.low %v2957_v29, %v2961_v62 }
 0x49c   :  { %v7762_v5 = vcombine.high %v2958_v63, %v2962_v4  ;;  %v7761_v10 = vcombine.low %v2958_v63, %v2962_v4  ;;  %v3010_v29 = vld [vmem:[#allocation7 + $0xc78] sm:$0xff]  ;;  %v3013_v4 = vld [vmem:[#allocation7 + $0xc90] sm:$0xff] }
 0x49d   :  { %6144 = vmatpush1.bf16.msra.mxu1 %v7703_v37  ;;  %v2965_v37 = vld [vmem:[#allocation7 + $0xb10] sm:$0xff] }
 0x49e   :  { %6308 = vmatpush1.bf16.msra.mxu0 %v7705_v21  ;;  %6145 = vmatprep.subr.bf16.mxu1 %v7712_v7  ;;  %v2969_v21 = vld [vmem:[#allocation7 + $0xb30] sm:$0xff]  ;;  %v2966_v7 = vld [vmem:[#allocation7 + $0xb18] sm:$0xff] }
 0x49f   :  { %6309 = vmatprep.subr.bf16.mxu0 %v7714_v8  ;;  %v2970_v8 = vld [vmem:[#allocation7 + $0xb38] sm:$0xff]  ;;  %v7768_v6 = vcombine.high %v2965_v37, %v2969_v21  ;;  %v7767_v43 = vcombine.low %v2965_v37, %v2969_v21 }
 0x4a0   :  { %v7770_v11 = vcombine.high %v2966_v7, %v2970_v8  ;;  %v7769_v19 = vcombine.low %v2966_v7, %v2970_v8 }
 0x4a1   :  { %6146 = vmatpush1.bf16.msra.mxu1 %v7711_v57  ;;  %v2973_v57 = vld [vmem:[#allocation7 + $0xb50] sm:$0xff] }
 0x4a2   :  { %6310 = vmatpush1.bf16.msra.mxu0 %v7713_v20  ;;  %6147 = vmatprep.subr.bf16.mxu1 %v7720_v13  ;;  %v2977_v20 = vld [vmem:[#allocation7 + $0xb70] sm:$0xff]  ;;  %v2974_v13 = vld [vmem:[#allocation7 + $0xb58] sm:$0xff] }
 0x4a3   :  { %6311 = vmatprep.subr.bf16.mxu0 %v7722_v14  ;;  %v2978_v14 = vld [vmem:[#allocation7 + $0xb78] sm:$0xff]  ;;  %v7776_v22 = vcombine.high %v2973_v57, %v2977_v20  ;;  %v7775_v27 = vcombine.low %v2973_v57, %v2977_v20 }
 0x4a4   :  { %v7778_v23 = vcombine.high %v2974_v13, %v2978_v14  ;;  %v7777_v30 = vcombine.low %v2974_v13, %v2978_v14  ;;  %v3029_v14 = vld [vmem:[#allocation7 + $0xd10] sm:$0xff] }
 0x4a5   :  { %6148 = vmatpush1.bf16.msra.mxu1 %v7719_v28  ;;  %v2981_v28 = vld [vmem:[#allocation7 + $0xb90] sm:$0xff] }
 0x4a6   :  { %6312 = vmatpush1.bf16.msra.mxu0 %v7721_v24  ;;  %6149 = vmatprep.subr.bf16.mxu1 %v7728_v25  ;;  %v2985_v24 = vld [vmem:[#allocation7 + $0xbb0] sm:$0xff]  ;;  %v2982_v25 = vld [vmem:[#allocation7 + $0xb98] sm:$0xff] }
 0x4a7   :  { %6313 = vmatprep.subr.bf16.mxu0 %v7730_v26  ;;  %v2986_v26 = vld [vmem:[#allocation7 + $0xbb8] sm:$0xff]  ;;  %v7784_v31 = vcombine.high %v2981_v28, %v2985_v24  ;;  %v7783_v44 = vcombine.low %v2981_v28, %v2985_v24 }
 0x4a8   :  { %v7786_v34 = vcombine.high %v2982_v25, %v2986_v26  ;;  %v7785_v0 = vcombine.low %v2982_v25, %v2986_v26  ;;  %v3037_v25 = vld [vmem:[#allocation7 + $0xd50] sm:$0xff] }
 0x4a9   :  { %6150 = vmatpush1.bf16.msra.mxu1 %v7727_v35  ;;  %v2989_v35 = vld [vmem:[#allocation7 + $0xbd0] sm:$0xff] }
 0x4aa   :  { %6314 = vmatpush1.bf16.msra.mxu0 %v7729_v36  ;;  %6151 = vmatprep.subr.bf16.mxu1 %v7736_v39  ;;  %v2993_v36 = vld [vmem:[#allocation7 + $0xbf0] sm:$0xff]  ;;  %v2990_v39 = vld [vmem:[#allocation7 + $0xbd8] sm:$0xff] }
 0x4ab   :  { %6315 = vmatprep.subr.bf16.mxu0 %v7738_v40  ;;  %v2994_v40 = vld [vmem:[#allocation7 + $0xbf8] sm:$0xff]  ;;  %v7792_v60 = vcombine.high %v2989_v35, %v2993_v36  ;;  %v7791_v53 = vcombine.low %v2989_v35, %v2993_v36  ;;  %v3041_v26 = vld [vmem:[#allocation7 + $0xd70] sm:$0xff] }
 0x4ac   :  { %v7794_v47 = vcombine.high %v2990_v39, %v2994_v40  ;;  %v7793_v48 = vcombine.low %v2990_v39, %v2994_v40  ;;  %v7840_v35 = vcombine.high %v3037_v25, %v3041_v26  ;;  %v3045_v39 = vld [vmem:[#allocation7 + $0xd90] sm:$0xff] }
 0x4ad   :  { %6152 = vmatpush1.bf16.msra.mxu1 %v7735_v17  ;;  %v2997_v17 = vld [vmem:[#allocation7 + $0xc10] sm:$0xff] }
 0x4ae   :  { %6316 = vmatpush1.bf16.msra.mxu0 %v7737_v50  ;;  %6153 = vmatprep.subr.bf16.mxu1 %v7744_v51  ;;  %v3001_v50 = vld [vmem:[#allocation7 + $0xc30] sm:$0xff]  ;;  %v2998_v51 = vld [vmem:[#allocation7 + $0xc18] sm:$0xff] }
 0x4af   :  { %6317 = vmatprep.subr.bf16.mxu0 %v7746_v52  ;;  %v3002_v52 = vld [vmem:[#allocation7 + $0xc38] sm:$0xff]  ;;  %v7800_v54 = vcombine.high %v2997_v17, %v3001_v50  ;;  %v3049_v40 = vld [vmem:[#allocation7 + $0xdb0] sm:$0xff] }
 0x4b0   :  { %v7802_v55 = vcombine.high %v2998_v51, %v3002_v52  ;;  %v7801_v62 = vcombine.low %v2998_v51, %v3002_v52 }
 0x4b1   :  { %6154 = vmatpush1.bf16.msra.mxu1 %v7743_v56  ;;  %v3005_v56 = vld [vmem:[#allocation7 + $0xc50] sm:$0xff] }
 0x4b2   :  { %6318 = vmatpush1.bf16.msra.mxu0 %v7745_v61  ;;  %6155 = vmatprep.subr.bf16.mxu1 %v7752_v58  ;;  %v3009_v61 = vld [vmem:[#allocation7 + $0xc70] sm:$0xff]  ;;  %v7799_v58 = vcombine.low %v2997_v17, %v3001_v50  ;;  %v7848_v17 = vcombine.high %v3045_v39, %v3049_v40 }
 0x4b3   :  { %6319 = vmatprep.subr.bf16.mxu0 %v7754_v59  ;;  %v3006_v59 = vld [vmem:[#allocation7 + $0xc58] sm:$0xff]  ;;  %v7808_v63 = vcombine.high %v3005_v56, %v3009_v61  ;;  %v7807_v37 = vcombine.low %v3005_v56, %v3009_v61 }
 0x4b4   :  { %v7809_v21 = vcombine.low %v3006_v59, %v3010_v29  ;;  %v3054_v56 = vld [vmem:[#allocation7 + $0xdd8] sm:$0xff] }
 0x4b5   :  { %6156 = vmatpush1.bf16.msra.mxu1 %v7751_v1  ;;  %v3017_v1 = vld [vmem:[#allocation7 + $0xcb0] sm:$0xff]  ;;  %v3058_v61 = vld [vmem:[#allocation7 + $0xdf8] sm:$0xff] }
 0x4b6   :  { %6320 = vmatpush1.bf16.msra.mxu0 %v7753_v2  ;;  %6157 = vmatprep.subr.bf16.mxu1 %v7760_v3  ;;  %v7810_v2 = vcombine.high %v3006_v59, %v3010_v29  ;;  %v3014_v3 = vld [vmem:[#allocation7 + $0xc98] sm:$0xff]  ;;  %v7816_v7 = vcombine.high %v3013_v4, %v3017_v1  ;;  %v7815_v57 = vcombine.low %v3013_v4, %v3017_v1 }
 0x4b7   :  { %6321 = vmatprep.subr.bf16.mxu0 %v7762_v5  ;;  %v3018_v5 = vld [vmem:[#allocation7 + $0xcb8] sm:$0xff]  ;;  %v7847_v29 = vcombine.low %v3045_v39, %v3049_v40 }
 0x4b8   :  { %v7818_v8 = vcombine.high %v3014_v3, %v3018_v5 }
 0x4b9   :  { %6158 = vmatpush1.bf16.msra.mxu1 %v7759_v9  ;;  %v3021_v9 = vld [vmem:[#allocation7 + $0xcd0] sm:$0xff] }
 0x4ba   :  { %6322 = vmatpush1.bf16.msra.mxu0 %v7761_v10  ;;  %6159 = vmatprep.subr.bf16.mxu1 %v7768_v6  ;;  %v3025_v10 = vld [vmem:[#allocation7 + $0xcf0] sm:$0xff]  ;;  %v3022_v6 = vld [vmem:[#allocation7 + $0xcd8] sm:$0xff] }
 0x4bb   :  { %6323 = vmatprep.subr.bf16.mxu0 %v7770_v11  ;;  %v3026_v11 = vld [vmem:[#allocation7 + $0xcf8] sm:$0xff]  ;;  %v7824_v20 = vcombine.high %v3021_v9, %v3025_v10 }
 0x4bc   :  { %v7826_v13 = vcombine.high %v3022_v6, %v3026_v11 }
 0x4bd   :  { %6160 = vmatpush1.bf16.msra.mxu1 %v7767_v43  ;;  %v3033_v43 = vld [vmem:[#allocation7 + $0xd30] sm:$0xff] }
 0x4be   :  { %6324 = vmatpush1.bf16.msra.mxu0 %v7769_v19  ;;  %6161 = vmatprep.subr.bf16.mxu1 %v7776_v22  ;;  %v3030_v19 = vld [vmem:[#allocation7 + $0xd18] sm:$0xff]  ;;  %v7832_v28 = vcombine.high %v3029_v14, %v3033_v43 }
 0x4bf   :  { %6325 = vmatprep.subr.bf16.mxu0 %v7778_v23  ;;  %v3034_v22 = vld [vmem:[#allocation7 + $0xd38] sm:$0xff]  ;;  %v7825_v23 = vcombine.low %v3022_v6, %v3026_v11  ;;  %v3069_v6 = vld [vmem:[#allocation7 + $0xe50] sm:$0xff] }
 0x4c0   :  { %v7834_v24 = vcombine.high %v3030_v19, %v3034_v22  ;;  %v3073_v11 = vld [vmem:[#allocation7 + $0xe70] sm:$0xff] }
 0x4c1   :  { %6162 = vmatpush1.bf16.msra.mxu1 %v7775_v27  ;;  %v3038_v27 = vld [vmem:[#allocation7 + $0xd58] sm:$0xff] }
 0x4c2   :  { %6326 = vmatpush1.bf16.msra.mxu0 %v7777_v30  ;;  %6163 = vmatprep.subr.bf16.mxu1 %v7784_v31  ;;  %v3042_v30 = vld [vmem:[#allocation7 + $0xd78] sm:$0xff]  ;;  %v7831_v31 = vcombine.low %v3029_v14, %v3033_v43  ;;  %v7872_v14 = vcombine.high %v3069_v6, %v3073_v11 }
 0x4c3   :  { %6327 = vmatprep.subr.bf16.mxu0 %v7786_v34  ;;  %v7833_v34 = vcombine.low %v3030_v19, %v3034_v22  ;;  %v7842_v36 = vcombine.high %v3038_v27, %v3042_v30  ;;  %v3077_v19 = vld [vmem:[#allocation7 + $0xe90] sm:$0xff] }
 0x4c4   :  { %v3081_v22 = vld [vmem:[#allocation7 + $0xeb0] sm:$0xff] }
 0x4c5   :  { %6164 = vmatpush1.bf16.msra.mxu1 %v7783_v44  ;;  %v3046_v44 = vld [vmem:[#allocation7 + $0xd98] sm:$0xff] }
 0x4c6   :  { %6328 = vmatpush1.bf16.msra.mxu0 %v7785_v0  ;;  %6165 = vmatprep.subr.bf16.mxu1 %v7792_v60  ;;  %v3050_v0 = vld [vmem:[#allocation7 + $0xdb8] sm:$0xff]  ;;  %v7839_v60 = vcombine.low %v3037_v25, %v3041_v26  ;;  %v7880_v25 = vcombine.high %v3077_v19, %v3081_v22 }
 0x4c7   :  { %6329 = vmatprep.subr.bf16.mxu0 %v7794_v47  ;;  %v7841_v47 = vcombine.low %v3038_v27, %v3042_v30  ;;  %v7850_v52 = vcombine.high %v3046_v44, %v3050_v0  ;;  %v7849_v4 = vcombine.low %v3046_v44, %v3050_v0  ;;  %v3085_v27 = vld [vmem:[#allocation7 + $0xed0] sm:$0xff] }
 0x4c8   :  { %v3089_v30 = vld [vmem:[#allocation7 + $0xef0] sm:$0xff] }
 0x4c9   :  { %6166 = vmatpush1.bf16.msra.mxu1 %v7791_v53  ;;  %v3053_v53 = vld [vmem:[#allocation7 + $0xdd0] sm:$0xff]  ;;  %v7888_v39 = vcombine.high %v3085_v27, %v3089_v30 }
 0x4ca   :  { %6330 = vmatpush1.bf16.msra.mxu0 %v7793_v48  ;;  %6176 = vmatprep.subr.bf16.mxu1 %v7800_v54  ;;  %v3057_v48 = vld [vmem:[#allocation7 + $0xdf0] sm:$0xff] }
 0x4cb   :  { %6340 = vmatprep.subr.bf16.mxu0 %v7802_v55  ;;  %v7856_v1 = vcombine.high %v3053_v53, %v3057_v48  ;;  %v3093_v44 = vld [vmem:[#allocation7 + $0xf10] sm:$0xff] }
 0x4cc   :  { %6168 = vmatmul.mubr.bf16.vlgmr.msra.gmra.mrb[16].mxu1 %v8712_v32  ;;  %v3097_v0 = vld [vmem:[#allocation7 + $0xf30] sm:$0xff] }
 0x4cd   :  { %6332 = vmatmul.mubr.bf16.vlgmr.msra.gmra.mrb[20].mxu0 %v8712_v32  ;;  %6177 = vmatpush1.bf16.msra.mxu1 %v7799_v58  ;;  %v7817_v32 = vcombine.low %v3014_v3, %v3018_v5  ;;  %v3061_v3 = vld [vmem:[#allocation7 + $0xe10] sm:$0xff] }
 0x4ce   :  { %6208 = vmatprep.mubr.bf16.mxu1 %v8716_v41  ;;  %6341 = vmatpush1.bf16.msra.mxu0 %v7801_v62  ;;  %v3065_v5 = vld [vmem:[#allocation7 + $0xe30] sm:$0xff] }
 0x4cf   :  { %6372 = vmatprep.mubr.bf16.mxu0 %v8716_v41  ;;  %6178 = vmatprep.subr.bf16.mxu1 %v7808_v63  ;;  %v7823_v41 = vcombine.low %v3021_v9, %v3025_v10  ;;  %v7864_v9 = vcombine.high %v3061_v3, %v3065_v5 }
 0x4d0   :  { %6342 = vmatprep.subr.bf16.mxu0 %v7810_v2  ;;  %v7858_v2 = vcombine.high %v3054_v56, %v3058_v61 }
 0x4d1   :  { %6179 = vmatpush1.bf16.msra.mxu1 %v7807_v37  ;;  %v3062_v37 = vld [vmem:[#allocation7 + $0xe18] sm:$0xff] }
 0x4d2   :  { %6343 = vmatpush1.bf16.msra.mxu0 %v7809_v21  ;;  %6180 = vmatprep.subr.bf16.mxu1 %v7816_v7  ;;  %v3066_v21 = vld [vmem:[#allocation7 + $0xe38] sm:$0xff]  ;;  %v7855_v7 = vcombine.low %v3053_v53, %v3057_v48  ;;  %v7896_v53 = vcombine.high %v3093_v44, %v3097_v0 }
 0x4d3   :  { %6344 = vmatprep.subr.bf16.mxu0 %v7818_v8  ;;  %v7857_v8 = vcombine.low %v3054_v56, %v3058_v61  ;;  %v7866_v10 = vcombine.high %v3062_v37, %v3066_v21  ;;  %v3101_v56 = vld [vmem:[#allocation7 + $0xf50] sm:$0xff] }
 0x4d4   :  { %v3105_v61 = vld [vmem:[#allocation7 + $0xf70] sm:$0xff] }
 0x4d5   :  { %6181 = vmatpush1.bf16.msra.mxu1 %v7815_v57  ;;  %v3070_v57 = vld [vmem:[#allocation7 + $0xe58] sm:$0xff] }
 0x4d6   :  { %6345 = vmatpush1.bf16.msra.mxu0 %v7817_v32  ;;  %6182 = vmatprep.subr.bf16.mxu1 %v7824_v20  ;;  %v3074_v32 = vld [vmem:[#allocation7 + $0xe78] sm:$0xff]  ;;  %v7863_v20 = vcombine.low %v3061_v3, %v3065_v5 }
 0x4d7   :  { %6346 = vmatprep.subr.bf16.mxu0 %v7826_v13  ;;  %v7865_v13 = vcombine.low %v3062_v37, %v3066_v21  ;;  %v7874_v43 = vcombine.high %v3070_v57, %v3074_v32  ;;  %v3110_v3 = vld [vmem:[#allocation7 + $0xf98] sm:$0xff]  ;;  %v8752_v37 = vld [vmem:[#allocation10 + $0xe] sm:$0xff]  ;;  %v7903_v21 = vcombine.low %v3101_v56, %v3105_v61 }
 0x4d8   :  { %v3114_v5 = vld [vmem:[#allocation7 + $0xfb8] sm:$0xff] }
 0x4d9   :  { %6183 = vmatpush1.bf16.msra.mxu1 %v7823_v41  ;;  %v3078_v41 = vld [vmem:[#allocation7 + $0xe98] sm:$0xff] }
 0x4da   :  { %6347 = vmatpush1.bf16.msra.mxu0 %v7825_v23  ;;  %6184 = vmatprep.subr.bf16.mxu1 %v7832_v28  ;;  %v3082_v23 = vld [vmem:[#allocation7 + $0xeb8] sm:$0xff]  ;;  %v7871_v28 = vcombine.low %v3069_v6, %v3073_v11  ;;  %v3121_v6 = vld [vmem:[#allocation7 + $0xff0] sm:$0xff]  ;;  %v3132_v11 = vrot.slane %v8752_v37, %v8620_v18 }
 0x4db   :  { %6348 = vmatprep.subr.bf16.mxu0 %v7834_v24  ;;  %v7873_v24 = vcombine.low %v3070_v57, %v3074_v32  ;;  %v7882_v26 = vcombine.high %v3078_v41, %v3082_v23  ;;  %v3118_v57 = vld [vmem:[#allocation7 + $0xfd8] sm:$0xff] }
 0x4dc   :  { %v3122_v32 = vld [vmem:[#allocation7 + $0xff8] sm:$0xff] }
 0x4dd   :  { %6185 = vmatpush1.bf16.msra.mxu1 %v7831_v31  ;;  %v3086_v31 = vld [vmem:[#allocation7 + $0xed8] sm:$0xff]  ;;  %v7921_v18 = vcombine.low %v3118_v57, %v3122_v32 }
 0x4de   :  { %6349 = vmatpush1.bf16.msra.mxu0 %v7833_v34  ;;  %6186 = vmatprep.subr.bf16.mxu1 %v7840_v35  ;;  %v3090_v34 = vld [vmem:[#allocation7 + $0xef8] sm:$0xff]  ;;  %v7879_v35 = vcombine.low %v3077_v19, %v3081_v22  ;;  %v7922_v19 = vcombine.high %v3118_v57, %v3122_v32  ;;  %v8308_v57 = vld [vmem:[#allocation9 + $0x180] sm:$0xff]   ;;  %v8309_v32 = vld [vmem:[#allocation9 + $0x148] sm:$0xff]  }
 0x4df   :  { %v8744_v50 = vpop.f32.mrb[12].mxu1  ;;  %v8746_v51 = vpop.f32.mrb[16].mxu0  ;;  %6350 = vmatprep.subr.bf16.mxu0 %v7842_v36  ;;  %v7881_v36 = vcombine.low %v3078_v41, %v3082_v23  ;;  %v7890_v40 = vcombine.high %v3086_v31, %v3090_v34 }
 0x4e0   :  { %v8748_v54 = vpop.f32.mrb[13].mxu1  ;;  %v8750_v55 = vpop.f32.mrb[17].mxu0 }
 0x4e1   :  { %v5886_v58 = vpop.f32.mrb[14].mxu1  ;;  %v6050_v59 = vpop.f32.mrb[18].mxu0  ;;  %6187 = vmatpush1.bf16.msra.mxu1 %v7839_v60  ;;  %v3094_v60 = vld [vmem:[#allocation7 + $0xf18] sm:$0xff]  ;;  %v8085_v22 = vadd.f32 %v8748_v54, %v3132_v11 }
 0x4e2   :  { %6351 = vmatpush1.bf16.msra.mxu0 %v7841_v47  ;;  %v5887_v62 = vpop.f32.mrb[15].mxu1  ;;  %v6051_v63 = vpop.f32.mrb[19].mxu0  ;;  %6188 = vmatprep.subr.bf16.mxu1 %v7848_v17  ;;  %v3098_v47 = vld [vmem:[#allocation7 + $0xf38] sm:$0xff]  ;;  %v7887_v17 = vcombine.low %v3085_v27, %v3089_v30  ;;  %v8276_v27 = vld [vmem:[#allocation9 + $0x80] sm:$0xff]   ;;  %v8277_v30 = vld [vmem:[#allocation9 + $0x48] sm:$0xff]  }
 0x4e3   :  { %6352 = vmatprep.subr.bf16.mxu0 %v7850_v52  ;;  %v7889_v52 = vcombine.low %v3086_v31, %v3090_v34  ;;  %v7898_v48 = vcombine.high %v3094_v60, %v3098_v47  ;;  %v3102_v58 = vld [vmem:[#allocation7 + $0xf58] sm:$0xff]  ;;  %v7897_v62 = vcombine.low %v3094_v60, %v3098_v47  ;;  %v7904_v63 = vcombine.high %v3101_v56, %v3105_v61  ;;  %v8279_v34 = vld [vmem:[#allocation9 + $0x8] sm:$0xff]  }
 0x4e4   :  { %v3106_v59 = vld [vmem:[#allocation7 + $0xf78] sm:$0xff]  ;;  %v8293_v56 = vld [vmem:[#allocation9 + $0x68] sm:$0xff]  }
 0x4e5   :  { %6189 = vmatpush1.bf16.msra.mxu1 %v7847_v29  ;;  %v7895_v29 = vcombine.low %v3093_v44, %v3097_v0  ;;  %v8284_v44 = vld [vmem:[#allocation9 + $0x90] sm:$0xff]   ;;  %v8285_v0 = vld [vmem:[#allocation9 + $0x58] sm:$0xff]   ;;  %v8294_v61 = vld [vmem:[#allocation9 + $0xe8] sm:$0xff]  }
 0x4e6   :  { %6353 = vmatpush1.bf16.msra.mxu0 %v7849_v4  ;;  %6190 = vmatprep.subr.bf16.mxu1 %v7856_v1  ;;  %v7906_v4 = vcombine.high %v3102_v58, %v3106_v59  ;;  %v3109_v1 = vld [vmem:[#allocation7 + $0xf90] sm:$0xff]  ;;  %v8286_v60 = vld [vmem:[#allocation9 + $0xd8] sm:$0xff]  }
 0x4e7   :  { %6354 = vmatprep.subr.bf16.mxu0 %v7858_v2  ;;  %v3113_v2 = vld [vmem:[#allocation7 + $0xfb0] sm:$0xff]  ;;  %v8288_v47 = vld [vmem:[#allocation9 + $0x98] sm:$0xff]  }
 0x4e9   :  { %6191 = vmatpush1.bf16.msra.mxu1 %v7855_v7  ;;  %v7905_v7 = vcombine.low %v3102_v58, %v3106_v59  ;;  %v8295_v58 = vld [vmem:[#allocation9 + $0x28] sm:$0xff]   ;;  %v3128_v59 = vrot.slane %v8752_v37, %v8617_v16  ;;  %v8302_v16 = vld [vmem:[#allocation9 + $0xf8] sm:$0xff]  }
 0x4ea   :  { %6355 = vmatpush1.bf16.msra.mxu0 %v7857_v8  ;;  %6192 = vmatprep.subr.bf16.mxu1 %v7864_v9  ;;  %v7912_v8 = vcombine.high %v3109_v1, %v3113_v2  ;;  %v7914_v9 = vcombine.high %v3110_v3, %v3114_v5 }
 0x4eb   :  { %6356 = vmatprep.subr.bf16.mxu0 %v7866_v10  ;;  %v3117_v10 = vld [vmem:[#allocation7 + $0xfd0] sm:$0xff] }
 0x4ec   :  { %v7919_v23 = vcombine.low %v3117_v10, %v3121_v6 }
 0x4ed   :  { %6193 = vmatpush1.bf16.msra.mxu1 %v7863_v20  ;;  %v3140_v20 = vrot.slane %v8752_v37, %v8627_v38  ;;  %v8274_v38 = vld [vmem:[#allocation9 + $0xc0] sm:$0xff]  }
 0x4ee   :  { %6357 = vmatpush1.bf16.msra.mxu0 %v7865_v13  ;;  %6194 = vmatprep.subr.bf16.mxu1 %v7872_v14  ;;  %v7911_v13 = vcombine.low %v3109_v1, %v3113_v2  ;;  %v7913_v14 = vcombine.low %v3110_v3, %v3114_v5  ;;  %v8299_v1 = vld [vmem:[#allocation9 + $0x30] sm:$0xff]   ;;  %v8084_v2 = vadd.f32 %v8744_v50, %v3128_v59  ;;  %v8301_v5 = vld [vmem:[#allocation9 + $0x78] sm:$0xff]   ;;  %v8307_v50 = vld [vmem:[#allocation9 + $0x100] sm:$0xff]  }
 0x4ef   :  { %6358 = vmatprep.subr.bf16.mxu0 %v7874_v43  ;;  %v7920_v43 = vcombine.high %v3117_v10, %v3121_v6  ;;  %v8087_v41 = vadd.f32 %v8750_v55, %v3140_v20  ;;  %v8278_v55 = vld [vmem:[#allocation9 + $0xc8] sm:$0xff]   ;;  %v8300_v3 = vld [vmem:[#allocation9 + $0xb0] sm:$0xff]   ;;  %v8306_v6 = vld [vmem:[#allocation9 + $0x1c0] sm:$0xff]  }
 0x4f0   :  { %v8310_v20 = vld [vmem:[#allocation9 + $0x1c8] sm:$0xff]  }
 0x4f1   :  { %6195 = vmatpush1.bf16.msra.mxu1 %v7871_v28  ;;  %v8273_v28 = vld [vmem:[#allocation9 + $0x40] sm:$0xff]  }
 0x4f2   :  { %6359 = vmatpush1.bf16.msra.mxu0 %v7873_v24  ;;  %6196 = vmatprep.subr.bf16.mxu1 %v7880_v25  ;;  %v6382_v24 = vmax.f32 %v8085_v22, 0.0  ;;  %v6384_v25 = vmax.f32 %v8087_v41, 0.0  ;;  %v8315_v22 = vld [vmem:[#allocation9 + $0x110] sm:$0xff]  }
 0x4f3   :  { %6360 = vmatprep.subr.bf16.mxu0 %v7882_v26  ;;  %v8275_v26 = vld [vmem:[#allocation9] sm:$0xff]   ;;  %v8316_v41 = vld [vmem:[#allocation9 + $0x190] sm:$0xff]  }
 0x4f4   :  { %v6390_v54 = vpack.c.bf16 %v6382_v24, %v6382_v24  ;;  %v6392_v31 = vpack.c.bf16 %v6384_v25, %v6384_v25  ;;  %v8321_v24 = vld [vmem:[#allocation9 + $0x160] sm:$0xff]  }
 0x4f5   :  { %6197 = vmatpush1.bf16.msra.mxu1 %v7879_v35  ;;  %v8280_v35 = vld [vmem:[#allocation9 + $0x88] sm:$0xff]   ;;  %v8322_v25 = vld [vmem:[#allocation9 + $0x1e0] sm:$0xff]  }
 0x4f6   :  { %6361 = vmatpush1.bf16.msra.mxu0 %v7881_v36  ;;  %6198 = vmatprep.subr.bf16.mxu1 %v7888_v39  ;;  %v8281_v36 = vld [vmem:[#allocation9 + $0x50] sm:$0xff]  }
 0x4f7   :  { %6362 = vmatprep.subr.bf16.mxu0 %v7890_v40  ;;  %v8282_v39 = vld [vmem:[#allocation9 + $0xd0] sm:$0xff]  }
 0x4f8   :  { %v8283_v40 = vld [vmem:[#allocation9 + $0x10] sm:$0xff]  }
 0x4f9   :  { %6199 = vmatpush1.bf16.msra.mxu1 %v7887_v17  ;;  %v8289_v17 = vld [vmem:[#allocation9 + $0x60] sm:$0xff]  }
 0x4fa   :  { %6363 = vmatpush1.bf16.msra.mxu0 %v7889_v52  ;;  %6200 = vmatprep.subr.bf16.mxu1 %v7896_v53  ;;  %v8290_v52 = vld [vmem:[#allocation9 + $0xe0] sm:$0xff]  }
 0x4fb   :  { %6364 = vmatprep.subr.bf16.mxu0 %v7898_v48  ;;  %v8291_v53 = vld [vmem:[#allocation9 + $0x20] sm:$0xff]  }
 0x4fc   :  { %v8292_v48 = vld [vmem:[#allocation9 + $0xa0] sm:$0xff]  }
 0x4fd   :  { %6201 = vmatpush1.bf16.msra.mxu1 %v7895_v29  ;;  %v8296_v29 = vld [vmem:[#allocation9 + $0xa8] sm:$0xff]  }
 0x4fe   :  { %6365 = vmatpush1.bf16.msra.mxu0 %v7897_v62  ;;  %6202 = vmatprep.subr.bf16.mxu1 %v7904_v63  ;;  %v8297_v62 = vld [vmem:[#allocation9 + $0x70] sm:$0xff]   ;;  %v3136_v63 = vrot.slane %v8752_v37, %v8650_v46  ;;  %v8304_v46 = vld [vmem:[#allocation9 + $0xb8] sm:$0xff]  }
 0x4ff   :  { %6366 = vmatprep.subr.bf16.mxu0 %v7906_v4  ;;  %v8298_v4 = vld [vmem:[#allocation9 + $0xf0] sm:$0xff]  }
 0x501   :  { %6203 = vmatpush1.bf16.msra.mxu1 %v7903_v21  ;;  %v8086_v21 = vadd.f32 %v8746_v51, %v3136_v63 }
 0x502   :  { %6367 = vmatpush1.bf16.msra.mxu0 %v7905_v7  ;;  %6204 = vmatprep.subr.bf16.mxu1 %v7912_v8  ;;  %v8303_v7 = vld [vmem:[#allocation9 + $0x38] sm:$0xff]   ;;  %v6381_v8 = vmax.f32 %v8084_v2, 0.0 }
 0x503   :  { %6368 = vmatprep.subr.bf16.mxu0 %v7914_v9  ;;  %v8305_v9 = vld [vmem:[#allocation9 + $0x140] sm:$0xff]   ;;  %v6383_v10 = vmax.f32 %v8086_v21, 0.0 }
 0x504   :  { %v6389_v11 = vpack.c.bf16 %v6381_v8, %v6381_v8 }
 0x505   :  { %6205 = vmatpush1.bf16.msra.mxu1 %v7911_v13  ;;  %v6391_v51 = vpack.c.bf16 %v6383_v10, %v6383_v10  ;;  %v8311_v13 = vld [vmem:[#allocation9 + $0x108] sm:$0xff]  }
 0x506   :  { %6369 = vmatpush1.bf16.msra.mxu0 %v7913_v14  ;;  %6206 = vmatprep.subr.bf16.mxu1 %v7920_v43  ;;  %v8312_v14 = vld [vmem:[#allocation9 + $0x188] sm:$0xff]   ;;  %v8313_v43 = vld [vmem:[#allocation9 + $0x150] sm:$0xff]  }
 0x507   :  { %6370 = vmatprep.subr.bf16.mxu0 %v7922_v19  ;;  %v8314_v19 = vld [vmem:[#allocation9 + $0x1d0] sm:$0xff]  }
 0x509   :  { %6207 = vmatpush1.bf16.msra.mxu1 %v7919_v23  ;;  %v8317_v23 = vld [vmem:[#allocation9 + $0x158] sm:$0xff]  }
 0x50a   :  { %6371 = vmatpush1.bf16.msra.mxu0 %v7921_v18  ;;  %7988 = vmatprep.subr.bf16.mxu1 %v8273_v28  ;;  %v8318_v18 = vld [vmem:[#allocation9 + $0x1d8] sm:$0xff]  }
 0x50b   :  { %8010 = vmatprep.subr.bf16.mxu0 %v8274_v38  ;;  %v8319_v28 = vld [vmem:[#allocation9 + $0x118] sm:$0xff]  }
 0x50c   :  { %6209 = vmatmul.mubr.bf16.vlgmr.msra.gmra.mrb[16].mxu1 %v8726_v12  ;;  %v8320_v38 = vld [vmem:[#allocation9 + $0x198] sm:$0xff]  }
 0x50d   :  { %6373 = vmatmul.mubr.bf16.vlgmr.msra.gmra.mrb[20].mxu0 %v8726_v12  ;;  %7989 = vmatpush3.bf16.msra.mxu1 %v8275_v26  ;;  %v8287_v12 = vld [vmem:[#allocation9 + $0x18] sm:$0xff]   ;;  %v8323_v26 = vld [vmem:[#allocation9 + $0x120] sm:$0xff]  }
 0x50e   :  { %6948 = vmatprep.mubr.bf16.mxu1 %v6390_v54  ;;  %8011 = vmatpush3.bf16.msra.mxu0 %v8276_v27  ;;  %v8324_v27 = vld [vmem:[#allocation9 + $0x1a0] sm:$0xff]   ;;  %v8326_v54 = vld [vmem:[#allocation9 + $0x1e8] sm:$0xff]  }
 0x50f   :  { %6988 = vmatprep.mubr.bf16.mxu0 %v6392_v31  ;;  %7990 = vmatprep.subr.bf16.mxu1 %v8277_v30  ;;  %v8325_v30 = vld [vmem:[#allocation9 + $0x168] sm:$0xff]  }
 0x510   :  { %8012 = vmatprep.subr.bf16.mxu0 %v8278_v55  ;;  %v8327_v55 = vld [vmem:[#allocation9 + $0x128] sm:$0xff]  }
 0x511   :  { %7991 = vmatpush3.bf16.msra.mxu1 %v8279_v34  ;;  %v8328_v31 = vld [vmem:[#allocation9 + $0x1a8] sm:$0xff]   ;;  %v8329_v34 = vld [vmem:[#allocation9 + $0x170] sm:$0xff]  }
 0x512   :  { %8013 = vmatpush3.bf16.msra.mxu0 %v8280_v35  ;;  %7992 = vmatprep.subr.bf16.mxu1 %v8281_v36  ;;  %v8330_v35 = vld [vmem:[#allocation9 + $0x1f0] sm:$0xff]  }
 0x513   :  { %8014 = vmatprep.subr.bf16.mxu0 %v8282_v39  ;;  %v8331_v36 = vld [vmem:[#allocation9 + $0x130] sm:$0xff]  }
 0x514   :  { %v8332_v39 = vld [vmem:[#allocation9 + $0x1b0] sm:$0xff]  }
 0x515   :  { %7993 = vmatpush3.bf16.msra.mxu1 %v8283_v40  ;;  %v8333_v40 = vld [vmem:[#allocation9 + $0x178] sm:$0xff]  }
 0x516   :  { %8015 = vmatpush3.bf16.msra.mxu0 %v8284_v44  ;;  %7994 = vmatprep.subr.bf16.mxu1 %v8285_v0  ;;  %v8334_v44 = vld [vmem:[#allocation9 + $0x1f8] sm:$0xff]  }
 0x517   :  { %8016 = vmatprep.subr.bf16.mxu0 %v8286_v60  ;;  %v8335_v0 = vld [vmem:[#allocation9 + $0x138] sm:$0xff]  }
 0x518   :  { %v8336_v60 = vld [vmem:[#allocation9 + $0x1b8] sm:$0xff]  }
 0x519   :  { %7995 = vmatpush3.bf16.msra.mxu1 %v8287_v12  ;;  %v3144_v12 = vrot.slane %v8752_v37, %v965_v42 }
 0x51a   :  { %8017 = vmatpush3.bf16.msra.mxu0 %v8288_v47  ;;  %7996 = vmatprep.subr.bf16.mxu1 %v8289_v17  ;;  %v3152_v47 = vrot.slane %v8752_v37, %v973_v33  ;;  %v3148_v17 = vrot.slane %v8752_v37, %v969_v45 }
 0x51b   :  { %8018 = vmatprep.subr.bf16.mxu0 %v8290_v52  ;;  %v3156_v52 = vrot.slane %v8752_v37, %v977_v49 }
 0x51d   :  { %7997 = vmatpush3.bf16.msra.mxu1 %v8291_v53 }
 0x51e   :  { %8019 = vmatpush3.bf16.msra.mxu0 %v8292_v48  ;;  %7998 = vmatprep.subr.bf16.mxu1 %v8293_v56 }
 0x51f   :  { %8020 = vmatprep.subr.bf16.mxu0 %v8294_v61 }
 0x521   :  { %7999 = vmatpush3.bf16.msra.mxu1 %v8295_v58 }
 0x522   :  { %8021 = vmatpush3.bf16.msra.mxu0 %v8296_v29  ;;  %8000 = vmatprep.subr.bf16.mxu1 %v8297_v62 }
 0x523   :  { %8022 = vmatprep.subr.bf16.mxu0 %v8298_v4 }
 0x525   :  { %8001 = vmatpush3.bf16.msra.mxu1 %v8299_v1 }
 0x526   :  { %8023 = vmatpush3.bf16.msra.mxu0 %v8300_v3  ;;  %8002 = vmatprep.subr.bf16.mxu1 %v8301_v5 }
 0x527   :  { %8024 = vmatprep.subr.bf16.mxu0 %v8302_v16 }
 0x529   :  { %8003 = vmatpush3.bf16.msra.mxu1 %v8303_v7  ;;  %v7923_v7 = vld [vmem:[#allocation10 + $0x16] ss:$0 sm:$0xff] }
 0x52a   :  { %8025 = vmatpush3.bf16.msra.mxu0 %v8304_v46  ;;  %8032 = vmatprep.subr.bf16.mxu1 %v8305_v9 }
 0x52b   :  { %8054 = vmatprep.subr.bf16.mxu0 %v8306_v6 }
 0x52c   :  { %6949 = vmatmul.mubr.bf16.vlgmr.msra.gmra.mrb[20].mxu1 %v6389_v11 }
 0x52d   :  { %6989 = vmatmul.mubr.bf16.vlgmr.msra.gmra.mrb[24].mxu0 %v6391_v51  ;;  %8033 = vmatpush3.bf16.msra.mxu1 %v8307_v50 }
 0x52e   :  { %8055 = vmatpush3.bf16.msra.mxu0 %v8308_v57  ;;  %8034 = vmatprep.subr.bf16.mxu1 %v8309_v32 }
 0x52f   :  { %8056 = vmatprep.subr.bf16.mxu0 %v8310_v20 }
 0x531   :  { %8035 = vmatpush3.bf16.msra.mxu1 %v8311_v13 }
 0x532   :  { %8057 = vmatpush3.bf16.msra.mxu0 %v8312_v14  ;;  %8036 = vmatprep.subr.bf16.mxu1 %v8313_v43 }
 0x533   :  { %8058 = vmatprep.subr.bf16.mxu0 %v8314_v19 }
 0x535   :  { %8037 = vmatpush3.bf16.msra.mxu1 %v8315_v22 }
 0x536   :  { %8059 = vmatpush3.bf16.msra.mxu0 %v8316_v41  ;;  %8038 = vmatprep.subr.bf16.mxu1 %v8317_v23 }
 0x537   :  { %8060 = vmatprep.subr.bf16.mxu0 %v8318_v18 }
 0x539   :  { %8039 = vmatpush3.bf16.msra.mxu1 %v8319_v28 }
 0x53a   :  { %8061 = vmatpush3.bf16.msra.mxu0 %v8320_v38  ;;  %8040 = vmatprep.subr.bf16.mxu1 %v8321_v24 }
 0x53b   :  { %8062 = vmatprep.subr.bf16.mxu0 %v8322_v25 }
 0x53d   :  { %8041 = vmatpush3.bf16.msra.mxu1 %v8323_v26 }
 0x53e   :  { %8063 = vmatpush3.bf16.msra.mxu0 %v8324_v27  ;;  %8042 = vmatprep.subr.bf16.mxu1 %v8325_v30 }
 0x53f   :  { %8064 = vmatprep.subr.bf16.mxu0 %v8326_v54 }
 0x541   :  { %8043 = vmatpush3.bf16.msra.mxu1 %v8327_v55 }
 0x542   :  { %8065 = vmatpush3.bf16.msra.mxu0 %v8328_v31  ;;  %8044 = vmatprep.subr.bf16.mxu1 %v8329_v34 }
 0x543   :  { %8066 = vmatprep.subr.bf16.mxu0 %v8330_v35 }
 0x545   :  { %8045 = vmatpush3.bf16.msra.mxu1 %v8331_v36 }
 0x546   :  { %8067 = vmatpush3.bf16.msra.mxu0 %v8332_v39  ;;  %8046 = vmatprep.subr.bf16.mxu1 %v8333_v40 }
 0x547   :  { %8068 = vmatprep.subr.bf16.mxu0 %v8334_v44 }
 0x549   :  { %8047 = vmatpush3.bf16.msra.mxu1 %v8335_v0 }
 0x54a   :  { %8069 = vmatpush3.bf16.msra.mxu0 %v8336_v60 }
 0x5df   :  { %v6210_v53 = vpop.f32.mrb[16].mxu1 }
 0x5e0   :  { %v8088_v48 = vadd.f32 %v6210_v53, %v3144_v12  ;;  %v6374_v56 = vpop.f32.mrb[20].mxu0  ;;  %v6212_v61 = vpop.f32.mrb[17].mxu1 }
 0x5e1   :  { %v8090_v58 = vadd.f32 %v6374_v56, %v3152_v47  ;;  %v8089_v59 = vadd.f32 %v6212_v61, %v3148_v17  ;;  %v6376_v29 = vpop.f32.mrb[21].mxu0  ;;  %v6214_v42 = vpop.f32.mrb[18].mxu1 }
 0x5e2   :  { %v6385_v62 = vmax.f32 %v8088_v48, 0.0  ;;  %v8091_v63 = vadd.f32 %v6376_v29, %v3156_v52  ;;  %v6378_v4 = vpop.f32.mrb[22].mxu0  ;;  %v6215_v33 = vpop.f32.mrb[19].mxu1 }
 0x5e3   :  { %v6387_v1 = vmax.f32 %v8090_v58, 0.0  ;;  %v6386_v2 = vmax.f32 %v8089_v59, 0.0  ;;  %v6379_v3 = vpop.f32.mrb[23].mxu0 }
 0x5e4   :  { %v6388_v45 = vmax.f32 %v8091_v63, 0.0  ;;  %v6393_v15 = vpack.c.bf16 %v6385_v62, %v6385_v62 }
 0x5e5   :  { %v6394_v5 = vpack.c.bf16 %v6386_v2, %v6386_v2  ;;  %v6395_v49 = vpack.c.bf16 %v6387_v1, %v6387_v1 }
 0x5e6   :  { %v6396_v21 = vpack.c.bf16 %v6388_v45, %v6388_v45 }
 0x5e7   :  { %7028 = vmatprep.mubr.bf16.mxu1 %v6394_v5 }
 0x5e8   :  { %7068 = vmatprep.mubr.bf16.mxu0 %v6396_v21  ;;  %7029 = vmatmul.mubr.bf16.vlgmr.msra.gmra.mrb[24].mxu1 %v6393_v15 }
 0x5e9   :  { %7069 = vmatmul.mubr.bf16.vlgmr.msra.gmra.mrb[28].mxu0 %v6395_v49 }
 0x5ff   :  { %v8004_v37 = vpop.f32.mrb[20].mxu1 }
 0x600   :  { %v8026_v16 = vpop.f32.mrb[24].mxu0  ;;  %v8005_v8 = vpop.f32.mrb[21].mxu1 }
 0x601   :  { %v8006_v46 = vadd.f32 %v8005_v8, %v8004_v37  ;;  %v8027_v9 = vpop.f32.mrb[25].mxu0  ;;  %v8007_v10 = vpop.f32.mrb[22].mxu1 }
 0x602   :  { %v8028_v6 = vadd.f32 %v8027_v9, %v8026_v16  ;;  %v8029_v50 = vpop.f32.mrb[26].mxu0  ;;  %v8008_v11 = vpop.f32.mrb[23].mxu1 }
 0x603   :  { %v6951_v57 = vadd.f32 %v8006_v46, %v7923_v7  ;;  %v8030_v32 = vpop.f32.mrb[27].mxu0 }
 0x605   :  { %v6991_v51 = vadd.f32 %v8028_v6, %v6951_v57 }
 0x6bb   :  { %v8048_v20 = vpop.f32.mrb[24].mxu1 }
 0x6bc   :  { %v8070_v13 = vpop.f32.mrb[28].mxu0  ;;  %v8049_v14 = vpop.f32.mrb[25].mxu1 }
 0x6bd   :  { %v8050_v43 = vadd.f32 %v8049_v14, %v8048_v20  ;;  %v8071_v19 = vpop.f32.mrb[29].mxu0  ;;  %v8051_v22 = vpop.f32.mrb[26].mxu1 }
 0x6be   :  { %v8072_v41 = vadd.f32 %v8071_v19, %v8070_v13  ;;  %v8073_v23 = vpop.f32.mrb[30].mxu0  ;;  %v8052_v18 = vpop.f32.mrb[27].mxu1 }
 0x6bf   :  { %v7031_v28 = vadd.f32 %v8050_v43, %v6991_v51  ;;  %v8074_v38 = vpop.f32.mrb[31].mxu0 }
 0x6c1   :  { %v7071_v24 = vadd.f32 %v8072_v41, %v7031_v28 }
 0x6c3   :  { %v7076_v25 = vmax.f32 %v7071_v24, 0.0 }
 0x6c5   :  { %7077 = vst [vmem:[%s8790_s7] sm:$0xff] %v7076_v25 }
 0x6c6   :  { %7082 = vsyncpa [#allocation3], 1 }
 0x6c7   :  { %7083 = vsyncpa [#allocation5], 1 }
 0x6c8   :  { %7084 = vsyncpa [#allocation8], 1 }
 0x6c9   :  { %7085 = vsyncpa [#allocation11], 1 }

</bundles_post_ra>
